<compile_context>
chip_gen: v5e
topology: v5e:2x2
jax: 0.10.0
libtpu: 0.0.40
codegen_flags: <defaults>
</compile_context>

<pallas_src>
import functools

import numpy as np

import jax
import jax.numpy as jnp
from jax.experimental import pallas as pl
from jax.experimental.pallas import tpu as pltpu


# ---------------------------------------------------------------------------
# Host-side (numpy) precomputed 0/1 gather masks, one tensor per layer.
# G[t, p, q] = 1 iff flattened input pixel p feeds flattened output pixel q at
# kernel tap t (t = i*K + j).  Taps with no source (outside the zero-padded
# conv support / outside the transposed-conv scatter range) contribute 0, which
# is exactly the conv / convT semantics.  Both max-pools have pad=0 and fully
# covered windows, so every pool tap is valid and max-over-taps never sees a
# spurious 0 from a missing tap.
# ---------------------------------------------------------------------------
def _conv_gather_masks(h_in, w_in, h_out, w_out, k, stride, pad):
    hw_in, hw_out = h_in * w_in, h_out * w_out
    yo, xo = np.meshgrid(np.arange(h_out), np.arange(w_out), indexing="ij")
    yo, xo = yo.reshape(-1), xo.reshape(-1)
    q = np.arange(hw_out)
    g = np.zeros((k * k, hw_in, hw_out), np.float32)
    for i in range(k):
        for j in range(k):
            yi = yo * stride + i - pad
            xi = xo * stride + j - pad
            valid = (yi >= 0) & (yi < h_in) & (xi >= 0) & (xi < w_in)
            p = yi * w_in + xi
            g[i * k + j, p[valid], q[valid]] = 1.0
    return g


def _convT_gather_masks(h_in, w_in, h_out, w_out, k, stride):
    # Scatter form: output (yo, xo) receives tap (i, j) from input (yi, xi)
    # iff yo = stride*yi + i and xo = stride*xi + j.
    hw_in, hw_out = h_in * w_in, h_out * w_out
    yo, xo = np.meshgrid(np.arange(h_out), np.arange(w_out), indexing="ij")
    yo, xo = yo.reshape(-1), xo.reshape(-1)
    q = np.arange(hw_out)
    g = np.zeros((k * k, hw_in, hw_out), np.float32)
    for i in range(k):
        for j in range(k):
            ny, nx = yo - i, xo - j
            yi, xi = ny // stride, nx // stride
            valid = ((ny >= 0) & (nx >= 0) & (ny % stride == 0) &
                     (nx % stride == 0) & (yi < h_in) & (xi < w_in))
            p = yi * w_in + xi
            g[i * k + j, p[valid], q[valid]] = 1.0
    return g


_G_C1 = _conv_gather_masks(16, 16, 16, 16, 3, 1, 1)   # Conv(1->8, k3, s1, p1): (9, 256, 256)
_G_P1 = _conv_gather_masks(16, 16, 8, 8, 2, 2, 0)     # MaxPool(2, s2)        : (4, 256, 64)
_G_C2 = _conv_gather_masks(8, 8, 4, 4, 3, 2, 1)       # Conv(8->4, k3, s2, p1): (9, 64, 16)
_G_P2 = _conv_gather_masks(4, 4, 3, 3, 2, 1, 0)       # MaxPool(2, s1)        : (4, 16, 9)
_G_T1 = _convT_gather_masks(3, 3, 7, 7, 3, 2)         # ConvT(4->8, k3, s2)   : (9, 9, 49)
_G_T2 = _convT_gather_masks(7, 7, 15, 15, 3, 2)       # ConvT(8->4, k3, s2)   : (9, 49, 225)
_G_T3 = _convT_gather_masks(15, 15, 16, 16, 2, 1)     # ConvT(4->3, k2, s1)   : (4, 225, 256)


# ---------------------------------------------------------------------------
# The single fused Pallas kernel.
# Activations are (N*C, H*W) f32 matrices (n-major rows, lane-dense columns).
# ---------------------------------------------------------------------------
def _autoencoder_kernel(
    n, k_pad,
    x_ref,
    w1_ref, w2_ref, w3_ref, w4_ref, w5_ref,
    g_c1_ref, g_p1_ref, g_c2_ref, g_p2_ref, g_t1_ref, g_t2_ref, g_t3_ref,
    out_ref,
    s1_ref, s2_ref, s3_ref, s4_ref, s5_ref,
):
    def conv_like(x, g_ref, w_ref, s_ref, taps, nc_in, act):
        # 1) gather all taps (bf16 activations x bf16 0/1 masks on the MXU,
        #    f32 accumulate) into 8-aligned sublane blocks of one VMEM scratch,
        # 2) write a ones row (bias folded into the weight matrix),
        # 3) ONE f32 weight matmul with K = taps*nc_in + 1 for the whole layer.
        xb = x.astype(jnp.bfloat16)
        for t in range(taps):
            s_ref[t * nc_in:(t + 1) * nc_in, :] = jnp.dot(
                xb, g_ref[t], preferred_element_type=jnp.float32)
        s_ref[taps * nc_in:taps * nc_in + 1, :] = jnp.ones(
            (1, s_ref.shape[1]), jnp.float32)
        y = jnp.dot(w_ref[...], s_ref[...], preferred_element_type=jnp.float32)
        return jnp.maximum(y, 0.0) if act == "relu" else jnp.tanh(y)

    def pool_like(x, g_ref, taps):
        # MaxPool fused: elementwise max over the gathered window taps.
        xb = x.astype(jnp.bfloat16)
        out = None
        for t in range(taps):
            v = jnp.dot(xb, g_ref[t], preferred_element_type=jnp.float32)
            out = v if out is None else jnp.maximum(out, v)
        return out

    x = x_ref[...]                                                  # (k_pad, 256)
    x = conv_like(x, g_c1_ref, w1_ref, s1_ref, 9, k_pad, "relu")    # (n*8, 256)
    x = pool_like(x, g_p1_ref, 4)                                   # (n*8, 64)
    x = conv_like(x, g_c2_ref, w2_ref, s2_ref, 9, n * 8, "relu")    # (n*4, 16)
    x = pool_like(x, g_p2_ref, 4)                                   # (n*4, 9)
    x = conv_like(x, g_t1_ref, w3_ref, s3_ref, 9, n * 4, "relu")    # (n*8, 49)
    x = conv_like(x, g_t2_ref, w4_ref, s4_ref, 9, n * 8, "relu")    # (n*4, 225)
    x = conv_like(x, g_t3_ref, w5_ref, s5_ref, 4, n * 4, "tanh")    # (n*3, 256)
    out_ref[...] = x


# ---------------------------------------------------------------------------
# Parameter preprocessing (tiny; batch folded into the channel dim via kron).
# ---------------------------------------------------------------------------
def _expand_taps(taps, n):
    # (T, C_out, C_in) -> block-diagonal (T, n*C_out, n*C_in), n-major rows/cols.
    t, a, b = taps.shape
    eye = jnp.eye(n, dtype=taps.dtype)
    return jnp.einsum("tab,nm->tnamb", taps, eye).reshape(t, n * a, n * b)


def _conv_taps(w):
    # PyTorch Conv2d weight (C_out, C_in, K, K) -> (K*K, C_out, C_in), tap = i*K + j.
    c_out, c_in, kh, kw = w.shape
    return jnp.transpose(w.astype(jnp.float32), (2, 3, 0, 1)).reshape(kh * kw, c_out, c_in)


def _convT_taps(w):
    # PyTorch ConvTranspose2d weight (C_in, C_out, K, K) -> (K*K, C_out, C_in).
    c_in, c_out, kh, kw = w.shape
    return jnp.transpose(w.astype(jnp.float32), (2, 3, 1, 0)).reshape(kh * kw, c_out, c_in)


def _prep_layer(w_taps, b, n, k_in_pad=None):
    # -> W_cat (n*C_out, T*NC_in + 1); column order matches the scratch row order
    #    (tap-major, nc-minor); last column is the bias (multiplies the ones row).
    wt = _expand_taps(w_taps, n)                               # (T, n*C_out, n*C_in)
    t, a, c = wt.shape
    if k_in_pad is not None and k_in_pad > c:
        wt = jnp.concatenate(
            [wt, jnp.zeros((t, a, k_in_pad - c), jnp.float32)], axis=2)
        c = k_in_pad
    w_cat = jnp.transpose(wt, (1, 0, 2)).reshape(a, t * c)
    b_col = jnp.tile(b.astype(jnp.float32), n).reshape(a, 1)
    return jnp.concatenate([w_cat, b_col], axis=1)


# ---------------------------------------------------------------------------
# Forward pass (one pallas_call for the whole network).
# ---------------------------------------------------------------------------
def autoencoder_forward(params, x):
    n, c_in, h, w = x.shape
    assert (c_in, h, w) == (1, 16, 16), "kernel is specialized to 1x16x16 inputs"
    hw = h * w
    nc_in = n * c_in
    k_pad = max(8, nc_in)   # pad layer-1 rows to a full sublane tile (zero rows)

    x_flat = jnp.zeros((k_pad, hw), jnp.float32).at[:nc_in].set(
        x.astype(jnp.float32).reshape(nc_in, hw))

    w1 = _prep_layer(_conv_taps(params["enc_w1"]), params["enc_b1"], n, k_in_pad=k_pad)
    w2 = _prep_layer(_conv_taps(params["enc_w2"]), params["enc_b2"], n)
    w3 = _prep_layer(_convT_taps(params["dec_w1"]), params["dec_b1"], n)
    w4 = _prep_layer(_convT_taps(params["dec_w2"]), params["dec_b2"], n)
    w5 = _prep_layer(_convT_taps(params["dec_w3"]), params["dec_b3"], n)

    # bf16 masks are exact 0/1; gather results equal bf16-rounded activations.
    masks = [jnp.asarray(g, jnp.bfloat16)
             for g in (_G_C1, _G_P1, _G_C2, _G_P2, _G_T1, _G_T2, _G_T3)]

    args = [x_flat, w1, w2, w3, w4, w5, *masks]

    out_flat = pl.pallas_call(
        functools.partial(_autoencoder_kernel, n, k_pad),
        out_shape=jax.ShapeDtypeStruct((n * 3, hw), jnp.float32),
        in_specs=[pl.BlockSpec(memory_space=pltpu.MemorySpace.VMEM)] * len(args),
        out_specs=pl.BlockSpec(memory_space=pltpu.MemorySpace.VMEM),
        scratch_shapes=[
            pltpu.VMEM((9 * k_pad + 1, 16 * 16), jnp.float32),   # conv1  gathered taps
            pltpu.VMEM((9 * n * 8 + 1, 4 * 4), jnp.float32),     # conv2
            pltpu.VMEM((9 * n * 4 + 1, 7 * 7), jnp.float32),     # convT1
            pltpu.VMEM((9 * n * 8 + 1, 15 * 15), jnp.float32),   # convT2
            pltpu.VMEM((4 * n * 4 + 1, 16 * 16), jnp.float32),   # convT3
        ],
        compiler_params=pltpu.CompilerParams(vmem_limit_bytes=32 * 1024 * 1024),
    )(*args)

    # Layout plumbing only: (N*3, 256) lane-dense kernel output -> NCHW.
    return out_flat.reshape(n, 3, h, w)


# ---------------------------------------------------------------------------
# Pure-JAX reference (for correctness validation) + parameter init.
# bf16_activations=True mirrors the kernel's single bf16 rounding of each
# layer's input (the only mixed-precision step in the kernel).
# ---------------------------------------------------------------------------
def reference_forward(params, x, *, bf16_activations=False):
    dn = ("NCHW", "OIHW", "NCHW")
    prec = jax.lax.Precision.HIGHEST

    def rnd(v):
        return v.astype(jnp.bfloat16).astype(jnp.float32) if bf16_activations else v

    def conv(x, w, b, stride, padding):
        y = jax.lax.conv_general_dilated(
            rnd(x), w, (stride, stride), [(padding, padding), (padding, padding)],
            dimension_numbers=dn, precision=prec)
        return y + b.reshape(1, -1, 1, 1)

    def convT(x, w, b, stride):
        k = w.shape[2]
        wt = jnp.flip(w, (2, 3)).transpose(1, 0, 2, 3)
        y = jax.lax.conv_general_dilated(
            rnd(x), wt, (1, 1), [(k - 1, k - 1), (k - 1, k - 1)],
            lhs_dilation=(stride, stride), dimension_numbers=dn, precision=prec)
        return y + b.reshape(1, -1, 1, 1)

    def pool(x, k, s):
        return jax.lax.reduce_window(rnd(x), -jnp.inf, jax.lax.max,
                                     (1, 1, k, k), (1, 1, s, s), "VALID")

    x = jax.nn.relu(conv(x, params["enc_w1"], params["enc_b1"], 1, 1))
    x = pool(x, 2, 2)
    x = jax.nn.relu(conv(x, params["enc_w2"], params["enc_b2"], 2, 1))
    x = pool(x, 2, 1)
    x = jax.nn.relu(convT(x, params["dec_w1"], params["dec_b1"], 2))
    x = jax.nn.relu(convT(x, params["dec_w2"], params["dec_b2"], 2))
    x = jnp.tanh(convT(x, params["dec_w3"], params["dec_b3"], 1))
    return x


def init_params(key):
    keys = jax.random.split(key, 10)
    w_ = lambda k, s: jax.random.normal(k, s, jnp.float32) * 0.1
    b_ = lambda k, s: jax.random.normal(k, s, jnp.float32) * 0.01
    return dict(
        enc_w1=w_(keys[0], (8, 1, 3, 3)), enc_b1=b_(keys[1], (8,)),
        enc_w2=w_(keys[2], (4, 8, 3, 3)), enc_b2=b_(keys[3], (4,)),
        dec_w1=w_(keys[4], (4, 8, 3, 3)), dec_b1=b_(keys[5], (8,)),   # ConvTranspose2d(4, 8, 3, s=2)
        dec_w2=w_(keys[6], (8, 4, 3, 3)), dec_b2=b_(keys[7], (4,)),   # ConvTranspose2d(8, 4, 3, s=2)
        dec_w3=w_(keys[8], (4, 3, 2, 2)), dec_b3=b_(keys[9], (3,)),   # ConvTranspose2d(4, 3, 2, s=1)
    )


if __name__ == "__main__":
    key = jax.random.PRNGKey(0)
    pkey, xkey = jax.random.split(key)
    params = init_params(pkey)
    # grayscale image batch: (N=2, C=1, H=16, W=16), NCHW like PyTorch
    x = jax.random.normal(xkey, (2, 1, 16, 16), jnp.float32)

    fwd = jax.jit(autoencoder_forward)
    out = jax.block_until_ready(fwd(params, x))

    ref_matched = jax.block_until_ready(
        reference_forward(params, x, bf16_activations=True))
    ref_f32 = jax.block_until_ready(reference_forward(params, x))

    assert out.shape == (2, 3, 16, 16), out.shape
    assert bool(jnp.all(jnp.abs(out) <= 1.0)), "tanh output must be in [-1, 1]"
    # Tight check against a reference that mirrors the kernel's bf16 activation
    # rounding (only remaining diffs: f32 accumulation order, tanh approx).
    err_m = float(jnp.max(jnp.abs(out - ref_matched)))
    assert err_m < 2e-3, f"mismatch vs bf16-matched reference: max abs err = {err_m}"
    # Loose check against the pure-f32 reference (bf16 gather drift budget).
    err_f = float(jnp.max(jnp.abs(out - ref_f32)))
    assert err_f < 5e-2, f"mixed-precision drift vs f32 reference: max abs err = {err_f}"
    print("KERNEL_OK")
</pallas_src>

<mosaic_0001>
module attributes {stable_mosaic.version = 11 : i64} {
  func.func @_autoencoder_kernel(%arg0: memref<8x256xf32, #tpu.memory_space<vmem>>, %arg1: memref<16x73xf32, #tpu.memory_space<vmem>>, %arg2: memref<8x145xf32, #tpu.memory_space<vmem>>, %arg3: memref<16x73xf32, #tpu.memory_space<vmem>>, %arg4: memref<8x145xf32, #tpu.memory_space<vmem>>, %arg5: memref<6x33xf32, #tpu.memory_space<vmem>>, %arg6: memref<9x256x256xbf16, #tpu.memory_space<vmem>>, %arg7: memref<4x256x64xbf16, #tpu.memory_space<vmem>>, %arg8: memref<9x64x16xbf16, #tpu.memory_space<vmem>>, %arg9: memref<4x16x9xbf16, #tpu.memory_space<vmem>>, %arg10: memref<9x9x49xbf16, #tpu.memory_space<vmem>>, %arg11: memref<9x49x225xbf16, #tpu.memory_space<vmem>>, %arg12: memref<4x225x256xbf16, #tpu.memory_space<vmem>>, %arg13: memref<6x256xf32, #tpu.memory_space<vmem>>, %arg14: memref<73x256xf32, #tpu.memory_space<vmem>>, %arg15: memref<145x16xf32, #tpu.memory_space<vmem>>, %arg16: memref<73x49xf32, #tpu.memory_space<vmem>>, %arg17: memref<145x225xf32, #tpu.memory_space<vmem>>, %arg18: memref<33x256xf32, #tpu.memory_space<vmem>>) attributes {dimension_semantics = [], scalar_prefetch = 0 : i64, scratch_operands = 5 : i64, tpu.core_type = #tpu.core_type<tc>} {
    %c0 = arith.constant 0 : index
    %c0_0 = arith.constant 0 : index
    %0 = vector.load %arg0[%c0, %c0_0] : memref<8x256xf32, #tpu.memory_space<vmem>>, vector<8x256xf32>
    %1 = arith.truncf %0 : vector<8x256xf32> to vector<8x256xbf16>
    %c0_1 = arith.constant 0 : index
    %c0_2 = arith.constant 0 : index
    %c0_3 = arith.constant 0 : index
    %2 = vector.load %arg6[%c0_1, %c0_2, %c0_3] : memref<9x256x256xbf16, #tpu.memory_space<vmem>>, vector<1x256x256xbf16>
    %3 = vector.shape_cast %2 : vector<1x256x256xbf16> to vector<256x256xbf16>
    %cst = arith.constant dense<0.000000e+00> : vector<8x256xf32>
    %4 = tpu.matmul %1, %3, %cst {dimension_numbers = #tpu.dot_dimension_numbers<[1], [0], [0], [1], [0, 0, 1, 1], [], []>} : vector<8x256xbf16>, vector<256x256xbf16>, vector<8x256xf32> -> vector<8x256xf32>
    %c0_4 = arith.constant 0 : index
    %c0_5 = arith.constant 0 : index
    %5 = vector.load %arg14[%c0_4, %c0_5] : memref<73x256xf32, #tpu.memory_space<vmem>>, vector<8x256xf32>
    tpu.vector_store %arg14[%c0_4, %c0_5], %4 {strides = array<i32>} : memref<73x256xf32, #tpu.memory_space<vmem>>, vector<8x256xf32>,
    %c1 = arith.constant 1 : index
    %c0_6 = arith.constant 0 : index
    %c0_7 = arith.constant 0 : index
    %6 = vector.load %arg6[%c1, %c0_6, %c0_7] : memref<9x256x256xbf16, #tpu.memory_space<vmem>>, vector<1x256x256xbf16>
    %7 = vector.shape_cast %6 : vector<1x256x256xbf16> to vector<256x256xbf16>
    %cst_8 = arith.constant dense<0.000000e+00> : vector<8x256xf32>
    %8 = tpu.matmul %1, %7, %cst_8 {dimension_numbers = #tpu.dot_dimension_numbers<[1], [0], [0], [1], [0, 0, 1, 1], [], []>} : vector<8x256xbf16>, vector<256x256xbf16>, vector<8x256xf32> -> vector<8x256xf32>
    %c8 = arith.constant 8 : index
    %c0_9 = arith.constant 0 : index
    %9 = vector.load %arg14[%c8, %c0_9] : memref<73x256xf32, #tpu.memory_space<vmem>>, vector<8x256xf32>
    tpu.vector_store %arg14[%c8, %c0_9], %8 {strides = array<i32>} : memref<73x256xf32, #tpu.memory_space<vmem>>, vector<8x256xf32>,
    %c2 = arith.constant 2 : index
    %c0_10 = arith.constant 0 : index
    %c0_11 = arith.constant 0 : index
    %10 = vector.load %arg6[%c2, %c0_10, %c0_11] : memref<9x256x256xbf16, #tpu.memory_space<vmem>>, vector<1x256x256xbf16>
    %11 = vector.shape_cast %10 : vector<1x256x256xbf16> to vector<256x256xbf16>
    %cst_12 = arith.constant dense<0.000000e+00> : vector<8x256xf32>
    %12 = tpu.matmul %1, %11, %cst_12 {dimension_numbers = #tpu.dot_dimension_numbers<[1], [0], [0], [1], [0, 0, 1, 1], [], []>} : vector<8x256xbf16>, vector<256x256xbf16>, vector<8x256xf32> -> vector<8x256xf32>
    %c16 = arith.constant 16 : index
    %c0_13 = arith.constant 0 : index
    %13 = vector.load %arg14[%c16, %c0_13] : memref<73x256xf32, #tpu.memory_space<vmem>>, vector<8x256xf32>
    tpu.vector_store %arg14[%c16, %c0_13], %12 {strides = array<i32>} : memref<73x256xf32, #tpu.memory_space<vmem>>, vector<8x256xf32>,
    %c3 = arith.constant 3 : index
    %c0_14 = arith.constant 0 : index
    %c0_15 = arith.constant 0 : index
    %14 = vector.load %arg6[%c3, %c0_14, %c0_15] : memref<9x256x256xbf16, #tpu.memory_space<vmem>>, vector<1x256x256xbf16>
    %15 = vector.shape_cast %14 : vector<1x256x256xbf16> to vector<256x256xbf16>
    %cst_16 = arith.constant dense<0.000000e+00> : vector<8x256xf32>
    %16 = tpu.matmul %1, %15, %cst_16 {dimension_numbers = #tpu.dot_dimension_numbers<[1], [0], [0], [1], [0, 0, 1, 1], [], []>} : vector<8x256xbf16>, vector<256x256xbf16>, vector<8x256xf32> -> vector<8x256xf32>
    %c24 = arith.constant 24 : index
    %c0_17 = arith.constant 0 : index
    %17 = vector.load %arg14[%c24, %c0_17] : memref<73x256xf32, #tpu.memory_space<vmem>>, vector<8x256xf32>
    tpu.vector_store %arg14[%c24, %c0_17], %16 {strides = array<i32>} : memref<73x256xf32, #tpu.memory_space<vmem>>, vector<8x256xf32>,
    %c4 = arith.constant 4 : index
    %c0_18 = arith.constant 0 : index
    %c0_19 = arith.constant 0 : index
    %18 = vector.load %arg6[%c4, %c0_18, %c0_19] : memref<9x256x256xbf16, #tpu.memory_space<vmem>>, vector<1x256x256xbf16>
    %19 = vector.shape_cast %18 : vector<1x256x256xbf16> to vector<256x256xbf16>
    %cst_20 = arith.constant dense<0.000000e+00> : vector<8x256xf32>
    %20 = tpu.matmul %1, %19, %cst_20 {dimension_numbers = #tpu.dot_dimension_numbers<[1], [0], [0], [1], [0, 0, 1, 1], [], []>} : vector<8x256xbf16>, vector<256x256xbf16>, vector<8x256xf32> -> vector<8x256xf32>
    %c32 = arith.constant 32 : index
    %c0_21 = arith.constant 0 : index
    %21 = vector.load %arg14[%c32, %c0_21] : memref<73x256xf32, #tpu.memory_space<vmem>>, vector<8x256xf32>
    tpu.vector_store %arg14[%c32, %c0_21], %20 {strides = array<i32>} : memref<73x256xf32, #tpu.memory_space<vmem>>, vector<8x256xf32>,
    %c5 = arith.constant 5 : index
    %c0_22 = arith.constant 0 : index
    %c0_23 = arith.constant 0 : index
    %22 = vector.load %arg6[%c5, %c0_22, %c0_23] : memref<9x256x256xbf16, #tpu.memory_space<vmem>>, vector<1x256x256xbf16>
    %23 = vector.shape_cast %22 : vector<1x256x256xbf16> to vector<256x256xbf16>
    %cst_24 = arith.constant dense<0.000000e+00> : vector<8x256xf32>
    %24 = tpu.matmul %1, %23, %cst_24 {dimension_numbers = #tpu.dot_dimension_numbers<[1], [0], [0], [1], [0, 0, 1, 1], [], []>} : vector<8x256xbf16>, vector<256x256xbf16>, vector<8x256xf32> -> vector<8x256xf32>
    %c40 = arith.constant 40 : index
    %c0_25 = arith.constant 0 : index
    %25 = vector.load %arg14[%c40, %c0_25] : memref<73x256xf32, #tpu.memory_space<vmem>>, vector<8x256xf32>
    tpu.vector_store %arg14[%c40, %c0_25], %24 {strides = array<i32>} : memref<73x256xf32, #tpu.memory_space<vmem>>, vector<8x256xf32>,
    %c6 = arith.constant 6 : index
    %c0_26 = arith.constant 0 : index
    %c0_27 = arith.constant 0 : index
    %26 = vector.load %arg6[%c6, %c0_26, %c0_27] : memref<9x256x256xbf16, #tpu.memory_space<vmem>>, vector<1x256x256xbf16>
    %27 = vector.shape_cast %26 : vector<1x256x256xbf16> to vector<256x256xbf16>
    %cst_28 = arith.constant dense<0.000000e+00> : vector<8x256xf32>
    %28 = tpu.matmul %1, %27, %cst_28 {dimension_numbers = #tpu.dot_dimension_numbers<[1], [0], [0], [1], [0, 0, 1, 1], [], []>} : vector<8x256xbf16>, vector<256x256xbf16>, vector<8x256xf32> -> vector<8x256xf32>
    %c48 = arith.constant 48 : index
    %c0_29 = arith.constant 0 : index
    %29 = vector.load %arg14[%c48, %c0_29] : memref<73x256xf32, #tpu.memory_space<vmem>>, vector<8x256xf32>
    tpu.vector_store %arg14[%c48, %c0_29], %28 {strides = array<i32>} : memref<73x256xf32, #tpu.memory_space<vmem>>, vector<8x256xf32>,
    %c7 = arith.constant 7 : index
    %c0_30 = arith.constant 0 : index
    %c0_31 = arith.constant 0 : index
    %30 = vector.load %arg6[%c7, %c0_30, %c0_31] : memref<9x256x256xbf16, #tpu.memory_space<vmem>>, vector<1x256x256xbf16>
    %31 = vector.shape_cast %30 : vector<1x256x256xbf16> to vector<256x256xbf16>
    %cst_32 = arith.constant dense<0.000000e+00> : vector<8x256xf32>
    %32 = tpu.matmul %1, %31, %cst_32 {dimension_numbers = #tpu.dot_dimension_numbers<[1], [0], [0], [1], [0, 0, 1, 1], [], []>} : vector<8x256xbf16>, vector<256x256xbf16>, vector<8x256xf32> -> vector<8x256xf32>
    %c56 = arith.constant 56 : index
    %c0_33 = arith.constant 0 : index
    %33 = vector.load %arg14[%c56, %c0_33] : memref<73x256xf32, #tpu.memory_space<vmem>>, vector<8x256xf32>
    tpu.vector_store %arg14[%c56, %c0_33], %32 {strides = array<i32>} : memref<73x256xf32, #tpu.memory_space<vmem>>, vector<8x256xf32>,
    %c8_34 = arith.constant 8 : index
    %c0_35 = arith.constant 0 : index
    %c0_36 = arith.constant 0 : index
    %34 = vector.load %arg6[%c8_34, %c0_35, %c0_36] : memref<9x256x256xbf16, #tpu.memory_space<vmem>>, vector<1x256x256xbf16>
    %35 = vector.shape_cast %34 : vector<1x256x256xbf16> to vector<256x256xbf16>
    %cst_37 = arith.constant dense<0.000000e+00> : vector<8x256xf32>
    %36 = tpu.matmul %1, %35, %cst_37 {dimension_numbers = #tpu.dot_dimension_numbers<[1], [0], [0], [1], [0, 0, 1, 1], [], []>} : vector<8x256xbf16>, vector<256x256xbf16>, vector<8x256xf32> -> vector<8x256xf32>
    %c64 = arith.constant 64 : index
    %c0_38 = arith.constant 0 : index
    %37 = vector.load %arg14[%c64, %c0_38] : memref<73x256xf32, #tpu.memory_space<vmem>>, vector<8x256xf32>
    tpu.vector_store %arg14[%c64, %c0_38], %36 {strides = array<i32>} : memref<73x256xf32, #tpu.memory_space<vmem>>, vector<8x256xf32>,
    %cst_39 = arith.constant 1.000000e+00 : f32
    %38 = vector.broadcast %cst_39 : f32 to vector<1x256xf32>
    %c72 = arith.constant 72 : index
    %c0_40 = arith.constant 0 : index
    %39 = vector.load %arg14[%c72, %c0_40] : memref<73x256xf32, #tpu.memory_space<vmem>>, vector<1x256xf32>
    tpu.vector_store %arg14[%c72, %c0_40], %38 {strides = array<i32>} : memref<73x256xf32, #tpu.memory_space<vmem>>, vector<1x256xf32>,
    %c0_41 = arith.constant 0 : index
    %c0_42 = arith.constant 0 : index
    %40 = vector.load %arg1[%c0_41, %c0_42] : memref<16x73xf32, #tpu.memory_space<vmem>>, vector<16x73xf32>
    %c0_43 = arith.constant 0 : index
    %c0_44 = arith.constant 0 : index
    %41 = vector.load %arg14[%c0_43, %c0_44] : memref<73x256xf32, #tpu.memory_space<vmem>>, vector<73x256xf32>
    %cst_45 = arith.constant dense<0.000000e+00> : vector<16x256xf32>
    %42 = tpu.matmul %40, %41, %cst_45 {dimension_numbers = #tpu.dot_dimension_numbers<[1], [0], [0], [1], [0, 0, 1, 1], [], []>} : vector<16x73xf32>, vector<73x256xf32>, vector<16x256xf32> -> vector<16x256xf32>
    %cst_46 = arith.constant 0.000000e+00 : f32
    %43 = vector.broadcast %cst_46 : f32 to vector<16x256xf32>
    %44 = arith.maximumf %42, %43 : vector<16x256xf32>
    %45 = arith.truncf %44 : vector<16x256xf32> to vector<16x256xbf16>
    %c0_47 = arith.constant 0 : index
    %c0_48 = arith.constant 0 : index
    %c0_49 = arith.constant 0 : index
    %46 = vector.load %arg7[%c0_47, %c0_48, %c0_49] : memref<4x256x64xbf16, #tpu.memory_space<vmem>>, vector<1x256x64xbf16>
    %47 = vector.shape_cast %46 : vector<1x256x64xbf16> to vector<256x64xbf16>
    %cst_50 = arith.constant dense<0.000000e+00> : vector<16x64xf32>
    %48 = tpu.matmul %45, %47, %cst_50 {dimension_numbers = #tpu.dot_dimension_numbers<[1], [0], [0], [1], [0, 0, 1, 1], [], []>} : vector<16x256xbf16>, vector<256x64xbf16>, vector<16x64xf32> -> vector<16x64xf32>
    %c1_51 = arith.constant 1 : index
    %c0_52 = arith.constant 0 : index
    %c0_53 = arith.constant 0 : index
    %49 = vector.load %arg7[%c1_51, %c0_52, %c0_53] : memref<4x256x64xbf16, #tpu.memory_space<vmem>>, vector<1x256x64xbf16>
    %50 = vector.shape_cast %49 : vector<1x256x64xbf16> to vector<256x64xbf16>
    %cst_54 = arith.constant dense<0.000000e+00> : vector<16x64xf32>
    %51 = tpu.matmul %45, %50, %cst_54 {dimension_numbers = #tpu.dot_dimension_numbers<[1], [0], [0], [1], [0, 0, 1, 1], [], []>} : vector<16x256xbf16>, vector<256x64xbf16>, vector<16x64xf32> -> vector<16x64xf32>
    %52 = arith.maximumf %48, %51 : vector<16x64xf32>
    %c2_55 = arith.constant 2 : index
    %c0_56 = arith.constant 0 : index
    %c0_57 = arith.constant 0 : index
    %53 = vector.load %arg7[%c2_55, %c0_56, %c0_57] : memref<4x256x64xbf16, #tpu.memory_space<vmem>>, vector<1x256x64xbf16>
    %54 = vector.shape_cast %53 : vector<1x256x64xbf16> to vector<256x64xbf16>
    %cst_58 = arith.constant dense<0.000000e+00> : vector<16x64xf32>
    %55 = tpu.matmul %45, %54, %cst_58 {dimension_numbers = #tpu.dot_dimension_numbers<[1], [0], [0], [1], [0, 0, 1, 1], [], []>} : vector<16x256xbf16>, vector<256x64xbf16>, vector<16x64xf32> -> vector<16x64xf32>
    %56 = arith.maximumf %52, %55 : vector<16x64xf32>
    %c3_59 = arith.constant 3 : index
    %c0_60 = arith.constant 0 : index
    %c0_61 = arith.constant 0 : index
    %57 = vector.load %arg7[%c3_59, %c0_60, %c0_61] : memref<4x256x64xbf16, #tpu.memory_space<vmem>>, vector<1x256x64xbf16>
    %58 = vector.shape_cast %57 : vector<1x256x64xbf16> to vector<256x64xbf16>
    %cst_62 = arith.constant dense<0.000000e+00> : vector<16x64xf32>
    %59 = tpu.matmul %45, %58, %cst_62 {dimension_numbers = #tpu.dot_dimension_numbers<[1], [0], [0], [1], [0, 0, 1, 1], [], []>} : vector<16x256xbf16>, vector<256x64xbf16>, vector<16x64xf32> -> vector<16x64xf32>
    %60 = arith.maximumf %56, %59 : vector<16x64xf32>
    %61 = arith.truncf %60 : vector<16x64xf32> to vector<16x64xbf16>
    %c0_63 = arith.constant 0 : index
    %c0_64 = arith.constant 0 : index
    %c0_65 = arith.constant 0 : index
    %62 = vector.load %arg8[%c0_63, %c0_64, %c0_65] : memref<9x64x16xbf16, #tpu.memory_space<vmem>>, vector<1x64x16xbf16>
    %63 = vector.shape_cast %62 : vector<1x64x16xbf16> to vector<64x16xbf16>
    %cst_66 = arith.constant dense<0.000000e+00> : vector<16x16xf32>
    %64 = tpu.matmul %61, %63, %cst_66 {dimension_numbers = #tpu.dot_dimension_numbers<[1], [0], [0], [1], [0, 0, 1, 1], [], []>} : vector<16x64xbf16>, vector<64x16xbf16>, vector<16x16xf32> -> vector<16x16xf32>
    %c0_67 = arith.constant 0 : index
    %c0_68 = arith.constant 0 : index
    %65 = vector.load %arg15[%c0_67, %c0_68] : memref<145x16xf32, #tpu.memory_space<vmem>>, vector<16x16xf32>
    tpu.vector_store %arg15[%c0_67, %c0_68], %64 {strides = array<i32>} : memref<145x16xf32, #tpu.memory_space<vmem>>, vector<16x16xf32>,
    %c1_69 = arith.constant 1 : index
    %c0_70 = arith.constant 0 : index
    %c0_71 = arith.constant 0 : index
    %66 = vector.load %arg8[%c1_69, %c0_70, %c0_71] : memref<9x64x16xbf16, #tpu.memory_space<vmem>>, vector<1x64x16xbf16>
    %67 = vector.shape_cast %66 : vector<1x64x16xbf16> to vector<64x16xbf16>
    %cst_72 = arith.constant dense<0.000000e+00> : vector<16x16xf32>
    %68 = tpu.matmul %61, %67, %cst_72 {dimension_numbers = #tpu.dot_dimension_numbers<[1], [0], [0], [1], [0, 0, 1, 1], [], []>} : vector<16x64xbf16>, vector<64x16xbf16>, vector<16x16xf32> -> vector<16x16xf32>
    %c16_73 = arith.constant 16 : index
    %c0_74 = arith.constant 0 : index
    %69 = vector.load %arg15[%c16_73, %c0_74] : memref<145x16xf32, #tpu.memory_space<vmem>>, vector<16x16xf32>
    tpu.vector_store %arg15[%c16_73, %c0_74], %68 {strides = array<i32>} : memref<145x16xf32, #tpu.memory_space<vmem>>, vector<16x16xf32>,
    %c2_75 = arith.constant 2 : index
    %c0_76 = arith.constant 0 : index
    %c0_77 = arith.constant 0 : index
    %70 = vector.load %arg8[%c2_75, %c0_76, %c0_77] : memref<9x64x16xbf16, #tpu.memory_space<vmem>>, vector<1x64x16xbf16>
    %71 = vector.shape_cast %70 : vector<1x64x16xbf16> to vector<64x16xbf16>
    %cst_78 = arith.constant dense<0.000000e+00> : vector<16x16xf32>
    %72 = tpu.matmul %61, %71, %cst_78 {dimension_numbers = #tpu.dot_dimension_numbers<[1], [0], [0], [1], [0, 0, 1, 1], [], []>} : vector<16x64xbf16>, vector<64x16xbf16>, vector<16x16xf32> -> vector<16x16xf32>
    %c32_79 = arith.constant 32 : index
    %c0_80 = arith.constant 0 : index
    %73 = vector.load %arg15[%c32_79, %c0_80] : memref<145x16xf32, #tpu.memory_space<vmem>>, vector<16x16xf32>
    tpu.vector_store %arg15[%c32_79, %c0_80], %72 {strides = array<i32>} : memref<145x16xf32, #tpu.memory_space<vmem>>, vector<16x16xf32>,
    %c3_81 = arith.constant 3 : index
    %c0_82 = arith.constant 0 : index
    %c0_83 = arith.constant 0 : index
    %74 = vector.load %arg8[%c3_81, %c0_82, %c0_83] : memref<9x64x16xbf16, #tpu.memory_space<vmem>>, vector<1x64x16xbf16>
    %75 = vector.shape_cast %74 : vector<1x64x16xbf16> to vector<64x16xbf16>
    %cst_84 = arith.constant dense<0.000000e+00> : vector<16x16xf32>
    %76 = tpu.matmul %61, %75, %cst_84 {dimension_numbers = #tpu.dot_dimension_numbers<[1], [0], [0], [1], [0, 0, 1, 1], [], []>} : vector<16x64xbf16>, vector<64x16xbf16>, vector<16x16xf32> -> vector<16x16xf32>
    %c48_85 = arith.constant 48 : index
    %c0_86 = arith.constant 0 : index
    %77 = vector.load %arg15[%c48_85, %c0_86] : memref<145x16xf32, #tpu.memory_space<vmem>>, vector<16x16xf32>
    tpu.vector_store %arg15[%c48_85, %c0_86], %76 {strides = array<i32>} : memref<145x16xf32, #tpu.memory_space<vmem>>, vector<16x16xf32>,
    %c4_87 = arith.constant 4 : index
    %c0_88 = arith.constant 0 : index
    %c0_89 = arith.constant 0 : index
    %78 = vector.load %arg8[%c4_87, %c0_88, %c0_89] : memref<9x64x16xbf16, #tpu.memory_space<vmem>>, vector<1x64x16xbf16>
    %79 = vector.shape_cast %78 : vector<1x64x16xbf16> to vector<64x16xbf16>
    %cst_90 = arith.constant dense<0.000000e+00> : vector<16x16xf32>
    %80 = tpu.matmul %61, %79, %cst_90 {dimension_numbers = #tpu.dot_dimension_numbers<[1], [0], [0], [1], [0, 0, 1, 1], [], []>} : vector<16x64xbf16>, vector<64x16xbf16>, vector<16x16xf32> -> vector<16x16xf32>
    %c64_91 = arith.constant 64 : index
    %c0_92 = arith.constant 0 : index
    %81 = vector.load %arg15[%c64_91, %c0_92] : memref<145x16xf32, #tpu.memory_space<vmem>>, vector<16x16xf32>
    tpu.vector_store %arg15[%c64_91, %c0_92], %80 {strides = array<i32>} : memref<145x16xf32, #tpu.memory_space<vmem>>, vector<16x16xf32>,
    %c5_93 = arith.constant 5 : index
    %c0_94 = arith.constant 0 : index
    %c0_95 = arith.constant 0 : index
    %82 = vector.load %arg8[%c5_93, %c0_94, %c0_95] : memref<9x64x16xbf16, #tpu.memory_space<vmem>>, vector<1x64x16xbf16>
    %83 = vector.shape_cast %82 : vector<1x64x16xbf16> to vector<64x16xbf16>
    %cst_96 = arith.constant dense<0.000000e+00> : vector<16x16xf32>
    %84 = tpu.matmul %61, %83, %cst_96 {dimension_numbers = #tpu.dot_dimension_numbers<[1], [0], [0], [1], [0, 0, 1, 1], [], []>} : vector<16x64xbf16>, vector<64x16xbf16>, vector<16x16xf32> -> vector<16x16xf32>
    %c80 = arith.constant 80 : index
    %c0_97 = arith.constant 0 : index
    %85 = vector.load %arg15[%c80, %c0_97] : memref<145x16xf32, #tpu.memory_space<vmem>>, vector<16x16xf32>
    tpu.vector_store %arg15[%c80, %c0_97], %84 {strides = array<i32>} : memref<145x16xf32, #tpu.memory_space<vmem>>, vector<16x16xf32>,
    %c6_98 = arith.constant 6 : index
    %c0_99 = arith.constant 0 : index
    %c0_100 = arith.constant 0 : index
    %86 = vector.load %arg8[%c6_98, %c0_99, %c0_100] : memref<9x64x16xbf16, #tpu.memory_space<vmem>>, vector<1x64x16xbf16>
    %87 = vector.shape_cast %86 : vector<1x64x16xbf16> to vector<64x16xbf16>
    %cst_101 = arith.constant dense<0.000000e+00> : vector<16x16xf32>
    %88 = tpu.matmul %61, %87, %cst_101 {dimension_numbers = #tpu.dot_dimension_numbers<[1], [0], [0], [1], [0, 0, 1, 1], [], []>} : vector<16x64xbf16>, vector<64x16xbf16>, vector<16x16xf32> -> vector<16x16xf32>
    %c96 = arith.constant 96 : index
    %c0_102 = arith.constant 0 : index
    %89 = vector.load %arg15[%c96, %c0_102] : memref<145x16xf32, #tpu.memory_space<vmem>>, vector<16x16xf32>
    tpu.vector_store %arg15[%c96, %c0_102], %88 {strides = array<i32>} : memref<145x16xf32, #tpu.memory_space<vmem>>, vector<16x16xf32>,
    %c7_103 = arith.constant 7 : index
    %c0_104 = arith.constant 0 : index
    %c0_105 = arith.constant 0 : index
    %90 = vector.load %arg8[%c7_103, %c0_104, %c0_105] : memref<9x64x16xbf16, #tpu.memory_space<vmem>>, vector<1x64x16xbf16>
    %91 = vector.shape_cast %90 : vector<1x64x16xbf16> to vector<64x16xbf16>
    %cst_106 = arith.constant dense<0.000000e+00> : vector<16x16xf32>
    %92 = tpu.matmul %61, %91, %cst_106 {dimension_numbers = #tpu.dot_dimension_numbers<[1], [0], [0], [1], [0, 0, 1, 1], [], []>} : vector<16x64xbf16>, vector<64x16xbf16>, vector<16x16xf32> -> vector<16x16xf32>
    %c112 = arith.constant 112 : index
    %c0_107 = arith.constant 0 : index
    %93 = vector.load %arg15[%c112, %c0_107] : memref<145x16xf32, #tpu.memory_space<vmem>>, vector<16x16xf32>
    tpu.vector_store %arg15[%c112, %c0_107], %92 {strides = array<i32>} : memref<145x16xf32, #tpu.memory_space<vmem>>, vector<16x16xf32>,
    %c8_108 = arith.constant 8 : index
    %c0_109 = arith.constant 0 : index
    %c0_110 = arith.constant 0 : index
    %94 = vector.load %arg8[%c8_108, %c0_109, %c0_110] : memref<9x64x16xbf16, #tpu.memory_space<vmem>>, vector<1x64x16xbf16>
    %95 = vector.shape_cast %94 : vector<1x64x16xbf16> to vector<64x16xbf16>
    %cst_111 = arith.constant dense<0.000000e+00> : vector<16x16xf32>
    %96 = tpu.matmul %61, %95, %cst_111 {dimension_numbers = #tpu.dot_dimension_numbers<[1], [0], [0], [1], [0, 0, 1, 1], [], []>} : vector<16x64xbf16>, vector<64x16xbf16>, vector<16x16xf32> -> vector<16x16xf32>
    %c128 = arith.constant 128 : index
    %c0_112 = arith.constant 0 : index
    %97 = vector.load %arg15[%c128, %c0_112] : memref<145x16xf32, #tpu.memory_space<vmem>>, vector<16x16xf32>
    tpu.vector_store %arg15[%c128, %c0_112], %96 {strides = array<i32>} : memref<145x16xf32, #tpu.memory_space<vmem>>, vector<16x16xf32>,
    %cst_113 = arith.constant 1.000000e+00 : f32
    %98 = vector.broadcast %cst_113 : f32 to vector<1x16xf32>
    %c144 = arith.constant 144 : index
    %c0_114 = arith.constant 0 : index
    %99 = vector.load %arg15[%c144, %c0_114] : memref<145x16xf32, #tpu.memory_space<vmem>>, vector<1x16xf32>
    tpu.vector_store %arg15[%c144, %c0_114], %98 {strides = array<i32>} : memref<145x16xf32, #tpu.memory_space<vmem>>, vector<1x16xf32>,
    %c0_115 = arith.constant 0 : index
    %c0_116 = arith.constant 0 : index
    %100 = vector.load %arg2[%c0_115, %c0_116] : memref<8x145xf32, #tpu.memory_space<vmem>>, vector<8x145xf32>
    %c0_117 = arith.constant 0 : index
    %c0_118 = arith.constant 0 : index
    %101 = vector.load %arg15[%c0_117, %c0_118] : memref<145x16xf32, #tpu.memory_space<vmem>>, vector<145x16xf32>
    %cst_119 = arith.constant dense<0.000000e+00> : vector<8x16xf32>
    %102 = tpu.matmul %100, %101, %cst_119 {dimension_numbers = #tpu.dot_dimension_numbers<[1], [0], [0], [1], [0, 0, 1, 1], [], []>} : vector<8x145xf32>, vector<145x16xf32>, vector<8x16xf32> -> vector<8x16xf32>
    %cst_120 = arith.constant 0.000000e+00 : f32
    %103 = vector.broadcast %cst_120 : f32 to vector<8x16xf32>
    %104 = arith.maximumf %102, %103 : vector<8x16xf32>
    %105 = arith.truncf %104 : vector<8x16xf32> to vector<8x16xbf16>
    %c0_121 = arith.constant 0 : index
    %c0_122 = arith.constant 0 : index
    %c0_123 = arith.constant 0 : index
    %106 = vector.load %arg9[%c0_121, %c0_122, %c0_123] : memref<4x16x9xbf16, #tpu.memory_space<vmem>>, vector<1x16x9xbf16>
    %107 = vector.shape_cast %106 : vector<1x16x9xbf16> to vector<16x9xbf16>
    %cst_124 = arith.constant dense<0.000000e+00> : vector<8x9xf32>
    %108 = tpu.matmul %105, %107, %cst_124 {dimension_numbers = #tpu.dot_dimension_numbers<[1], [0], [0], [1], [0, 0, 1, 1], [], []>} : vector<8x16xbf16>, vector<16x9xbf16>, vector<8x9xf32> -> vector<8x9xf32>
    %c1_125 = arith.constant 1 : index
    %c0_126 = arith.constant 0 : index
    %c0_127 = arith.constant 0 : index
    %109 = vector.load %arg9[%c1_125, %c0_126, %c0_127] : memref<4x16x9xbf16, #tpu.memory_space<vmem>>, vector<1x16x9xbf16>
    %110 = vector.shape_cast %109 : vector<1x16x9xbf16> to vector<16x9xbf16>
    %cst_128 = arith.constant dense<0.000000e+00> : vector<8x9xf32>
    %111 = tpu.matmul %105, %110, %cst_128 {dimension_numbers = #tpu.dot_dimension_numbers<[1], [0], [0], [1], [0, 0, 1, 1], [], []>} : vector<8x16xbf16>, vector<16x9xbf16>, vector<8x9xf32> -> vector<8x9xf32>
    %112 = arith.maximumf %108, %111 : vector<8x9xf32>
    %c2_129 = arith.constant 2 : index
    %c0_130 = arith.constant 0 : index
    %c0_131 = arith.constant 0 : index
    %113 = vector.load %arg9[%c2_129, %c0_130, %c0_131] : memref<4x16x9xbf16, #tpu.memory_space<vmem>>, vector<1x16x9xbf16>
    %114 = vector.shape_cast %113 : vector<1x16x9xbf16> to vector<16x9xbf16>
    %cst_132 = arith.constant dense<0.000000e+00> : vector<8x9xf32>
    %115 = tpu.matmul %105, %114, %cst_132 {dimension_numbers = #tpu.dot_dimension_numbers<[1], [0], [0], [1], [0, 0, 1, 1], [], []>} : vector<8x16xbf16>, vector<16x9xbf16>, vector<8x9xf32> -> vector<8x9xf32>
    %116 = arith.maximumf %112, %115 : vector<8x9xf32>
    %c3_133 = arith.constant 3 : index
    %c0_134 = arith.constant 0 : index
    %c0_135 = arith.constant 0 : index
    %117 = vector.load %arg9[%c3_133, %c0_134, %c0_135] : memref<4x16x9xbf16, #tpu.memory_space<vmem>>, vector<1x16x9xbf16>
    %118 = vector.shape_cast %117 : vector<1x16x9xbf16> to vector<16x9xbf16>
    %cst_136 = arith.constant dense<0.000000e+00> : vector<8x9xf32>
    %119 = tpu.matmul %105, %118, %cst_136 {dimension_numbers = #tpu.dot_dimension_numbers<[1], [0], [0], [1], [0, 0, 1, 1], [], []>} : vector<8x16xbf16>, vector<16x9xbf16>, vector<8x9xf32> -> vector<8x9xf32>
    %120 = arith.maximumf %116, %119 : vector<8x9xf32>
    %121 = arith.truncf %120 : vector<8x9xf32> to vector<8x9xbf16>
    %c0_137 = arith.constant 0 : index
    %c0_138 = arith.constant 0 : index
    %c0_139 = arith.constant 0 : index
    %122 = vector.load %arg10[%c0_137, %c0_138, %c0_139] : memref<9x9x49xbf16, #tpu.memory_space<vmem>>, vector<1x9x49xbf16>
    %123 = vector.shape_cast %122 : vector<1x9x49xbf16> to vector<9x49xbf16>
    %cst_140 = arith.constant dense<0.000000e+00> : vector<8x49xf32>
    %124 = tpu.matmul %121, %123, %cst_140 {dimension_numbers = #tpu.dot_dimension_numbers<[1], [0], [0], [1], [0, 0, 1, 1], [], []>} : vector<8x9xbf16>, vector<9x49xbf16>, vector<8x49xf32> -> vector<8x49xf32>
    %c0_141 = arith.constant 0 : index
    %c0_142 = arith.constant 0 : index
    %125 = vector.load %arg16[%c0_141, %c0_142] : memref<73x49xf32, #tpu.memory_space<vmem>>, vector<8x49xf32>
    tpu.vector_store %arg16[%c0_141, %c0_142], %124 {strides = array<i32>} : memref<73x49xf32, #tpu.memory_space<vmem>>, vector<8x49xf32>,
    %c1_143 = arith.constant 1 : index
    %c0_144 = arith.constant 0 : index
    %c0_145 = arith.constant 0 : index
    %126 = vector.load %arg10[%c1_143, %c0_144, %c0_145] : memref<9x9x49xbf16, #tpu.memory_space<vmem>>, vector<1x9x49xbf16>
    %127 = vector.shape_cast %126 : vector<1x9x49xbf16> to vector<9x49xbf16>
    %cst_146 = arith.constant dense<0.000000e+00> : vector<8x49xf32>
    %128 = tpu.matmul %121, %127, %cst_146 {dimension_numbers = #tpu.dot_dimension_numbers<[1], [0], [0], [1], [0, 0, 1, 1], [], []>} : vector<8x9xbf16>, vector<9x49xbf16>, vector<8x49xf32> -> vector<8x49xf32>
    %c8_147 = arith.constant 8 : index
    %c0_148 = arith.constant 0 : index
    %129 = vector.load %arg16[%c8_147, %c0_148] : memref<73x49xf32, #tpu.memory_space<vmem>>, vector<8x49xf32>
    tpu.vector_store %arg16[%c8_147, %c0_148], %128 {strides = array<i32>} : memref<73x49xf32, #tpu.memory_space<vmem>>, vector<8x49xf32>,
    %c2_149 = arith.constant 2 : index
    %c0_150 = arith.constant 0 : index
    %c0_151 = arith.constant 0 : index
    %130 = vector.load %arg10[%c2_149, %c0_150, %c0_151] : memref<9x9x49xbf16, #tpu.memory_space<vmem>>, vector<1x9x49xbf16>
    %131 = vector.shape_cast %130 : vector<1x9x49xbf16> to vector<9x49xbf16>
    %cst_152 = arith.constant dense<0.000000e+00> : vector<8x49xf32>
    %132 = tpu.matmul %121, %131, %cst_152 {dimension_numbers = #tpu.dot_dimension_numbers<[1], [0], [0], [1], [0, 0, 1, 1], [], []>} : vector<8x9xbf16>, vector<9x49xbf16>, vector<8x49xf32> -> vector<8x49xf32>
    %c16_153 = arith.constant 16 : index
    %c0_154 = arith.constant 0 : index
    %133 = vector.load %arg16[%c16_153, %c0_154] : memref<73x49xf32, #tpu.memory_space<vmem>>, vector<8x49xf32>
    tpu.vector_store %arg16[%c16_153, %c0_154], %132 {strides = array<i32>} : memref<73x49xf32, #tpu.memory_space<vmem>>, vector<8x49xf32>,
    %c3_155 = arith.constant 3 : index
    %c0_156 = arith.constant 0 : index
    %c0_157 = arith.constant 0 : index
    %134 = vector.load %arg10[%c3_155, %c0_156, %c0_157] : memref<9x9x49xbf16, #tpu.memory_space<vmem>>, vector<1x9x49xbf16>
    %135 = vector.shape_cast %134 : vector<1x9x49xbf16> to vector<9x49xbf16>
    %cst_158 = arith.constant dense<0.000000e+00> : vector<8x49xf32>
    %136 = tpu.matmul %121, %135, %cst_158 {dimension_numbers = #tpu.dot_dimension_numbers<[1], [0], [0], [1], [0, 0, 1, 1], [], []>} : vector<8x9xbf16>, vector<9x49xbf16>, vector<8x49xf32> -> vector<8x49xf32>
    %c24_159 = arith.constant 24 : index
    %c0_160 = arith.constant 0 : index
    %137 = vector.load %arg16[%c24_159, %c0_160] : memref<73x49xf32, #tpu.memory_space<vmem>>, vector<8x49xf32>
    tpu.vector_store %arg16[%c24_159, %c0_160], %136 {strides = array<i32>} : memref<73x49xf32, #tpu.memory_space<vmem>>, vector<8x49xf32>,
    %c4_161 = arith.constant 4 : index
    %c0_162 = arith.constant 0 : index
    %c0_163 = arith.constant 0 : index
    %138 = vector.load %arg10[%c4_161, %c0_162, %c0_163] : memref<9x9x49xbf16, #tpu.memory_space<vmem>>, vector<1x9x49xbf16>
    %139 = vector.shape_cast %138 : vector<1x9x49xbf16> to vector<9x49xbf16>
    %cst_164 = arith.constant dense<0.000000e+00> : vector<8x49xf32>
    %140 = tpu.matmul %121, %139, %cst_164 {dimension_numbers = #tpu.dot_dimension_numbers<[1], [0], [0], [1], [0, 0, 1, 1], [], []>} : vector<8x9xbf16>, vector<9x49xbf16>, vector<8x49xf32> -> vector<8x49xf32>
    %c32_165 = arith.constant 32 : index
    %c0_166 = arith.constant 0 : index
    %141 = vector.load %arg16[%c32_165, %c0_166] : memref<73x49xf32, #tpu.memory_space<vmem>>, vector<8x49xf32>
    tpu.vector_store %arg16[%c32_165, %c0_166], %140 {strides = array<i32>} : memref<73x49xf32, #tpu.memory_space<vmem>>, vector<8x49xf32>,
    %c5_167 = arith.constant 5 : index
    %c0_168 = arith.constant 0 : index
    %c0_169 = arith.constant 0 : index
    %142 = vector.load %arg10[%c5_167, %c0_168, %c0_169] : memref<9x9x49xbf16, #tpu.memory_space<vmem>>, vector<1x9x49xbf16>
    %143 = vector.shape_cast %142 : vector<1x9x49xbf16> to vector<9x49xbf16>
    %cst_170 = arith.constant dense<0.000000e+00> : vector<8x49xf32>
    %144 = tpu.matmul %121, %143, %cst_170 {dimension_numbers = #tpu.dot_dimension_numbers<[1], [0], [0], [1], [0, 0, 1, 1], [], []>} : vector<8x9xbf16>, vector<9x49xbf16>, vector<8x49xf32> -> vector<8x49xf32>
    %c40_171 = arith.constant 40 : index
    %c0_172 = arith.constant 0 : index
    %145 = vector.load %arg16[%c40_171, %c0_172] : memref<73x49xf32, #tpu.memory_space<vmem>>, vector<8x49xf32>
    tpu.vector_store %arg16[%c40_171, %c0_172], %144 {strides = array<i32>} : memref<73x49xf32, #tpu.memory_space<vmem>>, vector<8x49xf32>,
    %c6_173 = arith.constant 6 : index
    %c0_174 = arith.constant 0 : index
    %c0_175 = arith.constant 0 : index
    %146 = vector.load %arg10[%c6_173, %c0_174, %c0_175] : memref<9x9x49xbf16, #tpu.memory_space<vmem>>, vector<1x9x49xbf16>
    %147 = vector.shape_cast %146 : vector<1x9x49xbf16> to vector<9x49xbf16>
    %cst_176 = arith.constant dense<0.000000e+00> : vector<8x49xf32>
    %148 = tpu.matmul %121, %147, %cst_176 {dimension_numbers = #tpu.dot_dimension_numbers<[1], [0], [0], [1], [0, 0, 1, 1], [], []>} : vector<8x9xbf16>, vector<9x49xbf16>, vector<8x49xf32> -> vector<8x49xf32>
    %c48_177 = arith.constant 48 : index
    %c0_178 = arith.constant 0 : index
    %149 = vector.load %arg16[%c48_177, %c0_178] : memref<73x49xf32, #tpu.memory_space<vmem>>, vector<8x49xf32>
    tpu.vector_store %arg16[%c48_177, %c0_178], %148 {strides = array<i32>} : memref<73x49xf32, #tpu.memory_space<vmem>>, vector<8x49xf32>,
    %c7_179 = arith.constant 7 : index
    %c0_180 = arith.constant 0 : index
    %c0_181 = arith.constant 0 : index
    %150 = vector.load %arg10[%c7_179, %c0_180, %c0_181] : memref<9x9x49xbf16, #tpu.memory_space<vmem>>, vector<1x9x49xbf16>
    %151 = vector.shape_cast %150 : vector<1x9x49xbf16> to vector<9x49xbf16>
    %cst_182 = arith.constant dense<0.000000e+00> : vector<8x49xf32>
    %152 = tpu.matmul %121, %151, %cst_182 {dimension_numbers = #tpu.dot_dimension_numbers<[1], [0], [0], [1], [0, 0, 1, 1], [], []>} : vector<8x9xbf16>, vector<9x49xbf16>, vector<8x49xf32> -> vector<8x49xf32>
    %c56_183 = arith.constant 56 : index
    %c0_184 = arith.constant 0 : index
    %153 = vector.load %arg16[%c56_183, %c0_184] : memref<73x49xf32, #tpu.memory_space<vmem>>, vector<8x49xf32>
    tpu.vector_store %arg16[%c56_183, %c0_184], %152 {strides = array<i32>} : memref<73x49xf32, #tpu.memory_space<vmem>>, vector<8x49xf32>,
    %c8_185 = arith.constant 8 : index
    %c0_186 = arith.constant 0 : index
    %c0_187 = arith.constant 0 : index
    %154 = vector.load %arg10[%c8_185, %c0_186, %c0_187] : memref<9x9x49xbf16, #tpu.memory_space<vmem>>, vector<1x9x49xbf16>
    %155 = vector.shape_cast %154 : vector<1x9x49xbf16> to vector<9x49xbf16>
    %cst_188 = arith.constant dense<0.000000e+00> : vector<8x49xf32>
    %156 = tpu.matmul %121, %155, %cst_188 {dimension_numbers = #tpu.dot_dimension_numbers<[1], [0], [0], [1], [0, 0, 1, 1], [], []>} : vector<8x9xbf16>, vector<9x49xbf16>, vector<8x49xf32> -> vector<8x49xf32>
    %c64_189 = arith.constant 64 : index
    %c0_190 = arith.constant 0 : index
    %157 = vector.load %arg16[%c64_189, %c0_190] : memref<73x49xf32, #tpu.memory_space<vmem>>, vector<8x49xf32>
    tpu.vector_store %arg16[%c64_189, %c0_190], %156 {strides = array<i32>} : memref<73x49xf32, #tpu.memory_space<vmem>>, vector<8x49xf32>,
    %cst_191 = arith.constant 1.000000e+00 : f32
    %158 = vector.broadcast %cst_191 : f32 to vector<1x49xf32>
    %c72_192 = arith.constant 72 : index
    %c0_193 = arith.constant 0 : index
    %159 = vector.load %arg16[%c72_192, %c0_193] : memref<73x49xf32, #tpu.memory_space<vmem>>, vector<1x49xf32>
    tpu.vector_store %arg16[%c72_192, %c0_193], %158 {strides = array<i32>} : memref<73x49xf32, #tpu.memory_space<vmem>>, vector<1x49xf32>,
    %c0_194 = arith.constant 0 : index
    %c0_195 = arith.constant 0 : index
    %160 = vector.load %arg3[%c0_194, %c0_195] : memref<16x73xf32, #tpu.memory_space<vmem>>, vector<16x73xf32>
    %c0_196 = arith.constant 0 : index
    %c0_197 = arith.constant 0 : index
    %161 = vector.load %arg16[%c0_196, %c0_197] : memref<73x49xf32, #tpu.memory_space<vmem>>, vector<73x49xf32>
    %cst_198 = arith.constant dense<0.000000e+00> : vector<16x49xf32>
    %162 = tpu.matmul %160, %161, %cst_198 {dimension_numbers = #tpu.dot_dimension_numbers<[1], [0], [0], [1], [0, 0, 1, 1], [], []>} : vector<16x73xf32>, vector<73x49xf32>, vector<16x49xf32> -> vector<16x49xf32>
    %cst_199 = arith.constant 0.000000e+00 : f32
    %163 = vector.broadcast %cst_199 : f32 to vector<16x49xf32>
    %164 = arith.maximumf %162, %163 : vector<16x49xf32>
    %165 = arith.truncf %164 : vector<16x49xf32> to vector<16x49xbf16>
    %c0_200 = arith.constant 0 : index
    %c0_201 = arith.constant 0 : index
    %c0_202 = arith.constant 0 : index
    %166 = vector.load %arg11[%c0_200, %c0_201, %c0_202] : memref<9x49x225xbf16, #tpu.memory_space<vmem>>, vector<1x49x225xbf16>
    %167 = vector.shape_cast %166 : vector<1x49x225xbf16> to vector<49x225xbf16>
    %cst_203 = arith.constant dense<0.000000e+00> : vector<16x225xf32>
    %168 = tpu.matmul %165, %167, %cst_203 {dimension_numbers = #tpu.dot_dimension_numbers<[1], [0], [0], [1], [0, 0, 1, 1], [], []>} : vector<16x49xbf16>, vector<49x225xbf16>, vector<16x225xf32> -> vector<16x225xf32>
    %c0_204 = arith.constant 0 : index
    %c0_205 = arith.constant 0 : index
    %169 = vector.load %arg17[%c0_204, %c0_205] : memref<145x225xf32, #tpu.memory_space<vmem>>, vector<16x225xf32>
    tpu.vector_store %arg17[%c0_204, %c0_205], %168 {strides = array<i32>} : memref<145x225xf32, #tpu.memory_space<vmem>>, vector<16x225xf32>,
    %c1_206 = arith.constant 1 : index
    %c0_207 = arith.constant 0 : index
    %c0_208 = arith.constant 0 : index
    %170 = vector.load %arg11[%c1_206, %c0_207, %c0_208] : memref<9x49x225xbf16, #tpu.memory_space<vmem>>, vector<1x49x225xbf16>
    %171 = vector.shape_cast %170 : vector<1x49x225xbf16> to vector<49x225xbf16>
    %cst_209 = arith.constant dense<0.000000e+00> : vector<16x225xf32>
    %172 = tpu.matmul %165, %171, %cst_209 {dimension_numbers = #tpu.dot_dimension_numbers<[1], [0], [0], [1], [0, 0, 1, 1], [], []>} : vector<16x49xbf16>, vector<49x225xbf16>, vector<16x225xf32> -> vector<16x225xf32>
    %c16_210 = arith.constant 16 : index
    %c0_211 = arith.constant 0 : index
    %173 = vector.load %arg17[%c16_210, %c0_211] : memref<145x225xf32, #tpu.memory_space<vmem>>, vector<16x225xf32>
    tpu.vector_store %arg17[%c16_210, %c0_211], %172 {strides = array<i32>} : memref<145x225xf32, #tpu.memory_space<vmem>>, vector<16x225xf32>,
    %c2_212 = arith.constant 2 : index
    %c0_213 = arith.constant 0 : index
    %c0_214 = arith.constant 0 : index
    %174 = vector.load %arg11[%c2_212, %c0_213, %c0_214] : memref<9x49x225xbf16, #tpu.memory_space<vmem>>, vector<1x49x225xbf16>
    %175 = vector.shape_cast %174 : vector<1x49x225xbf16> to vector<49x225xbf16>
    %cst_215 = arith.constant dense<0.000000e+00> : vector<16x225xf32>
    %176 = tpu.matmul %165, %175, %cst_215 {dimension_numbers = #tpu.dot_dimension_numbers<[1], [0], [0], [1], [0, 0, 1, 1], [], []>} : vector<16x49xbf16>, vector<49x225xbf16>, vector<16x225xf32> -> vector<16x225xf32>
    %c32_216 = arith.constant 32 : index
    %c0_217 = arith.constant 0 : index
    %177 = vector.load %arg17[%c32_216, %c0_217] : memref<145x225xf32, #tpu.memory_space<vmem>>, vector<16x225xf32>
    tpu.vector_store %arg17[%c32_216, %c0_217], %176 {strides = array<i32>} : memref<145x225xf32, #tpu.memory_space<vmem>>, vector<16x225xf32>,
    %c3_218 = arith.constant 3 : index
    %c0_219 = arith.constant 0 : index
    %c0_220 = arith.constant 0 : index
    %178 = vector.load %arg11[%c3_218, %c0_219, %c0_220] : memref<9x49x225xbf16, #tpu.memory_space<vmem>>, vector<1x49x225xbf16>
    %179 = vector.shape_cast %178 : vector<1x49x225xbf16> to vector<49x225xbf16>
    %cst_221 = arith.constant dense<0.000000e+00> : vector<16x225xf32>
    %180 = tpu.matmul %165, %179, %cst_221 {dimension_numbers = #tpu.dot_dimension_numbers<[1], [0], [0], [1], [0, 0, 1, 1], [], []>} : vector<16x49xbf16>, vector<49x225xbf16>, vector<16x225xf32> -> vector<16x225xf32>
    %c48_222 = arith.constant 48 : index
    %c0_223 = arith.constant 0 : index
    %181 = vector.load %arg17[%c48_222, %c0_223] : memref<145x225xf32, #tpu.memory_space<vmem>>, vector<16x225xf32>
    tpu.vector_store %arg17[%c48_222, %c0_223], %180 {strides = array<i32>} : memref<145x225xf32, #tpu.memory_space<vmem>>, vector<16x225xf32>,
    %c4_224 = arith.constant 4 : index
    %c0_225 = arith.constant 0 : index
    %c0_226 = arith.constant 0 : index
    %182 = vector.load %arg11[%c4_224, %c0_225, %c0_226] : memref<9x49x225xbf16, #tpu.memory_space<vmem>>, vector<1x49x225xbf16>
    %183 = vector.shape_cast %182 : vector<1x49x225xbf16> to vector<49x225xbf16>
    %cst_227 = arith.constant dense<0.000000e+00> : vector<16x225xf32>
    %184 = tpu.matmul %165, %183, %cst_227 {dimension_numbers = #tpu.dot_dimension_numbers<[1], [0], [0], [1], [0, 0, 1, 1], [], []>} : vector<16x49xbf16>, vector<49x225xbf16>, vector<16x225xf32> -> vector<16x225xf32>
    %c64_228 = arith.constant 64 : index
    %c0_229 = arith.constant 0 : index
    %185 = vector.load %arg17[%c64_228, %c0_229] : memref<145x225xf32, #tpu.memory_space<vmem>>, vector<16x225xf32>
    tpu.vector_store %arg17[%c64_228, %c0_229], %184 {strides = array<i32>} : memref<145x225xf32, #tpu.memory_space<vmem>>, vector<16x225xf32>,
    %c5_230 = arith.constant 5 : index
    %c0_231 = arith.constant 0 : index
    %c0_232 = arith.constant 0 : index
    %186 = vector.load %arg11[%c5_230, %c0_231, %c0_232] : memref<9x49x225xbf16, #tpu.memory_space<vmem>>, vector<1x49x225xbf16>
    %187 = vector.shape_cast %186 : vector<1x49x225xbf16> to vector<49x225xbf16>
    %cst_233 = arith.constant dense<0.000000e+00> : vector<16x225xf32>
    %188 = tpu.matmul %165, %187, %cst_233 {dimension_numbers = #tpu.dot_dimension_numbers<[1], [0], [0], [1], [0, 0, 1, 1], [], []>} : vector<16x49xbf16>, vector<49x225xbf16>, vector<16x225xf32> -> vector<16x225xf32>
    %c80_234 = arith.constant 80 : index
    %c0_235 = arith.constant 0 : index
    %189 = vector.load %arg17[%c80_234, %c0_235] : memref<145x225xf32, #tpu.memory_space<vmem>>, vector<16x225xf32>
    tpu.vector_store %arg17[%c80_234, %c0_235], %188 {strides = array<i32>} : memref<145x225xf32, #tpu.memory_space<vmem>>, vector<16x225xf32>,
    %c6_236 = arith.constant 6 : index
    %c0_237 = arith.constant 0 : index
    %c0_238 = arith.constant 0 : index
    %190 = vector.load %arg11[%c6_236, %c0_237, %c0_238] : memref<9x49x225xbf16, #tpu.memory_space<vmem>>, vector<1x49x225xbf16>
    %191 = vector.shape_cast %190 : vector<1x49x225xbf16> to vector<49x225xbf16>
    %cst_239 = arith.constant dense<0.000000e+00> : vector<16x225xf32>
    %192 = tpu.matmul %165, %191, %cst_239 {dimension_numbers = #tpu.dot_dimension_numbers<[1], [0], [0], [1], [0, 0, 1, 1], [], []>} : vector<16x49xbf16>, vector<49x225xbf16>, vector<16x225xf32> -> vector<16x225xf32>
    %c96_240 = arith.constant 96 : index
    %c0_241 = arith.constant 0 : index
    %193 = vector.load %arg17[%c96_240, %c0_241] : memref<145x225xf32, #tpu.memory_space<vmem>>, vector<16x225xf32>
    tpu.vector_store %arg17[%c96_240, %c0_241], %192 {strides = array<i32>} : memref<145x225xf32, #tpu.memory_space<vmem>>, vector<16x225xf32>,
    %c7_242 = arith.constant 7 : index
    %c0_243 = arith.constant 0 : index
    %c0_244 = arith.constant 0 : index
    %194 = vector.load %arg11[%c7_242, %c0_243, %c0_244] : memref<9x49x225xbf16, #tpu.memory_space<vmem>>, vector<1x49x225xbf16>
    %195 = vector.shape_cast %194 : vector<1x49x225xbf16> to vector<49x225xbf16>
    %cst_245 = arith.constant dense<0.000000e+00> : vector<16x225xf32>
    %196 = tpu.matmul %165, %195, %cst_245 {dimension_numbers = #tpu.dot_dimension_numbers<[1], [0], [0], [1], [0, 0, 1, 1], [], []>} : vector<16x49xbf16>, vector<49x225xbf16>, vector<16x225xf32> -> vector<16x225xf32>
    %c112_246 = arith.constant 112 : index
    %c0_247 = arith.constant 0 : index
    %197 = vector.load %arg17[%c112_246, %c0_247] : memref<145x225xf32, #tpu.memory_space<vmem>>, vector<16x225xf32>
    tpu.vector_store %arg17[%c112_246, %c0_247], %196 {strides = array<i32>} : memref<145x225xf32, #tpu.memory_space<vmem>>, vector<16x225xf32>,
    %c8_248 = arith.constant 8 : index
    %c0_249 = arith.constant 0 : index
    %c0_250 = arith.constant 0 : index
    %198 = vector.load %arg11[%c8_248, %c0_249, %c0_250] : memref<9x49x225xbf16, #tpu.memory_space<vmem>>, vector<1x49x225xbf16>
    %199 = vector.shape_cast %198 : vector<1x49x225xbf16> to vector<49x225xbf16>
    %cst_251 = arith.constant dense<0.000000e+00> : vector<16x225xf32>
    %200 = tpu.matmul %165, %199, %cst_251 {dimension_numbers = #tpu.dot_dimension_numbers<[1], [0], [0], [1], [0, 0, 1, 1], [], []>} : vector<16x49xbf16>, vector<49x225xbf16>, vector<16x225xf32> -> vector<16x225xf32>
    %c128_252 = arith.constant 128 : index
    %c0_253 = arith.constant 0 : index
    %201 = vector.load %arg17[%c128_252, %c0_253] : memref<145x225xf32, #tpu.memory_space<vmem>>, vector<16x225xf32>
    tpu.vector_store %arg17[%c128_252, %c0_253], %200 {strides = array<i32>} : memref<145x225xf32, #tpu.memory_space<vmem>>, vector<16x225xf32>,
    %cst_254 = arith.constant 1.000000e+00 : f32
    %202 = vector.broadcast %cst_254 : f32 to vector<1x225xf32>
    %c144_255 = arith.constant 144 : index
    %c0_256 = arith.constant 0 : index
    %203 = vector.load %arg17[%c144_255, %c0_256] : memref<145x225xf32, #tpu.memory_space<vmem>>, vector<1x225xf32>
    tpu.vector_store %arg17[%c144_255, %c0_256], %202 {strides = array<i32>} : memref<145x225xf32, #tpu.memory_space<vmem>>, vector<1x225xf32>,
    %c0_257 = arith.constant 0 : index
    %c0_258 = arith.constant 0 : index
    %204 = vector.load %arg4[%c0_257, %c0_258] : memref<8x145xf32, #tpu.memory_space<vmem>>, vector<8x145xf32>
    %c0_259 = arith.constant 0 : index
    %c0_260 = arith.constant 0 : index
    %205 = vector.load %arg17[%c0_259, %c0_260] : memref<145x225xf32, #tpu.memory_space<vmem>>, vector<145x225xf32>
    %cst_261 = arith.constant dense<0.000000e+00> : vector<8x225xf32>
    %206 = tpu.matmul %204, %205, %cst_261 {dimension_numbers = #tpu.dot_dimension_numbers<[1], [0], [0], [1], [0, 0, 1, 1], [], []>} : vector<8x145xf32>, vector<145x225xf32>, vector<8x225xf32> -> vector<8x225xf32>
    %cst_262 = arith.constant 0.000000e+00 : f32
    %207 = vector.broadcast %cst_262 : f32 to vector<8x225xf32>
    %208 = arith.maximumf %206, %207 : vector<8x225xf32>
    %209 = arith.truncf %208 : vector<8x225xf32> to vector<8x225xbf16>
    %c0_263 = arith.constant 0 : index
    %c0_264 = arith.constant 0 : index
    %c0_265 = arith.constant 0 : index
    %210 = vector.load %arg12[%c0_263, %c0_264, %c0_265] : memref<4x225x256xbf16, #tpu.memory_space<vmem>>, vector<1x225x256xbf16>
    %211 = vector.shape_cast %210 : vector<1x225x256xbf16> to vector<225x256xbf16>
    %cst_266 = arith.constant dense<0.000000e+00> : vector<8x256xf32>
    %212 = tpu.matmul %209, %211, %cst_266 {dimension_numbers = #tpu.dot_dimension_numbers<[1], [0], [0], [1], [0, 0, 1, 1], [], []>} : vector<8x225xbf16>, vector<225x256xbf16>, vector<8x256xf32> -> vector<8x256xf32>
    %c0_267 = arith.constant 0 : index
    %c0_268 = arith.constant 0 : index
    %213 = vector.load %arg18[%c0_267, %c0_268] : memref<33x256xf32, #tpu.memory_space<vmem>>, vector<8x256xf32>
    tpu.vector_store %arg18[%c0_267, %c0_268], %212 {strides = array<i32>} : memref<33x256xf32, #tpu.memory_space<vmem>>, vector<8x256xf32>,
    %c1_269 = arith.constant 1 : index
    %c0_270 = arith.constant 0 : index
    %c0_271 = arith.constant 0 : index
    %214 = vector.load %arg12[%c1_269, %c0_270, %c0_271] : memref<4x225x256xbf16, #tpu.memory_space<vmem>>, vector<1x225x256xbf16>
    %215 = vector.shape_cast %214 : vector<1x225x256xbf16> to vector<225x256xbf16>
    %cst_272 = arith.constant dense<0.000000e+00> : vector<8x256xf32>
    %216 = tpu.matmul %209, %215, %cst_272 {dimension_numbers = #tpu.dot_dimension_numbers<[1], [0], [0], [1], [0, 0, 1, 1], [], []>} : vector<8x225xbf16>, vector<225x256xbf16>, vector<8x256xf32> -> vector<8x256xf32>
    %c8_273 = arith.constant 8 : index
    %c0_274 = arith.constant 0 : index
    %217 = vector.load %arg18[%c8_273, %c0_274] : memref<33x256xf32, #tpu.memory_space<vmem>>, vector<8x256xf32>
    tpu.vector_store %arg18[%c8_273, %c0_274], %216 {strides = array<i32>} : memref<33x256xf32, #tpu.memory_space<vmem>>, vector<8x256xf32>,
    %c2_275 = arith.constant 2 : index
    %c0_276 = arith.constant 0 : index
    %c0_277 = arith.constant 0 : index
    %218 = vector.load %arg12[%c2_275, %c0_276, %c0_277] : memref<4x225x256xbf16, #tpu.memory_space<vmem>>, vector<1x225x256xbf16>
    %219 = vector.shape_cast %218 : vector<1x225x256xbf16> to vector<225x256xbf16>
    %cst_278 = arith.constant dense<0.000000e+00> : vector<8x256xf32>
    %220 = tpu.matmul %209, %219, %cst_278 {dimension_numbers = #tpu.dot_dimension_numbers<[1], [0], [0], [1], [0, 0, 1, 1], [], []>} : vector<8x225xbf16>, vector<225x256xbf16>, vector<8x256xf32> -> vector<8x256xf32>
    %c16_279 = arith.constant 16 : index
    %c0_280 = arith.constant 0 : index
    %221 = vector.load %arg18[%c16_279, %c0_280] : memref<33x256xf32, #tpu.memory_space<vmem>>, vector<8x256xf32>
    tpu.vector_store %arg18[%c16_279, %c0_280], %220 {strides = array<i32>} : memref<33x256xf32, #tpu.memory_space<vmem>>, vector<8x256xf32>,
    %c3_281 = arith.constant 3 : index
    %c0_282 = arith.constant 0 : index
    %c0_283 = arith.constant 0 : index
    %222 = vector.load %arg12[%c3_281, %c0_282, %c0_283] : memref<4x225x256xbf16, #tpu.memory_space<vmem>>, vector<1x225x256xbf16>
    %223 = vector.shape_cast %222 : vector<1x225x256xbf16> to vector<225x256xbf16>
    %cst_284 = arith.constant dense<0.000000e+00> : vector<8x256xf32>
    %224 = tpu.matmul %209, %223, %cst_284 {dimension_numbers = #tpu.dot_dimension_numbers<[1], [0], [0], [1], [0, 0, 1, 1], [], []>} : vector<8x225xbf16>, vector<225x256xbf16>, vector<8x256xf32> -> vector<8x256xf32>
    %c24_285 = arith.constant 24 : index
    %c0_286 = arith.constant 0 : index
    %225 = vector.load %arg18[%c24_285, %c0_286] : memref<33x256xf32, #tpu.memory_space<vmem>>, vector<8x256xf32>
    tpu.vector_store %arg18[%c24_285, %c0_286], %224 {strides = array<i32>} : memref<33x256xf32, #tpu.memory_space<vmem>>, vector<8x256xf32>,
    %cst_287 = arith.constant 1.000000e+00 : f32
    %226 = vector.broadcast %cst_287 : f32 to vector<1x256xf32>
    %c32_288 = arith.constant 32 : index
    %c0_289 = arith.constant 0 : index
    %227 = vector.load %arg18[%c32_288, %c0_289] : memref<33x256xf32, #tpu.memory_space<vmem>>, vector<1x256xf32>
    tpu.vector_store %arg18[%c32_288, %c0_289], %226 {strides = array<i32>} : memref<33x256xf32, #tpu.memory_space<vmem>>, vector<1x256xf32>,
    %c0_290 = arith.constant 0 : index
    %c0_291 = arith.constant 0 : index
    %228 = vector.load %arg5[%c0_290, %c0_291] : memref<6x33xf32, #tpu.memory_space<vmem>>, vector<6x33xf32>
    %c0_292 = arith.constant 0 : index
    %c0_293 = arith.constant 0 : index
    %229 = vector.load %arg18[%c0_292, %c0_293] : memref<33x256xf32, #tpu.memory_space<vmem>>, vector<33x256xf32>
    %cst_294 = arith.constant dense<0.000000e+00> : vector<6x256xf32>
    %230 = tpu.matmul %228, %229, %cst_294 {dimension_numbers = #tpu.dot_dimension_numbers<[1], [0], [0], [1], [0, 0, 1, 1], [], []>} : vector<6x33xf32>, vector<33x256xf32>, vector<6x256xf32> -> vector<6x256xf32>
    %231 = math.tanh %230 : vector<6x256xf32>
    %c0_295 = arith.constant 0 : index
    %c0_296 = arith.constant 0 : index
    %232 = vector.load %arg13[%c0_295, %c0_296] : memref<6x256xf32, #tpu.memory_space<vmem>>, vector<6x256xf32>
    tpu.vector_store %arg13[%c0_295, %c0_296], %231 {strides = array<i32>} : memref<6x256xf32, #tpu.memory_space<vmem>>, vector<6x256xf32>,
    return
  }
}

</mosaic_0001>

<bundles_post_ra>
// kernel: tile.33
= control target key start
LH: loop header
LB: loop body
LE: loop exit
PB: predicated region body
PF: predicated region fallthrough
CT: control target
= control target key end

     0   :  { %2 = vsyncpa [#allocation1], 0  ;;  %s48_s8 = smov [#allocation0]   ;;  %s65_s0 = inlined_call_operand.hbm [shape: f32[4], index: 0, kind: input, shape index: {}]   ;;  %s66_s1 = inlined_call_operand.vmem [shape: f32[2,4], index: 1, kind: output, shape index: {}]  }
   0x1   :  { %s8_s0 = sshll.u32 %s65_s0, 4  ;;  %s10_s9 = sshll.u32 %s48_s8, 4  ;;  %s9_s0 = int_to_ptr.hbm [resolvable:$true] %s8_s0  ;;  %s11_s9 = int_to_ptr.vmem [resolvable:$true] %s10_s9 }
   0x2   :  { %13 = dma.hbm_to_vmem [thread:$0]  %s9_s0, 16, %s11_s9, [#allocation1]  }
   0x3   :  { %46 = dma.done.wait [#allocation1], 16  }
   0x4   :  { %47 = vsyncadd [#allocation1], 4294967280  ;;  %v18_v0 = vld [vmem:[#allocation0] ss:$0 sm:$0xff] }
   0x5   :  { %19 = vst [vmem:[%s66_s1] sm:$0x3] %v18_v0 }
   0x6   :  { %20 = vsyncpa [#allocation1], 1 }

// kernel: tile.1
= control target key start
LH: loop header
LB: loop body
LE: loop exit
PB: predicated region body
PF: predicated region fallthrough
CT: control target
= control target key end

     0   :  { %s34_s8 = smov 125   ;;  %s35_s9 = smov 126   ;;  %vm7_vm0 = vcmask 7168   ;;  %s61_s0 = inlined_call_operand.vmem [shape: f32[2,4], index: 0, kind: input, shape index: {}]   ;;  %s62_s1 = inlined_call_operand.vmem [shape: f32[8,1], index: 1, kind: output, shape index: {}]  }
   0x1   :  { %v4_v0 = vld [vmem:[%s61_s0] sm:$0x3]  ;;  %s33_s0 = smov 127  }
   0x2   :  { %5 = vst [vmem:[#allocation0] sm:$0x3] %v4_v0 }
   0x9   :  { %v9_v1 = vld [vmem:[#allocation0] sm:$0x3]  }
   0xa   :  { %v21_v2 = vld [vmem:[#allocation0] sm:$0x3]   ;;  %10 = vrot.lane.b32.xlu0 %v9_v1, %s33_s0 }
   0xb   :  { %22 = vrot.lane.b32.xlu1 %v21_v2, %s34_s8  ;;  %v15_v3 = vld [vmem:[#allocation0] sm:$0x3]  }
   0xc   :  { %v6_v4 = vld [vmem:[#allocation0] sm:$0x3]  }
   0xd   :  { %8 = vst.msk [vmem:[%s62_s1] ss:$4 sm:$0x3] %vm7_vm0, %v6_v4  }
  0x12   :  { %16 = vrot.lane.b32.xlu0 %v15_v3, %s35_s9 }
  0x7c   :  { %v11_v5 = vpop.permute.xlu0 %10  }
  0x7d   :  { %v23_v6 = vpop.permute.xlu1 %22   ;;  %27 = vst.msk [vmem:[%s62_s1 + $0x1] ss:$4 sm:$0x3] %vm7_vm0, %v11_v5  }
  0x7e   :  { %29 = vst.msk [vmem:[%s62_s1 + $0x3] ss:$4 sm:$0x3] %vm7_vm0, %v23_v6  }
  0x84   :  { %v17_v7 = vpop.permute.xlu0 %16  }
  0x85   :  { %28 = vst.msk [vmem:[%s62_s1 + $0x2] ss:$4 sm:$0x3] %vm7_vm0, %v17_v7  }

// kernel: tile.2
= control target key start
LH: loop header
LB: loop body
LE: loop exit
PB: predicated region body
PF: predicated region fallthrough
CT: control target
= control target key end

     0   :  { %s66_s8 = smov 125   ;;  %s67_s9 = smov 123   ;;  %vm7_vm0 = vcmask 7168   ;;  %s117_s0 = inlined_call_operand.vmem [shape: f32[2,8], index: 0, kind: input, shape index: {}]   ;;  %s118_s1 = inlined_call_operand.vmem [shape: f32[16,1], index: 1, kind: output, shape index: {}]  }
   0x1   :  { %v4_v0 = vld [vmem:[%s117_s0] sm:$0x3]  ;;  %s65_s0 = smov 127   ;;  %s68_s10 = smov 126  }
   0x2   :  { %5 = vst [vmem:[#allocation0] sm:$0x3] %v4_v0  ;;  %s69_s11 = smov 124   ;;  %s70_s12 = smov 122  }
   0x3   :  { %s71_s13 = smov 121  }
   0x9   :  { %v9_v1 = vld [vmem:[#allocation0] sm:$0x3]  }
   0xa   :  { %v21_v2 = vld [vmem:[#allocation0] sm:$0x3]   ;;  %10 = vrot.lane.b32.xlu0 %v9_v1, %s65_s0 }
   0xb   :  { %22 = vrot.lane.b32.xlu1 %v21_v2, %s66_s8  ;;  %v33_v3 = vld [vmem:[#allocation0] sm:$0x3]  }
   0xc   :  { %34 = vrot.lane.b32.xlu2 %v33_v3, %s67_s9  ;;  %v15_v4 = vld [vmem:[#allocation0] sm:$0x3]  }
   0xd   :  { %v27_v5 = vld [vmem:[#allocation0] sm:$0x3]  }
   0xe   :  { %v39_v6 = vld [vmem:[#allocation0] sm:$0x3]  }
   0xf   :  { %v45_v7 = vld [vmem:[#allocation0] sm:$0x3]  }
  0x10   :  { %v6_v8 = vld [vmem:[#allocation0] sm:$0x3]  }
  0x11   :  { %8 = vst.msk [vmem:[%s118_s1] ss:$8 sm:$0x3] %vm7_vm0, %v6_v8  }
  0x12   :  { %16 = vrot.lane.b32.xlu0 %v15_v4, %s68_s10 }
  0x13   :  { %28 = vrot.lane.b32.xlu1 %v27_v5, %s69_s11 }
  0x14   :  { %40 = vrot.lane.b32.xlu2 %v39_v6, %s70_s12 }
  0x1a   :  { %46 = vrot.lane.b32.xlu0 %v45_v7, %s71_s13 }
  0x66   :  { %v35_v9 = vpop.permute.xlu2 %34  }
  0x67   :  { %55 = vst.msk [vmem:[%s118_s1 + $0x5] ss:$8 sm:$0x3] %vm7_vm0, %v35_v9  }
  0x6e   :  { %v41_v10 = vpop.permute.xlu2 %40  }
  0x6f   :  { %56 = vst.msk [vmem:[%s118_s1 + $0x6] ss:$8 sm:$0x3] %vm7_vm0, %v41_v10  }
  0x7c   :  { %v11_v11 = vpop.permute.xlu0 %10  }
  0x7d   :  { %v23_v12 = vpop.permute.xlu1 %22   ;;  %51 = vst.msk [vmem:[%s118_s1 + $0x1] ss:$8 sm:$0x3] %vm7_vm0, %v11_v11  }
  0x7e   :  { %53 = vst.msk [vmem:[%s118_s1 + $0x3] ss:$8 sm:$0x3] %vm7_vm0, %v23_v12  }
  0x84   :  { %v17_v13 = vpop.permute.xlu0 %16  }
  0x85   :  { %v29_v14 = vpop.permute.xlu1 %28   ;;  %52 = vst.msk [vmem:[%s118_s1 + $0x2] ss:$8 sm:$0x3] %vm7_vm0, %v17_v13  }
  0x86   :  { %54 = vst.msk [vmem:[%s118_s1 + $0x4] ss:$8 sm:$0x3] %vm7_vm0, %v29_v14  }
  0x8c   :  { %v47_v15 = vpop.permute.xlu0 %46  }
  0x8d   :  { %57 = vst.msk [vmem:[%s118_s1 + $0x7] ss:$8 sm:$0x3] %vm7_vm0, %v47_v15  }

// kernel: tile.38
= control target key start
LH: loop header
LB: loop body
LE: loop exit
PB: predicated region body
PF: predicated region fallthrough
CT: control target
= control target key end

     0   :  { %2 = vsyncpa [#allocation1], 0  ;;  %s48_s8 = smov [#allocation0]   ;;  %s65_s0 = inlined_call_operand.hbm [shape: f32[8], index: 0, kind: input, shape index: {}]   ;;  %s66_s1 = inlined_call_operand.vmem [shape: f32[2,8], index: 1, kind: output, shape index: {}]  }
   0x1   :  { %s8_s0 = sshll.u32 %s65_s0, 4  ;;  %s10_s9 = sshll.u32 %s48_s8, 4  ;;  %s9_s0 = int_to_ptr.hbm [resolvable:$true] %s8_s0  ;;  %s11_s9 = int_to_ptr.vmem [resolvable:$true] %s10_s9 }
   0x2   :  { %13 = dma.hbm_to_vmem [thread:$0]  %s9_s0, 16, %s11_s9, [#allocation1]  }
   0x3   :  { %46 = dma.done.wait [#allocation1], 16  }
   0x4   :  { %47 = vsyncadd [#allocation1], 4294967280  ;;  %v18_v0 = vld [vmem:[#allocation0] ss:$0 sm:$0xff] }
   0x5   :  { %19 = vst [vmem:[%s66_s1] sm:$0x3] %v18_v0 }
   0x6   :  { %20 = vsyncpa [#allocation1], 1 }

// kernel: tile.28
= control target key start
LH: loop header
LB: loop body
LE: loop exit
PB: predicated region body
PF: predicated region fallthrough
CT: control target
= control target key end

     0   :  { %s22_s0 = inlined_call_operand.vmem [shape: f32[8], index: 0, kind: input, shape index: {}]   ;;  %s23_s1 = inlined_call_operand.vmem [shape: f32[2,8], index: 1, kind: output, shape index: {}]  }
   0x1   :  { %v4_v0 = vld [vmem:[%s22_s0] ss:$0 sm:$0xff] }
   0x2   :  { %5 = vst [vmem:[%s23_s1] sm:$0x3] %v4_v0 }

// kernel: tile.48
= control target key start
LH: loop header
LB: loop body
LE: loop exit
PB: predicated region body
PF: predicated region fallthrough
CT: control target
= control target key end

     0   :  { %s22_s0 = inlined_call_operand.vmem [shape: f32[3], index: 0, kind: input, shape index: {}]   ;;  %s23_s1 = inlined_call_operand.vmem [shape: f32[2,3], index: 1, kind: output, shape index: {}]  }
   0x1   :  { %v4_v0 = vld [vmem:[%s22_s0] ss:$0 sm:$0xff] }
   0x2   :  { %5 = vst [vmem:[%s23_s1] sm:$0x3] %v4_v0 }

// kernel: tile.4
= control target key start
LH: loop header
LB: loop body
LE: loop exit
PB: predicated region body
PF: predicated region fallthrough
CT: control target
= control target key end

     0   :  { %s26_s8 = smov 126   ;;  %vm7_vm0 = vcmask 7168   ;;  %s49_s0 = inlined_call_operand.vmem [shape: f32[2,3], index: 0, kind: input, shape index: {}]   ;;  %s50_s1 = inlined_call_operand.vmem [shape: f32[6,1], index: 1, kind: output, shape index: {}]  }
   0x1   :  { %v4_v0 = vld [vmem:[%s49_s0] sm:$0x3]  ;;  %s25_s0 = smov 127  }
   0x2   :  { %5 = vst [vmem:[#allocation0] sm:$0x3] %v4_v0 }
   0x9   :  { %v9_v1 = vld [vmem:[#allocation0] sm:$0x3]  }
   0xa   :  { %10 = vrot.lane.b32.xlu0 %v9_v1, %s25_s0  ;;  %v15_v2 = vld [vmem:[#allocation0] sm:$0x3]  }
   0xb   :  { %v6_v3 = vld [vmem:[#allocation0] sm:$0x3]  }
   0xc   :  { %8 = vst.msk [vmem:[%s50_s1] ss:$3 sm:$0x3] %vm7_vm0, %v6_v3  }
  0x12   :  { %16 = vrot.lane.b32.xlu0 %v15_v2, %s26_s8 }
  0x7c   :  { %v11_v4 = vpop.permute.xlu0 %10  }
  0x7d   :  { %21 = vst.msk [vmem:[%s50_s1 + $0x1] ss:$3 sm:$0x3] %vm7_vm0, %v11_v4  }
  0x84   :  { %v17_v5 = vpop.permute.xlu0 %16  }
  0x85   :  { %22 = vst.msk [vmem:[%s50_s1 + $0x2] ss:$3 sm:$0x3] %vm7_vm0, %v17_v5  }

// kernel: autoencoder_forward.1
= control target key start
LH: loop header
LB: loop body
LE: loop exit
PB: predicated region body
PF: predicated region fallthrough
CT: control target
= control target key end

     0   :  { %18 = vsyncpa [#allocation8], 0  ;;  %s11469_s0 = inlined_call_operand.vmem [shape: f32[8,256], index: 0, kind: input, shape index: {}]   ;;  %s11470_s1 = inlined_call_operand.vmem [shape: f32[16,73], index: 1, kind: input, shape index: {}]   ;;  %s11471_s2 = inlined_call_operand.vmem [shape: f32[8,145], index: 2, kind: input, shape index: {}]   ;;  %s11472_s3 = inlined_call_operand.vmem [shape: f32[16,73], index: 3, kind: input, shape index: {}]   ;;  %s11473_s4 = inlined_call_operand.vmem [shape: f32[8,145], index: 4, kind: input, shape index: {}]   ;;  %s11474_s5 = inlined_call_operand.vmem [shape: f32[6,33], index: 5, kind: input, shape index: {}]   ;;  %s11475_s6 = inlined_call_operand.vmem [shape: bf16[9,256,256], index: 6, kind: input, shape index: {}]   ;;  %s11476_s7 = inlined_call_operand.hbm [shape: bf16[4,256,64], index: 7, kind: input, shape index: {}]   ;;  %s11477_s8 = inlined_call_operand.vmem [shape: bf16[9,64,16], index: 8, kind: input, shape index: {}]   ;;  %s11478_s9 = inlined_call_operand.vmem [shape: bf16[4,16,9], index: 9, kind: input, shape index: {}]   ;;  %s11479_s10 = inlined_call_operand.vmem [shape: bf16[9,9,49], index: 10, kind: input, shape index: {}]   ;;  %s11480_s11 = inlined_call_operand.hbm [shape: bf16[9,49,225], index: 11, kind: input, shape index: {}]   ;;  %s11481_s12 = inlined_call_operand.hbm [shape: bf16[4,225,256], index: 12, kind: input, shape index: {}]   ;;  %s11482_s13 = inlined_call_operand.vmem [shape: f32[6,256], index: 13, kind: output, shape index: {}]  }
   0x1   :  { %19 = vsyncpa [#allocation10], 0  ;;  %s57_s27 = sshll.u32 %s11480_s11, 4  ;;  %s9163_s28 = smov [#allocation9]   ;;  %s58_s27 = int_to_ptr.hbm [resolvable:$true] %s57_s27 }
   0x2   :  { %s59_s29 = sshll.u32 %s9163_s28, 4  ;;  %s38_s15 = sshll.u32 %s11476_s7, 4  ;;  %s60_s29 = int_to_ptr.vmem [resolvable:$true] %s59_s29  ;;  %s39_s15 = int_to_ptr.hbm [resolvable:$true] %s38_s15 }
   0x3   :  { %s9164_s16 = smov 128   ;;  %s9165_s17 = smov 8  }
   0x4   :  { %65 = dma.hbm_to_vmem [thread:$0]  %s58_s27, 8064, %s60_s29, [#allocation10], %s9164_s16, %s9164_s16, %s9165_s17  }
   0x5   :  { %s9166_s18 = smov [#allocation7]   ;;  %s9167_s20 = smov 64  }
   0x6   :  { %s40_s19 = sshll.u32 %s9166_s18, 4  ;;  %s9168_s21 = smov 4   ;;  %s41_s19 = int_to_ptr.vmem [resolvable:$true] %s40_s19 }
   0x7   :  { %46 = dma.hbm_to_vmem [thread:$0]  %s39_s15, 8192, %s41_s19, [#allocation8], %s9167_s20, %s9167_s20, %s9168_s21  }
   0x8   :  { %s70_s23 = sshll.u32 %s11481_s12, 4  ;;  %s9169_s24 = smov [#allocation11]   ;;  %s71_s23 = int_to_ptr.hbm [resolvable:$true] %s70_s23 }
   0x9   :  { %s72_s25 = sshll.u32 %s9169_s24, 4  ;;  %s73_s25 = int_to_ptr.vmem [resolvable:$true] %s72_s25 }
   0xa   :  { %78 = dma.hbm_to_vmem [thread:$0]  %s71_s23, 14848, %s73_s25, [#allocation10], %s9164_s16, %s9164_s16, %s9165_s17  }
   0xb   :  { %9159 = dma.done.wait [#allocation8], 8192  }
   0xc   :  { %9160 = vsyncadd [#allocation8], 4294959104 }
   0xd   :  { %9161 = dma.done.wait [#allocation10], 22912  }
   0xe   :  { %9162 = vsyncadd [#allocation10], 4294944384  ;;  %v5886_v0 = vld [vmem:[%s11475_s6 + $0x70] sm:$0xf]  ;;  %v8520_v1 = vld [vmem:[%s11475_s6 + $0x74] sm:$0xf0] }
   0xf   :  { %v5950_v2 = vld [vmem:[%s11475_s6 + $0xf0] sm:$0xf]  ;;  %v5887_v3 = vor.u32 %v8520_v1, %v5886_v0  ;;  %v8536_v4 = vld [vmem:[%s11475_s6 + $0xf4] sm:$0xf0]  ;;  %v8519_v5 = vld [vmem:[%s11475_s6 + $0x74] sm:$0xf] }
  0x10   :  { %v5888_v6 = vld [vmem:[%s11475_s6 + $0x78] sm:$0xf0]  ;;  %v5951_v7 = vor.u32 %v8536_v4, %v5950_v2  ;;  %v8535_v9 = vld [vmem:[%s11475_s6 + $0xf4] sm:$0xf]  ;;  %v5878_v11 = vld [vmem:[%s11475_s6 + $0x60] sm:$0xf] }
  0x11   :  { %v5891_v8 = vor.u32 %v8519_v5, %v5888_v6  ;;  %v5952_v10 = vld [vmem:[%s11475_s6 + $0xf8] sm:$0xf0]  ;;  %288 = vmatpush.bf16.msra.mxu0 %v5887_v3  ;;  %v8518_v13 = vld [vmem:[%s11475_s6 + $0x64] sm:$0xf0]  ;;  %v5942_v14 = vld [vmem:[%s11475_s6 + $0xe0] sm:$0xf] }
  0x12   :  { %v5955_v12 = vor.u32 %v8535_v9, %v5952_v10  ;;  %v8534_v15 = vld [vmem:[%s11475_s6 + $0xe4] sm:$0xf0]  ;;  %301 = vmatpush.bf16.msra.mxu1 %v5951_v7  ;;  %v5879_v16 = vor.u32 %v8518_v13, %v5878_v11  ;;  %v8517_v18 = vld [vmem:[%s11475_s6 + $0x64] sm:$0xf]  ;;  %v5880_v19 = vld [vmem:[%s11475_s6 + $0x68] sm:$0xf0] }
  0x13   :  { %314 = vmatpush.bf16.msra.mxu2 %v5891_v8  ;;  %v5943_v17 = vor.u32 %v8534_v15, %v5942_v14  ;;  %v8533_v20 = vld [vmem:[%s11475_s6 + $0xe4] sm:$0xf]  ;;  %v5883_v21 = vor.u32 %v8517_v18, %v5880_v19  ;;  %v5944_v22 = vld [vmem:[%s11475_s6 + $0xe8] sm:$0xf0]  ;;  %v5870_v23 = vld [vmem:[%s11475_s6 + $0x50] sm:$0xf] }
  0x14   :  { %327 = vmatpush.bf16.msra.mxu3 %v5955_v12  ;;  %v8516_v24 = vld [vmem:[%s11475_s6 + $0x54] sm:$0xf0]  ;;  %v5947_v25 = vor.u32 %v8533_v20, %v5944_v22  ;;  %v5934_v26 = vld [vmem:[%s11475_s6 + $0xd0] sm:$0xf]  ;;  %v8515_v28 = vld [vmem:[%s11475_s6 + $0x54] sm:$0xf] }
  0x15   :  { %v8532_v27 = vld [vmem:[%s11475_s6 + $0xd4] sm:$0xf0]  ;;  %289 = vmatpush.bf16.msra.mxu0 %v5879_v16  ;;  %v5871_v29 = vor.u32 %v8516_v24, %v5870_v23  ;;  %v5872_v30 = vld [vmem:[%s11475_s6 + $0x58] sm:$0xf0]  ;;  %v8531_v31 = vld [vmem:[%s11475_s6 + $0xd4] sm:$0xf] }
  0x16   :  { %v5936_v32 = vld [vmem:[%s11475_s6 + $0xd8] sm:$0xf0]  ;;  %302 = vmatpush.bf16.msra.mxu1 %v5943_v17  ;;  %v5935_v33 = vor.u32 %v8532_v27, %v5934_v26  ;;  %v5875_v34 = vor.u32 %v8515_v28, %v5872_v30  ;;  %v5862_v35 = vld [vmem:[%s11475_s6 + $0x40] sm:$0xf]  ;;  %v8514_v36 = vld [vmem:[%s11475_s6 + $0x44] sm:$0xf0] }
  0x17   :  { %315 = vmatpush.bf16.msra.mxu2 %v5883_v21  ;;  %v5926_v37 = vld [vmem:[%s11475_s6 + $0xc0] sm:$0xf]  ;;  %v5939_v38 = vor.u32 %v8531_v31, %v5936_v32  ;;  %v8530_v39 = vld [vmem:[%s11475_s6 + $0xc4] sm:$0xf0]  ;;  %v8513_v40 = vld [vmem:[%s11475_s6 + $0x44] sm:$0xf]  ;;  %v5863_v44 = vor.u32 %v8514_v36, %v5862_v35 }
  0x18   :  { %328 = vmatpush.bf16.msra.mxu3 %v5947_v25  ;;  %v5864_v41 = vld [vmem:[%s11475_s6 + $0x48] sm:$0xf0]  ;;  %v8529_v42 = vld [vmem:[%s11475_s6 + $0xc4] sm:$0xf]  ;;  %v5927_v45 = vor.u32 %v8530_v39, %v5926_v37  ;;  %v5854_v47 = vld [vmem:[%s11475_s6 + $0x30] sm:$0xf] }
  0x19   :  { %v5928_v43 = vld [vmem:[%s11475_s6 + $0xc8] sm:$0xf0]  ;;  %290 = vmatpush.bf16.msra.mxu0 %v5871_v29  ;;  %v5867_v46 = vor.u32 %v8513_v40, %v5864_v41  ;;  %v8512_v48 = vld [vmem:[%s11475_s6 + $0x34] sm:$0xf0]  ;;  %v5918_v49 = vld [vmem:[%s11475_s6 + $0xb0] sm:$0xf] }
  0x1a   :  { %303 = vmatpush.bf16.msra.mxu1 %v5935_v33  ;;  %v5931_v50 = vor.u32 %v8529_v42, %v5928_v43  ;;  %v8528_v51 = vld [vmem:[%s11475_s6 + $0xb4] sm:$0xf0]  ;;  %v8511_v52 = vld [vmem:[%s11475_s6 + $0x34] sm:$0xf]  ;;  %v5856_v53 = vld [vmem:[%s11475_s6 + $0x38] sm:$0xf0]  ;;  %v5855_v56 = vor.u32 %v8512_v48, %v5854_v47 }
  0x1b   :  { %316 = vmatpush.bf16.msra.mxu2 %v5875_v34  ;;  %v8527_v54 = vld [vmem:[%s11475_s6 + $0xb4] sm:$0xf]  ;;  %v5920_v55 = vld [vmem:[%s11475_s6 + $0xb8] sm:$0xf0]  ;;  %v5919_v57 = vor.u32 %v8528_v51, %v5918_v49  ;;  %v5859_v58 = vor.u32 %v8511_v52, %v5856_v53  ;;  %v5846_v59 = vld [vmem:[%s11475_s6 + $0x20] sm:$0xf] }
  0x1c   :  { %329 = vmatpush.bf16.msra.mxu3 %v5939_v38  ;;  %v8510_v60 = vld [vmem:[%s11475_s6 + $0x24] sm:$0xf0]  ;;  %v5910_v61 = vld [vmem:[%s11475_s6 + $0xa0] sm:$0xf]  ;;  %v5923_v62 = vor.u32 %v8527_v54, %v5920_v55  ;;  %v8509_v0 = vld [vmem:[%s11475_s6 + $0x24] sm:$0xf] }
  0x1d   :  { %291 = vmatpush.bf16.msra.mxu0 %v5863_v44  ;;  %v8526_v63 = vld [vmem:[%s11475_s6 + $0xa4] sm:$0xf0]  ;;  %v5848_v1 = vld [vmem:[%s11475_s6 + $0x28] sm:$0xf0]  ;;  %v8525_v2 = vld [vmem:[%s11475_s6 + $0xa4] sm:$0xf]  ;;  %v5847_v4 = vor.u32 %v8510_v60, %v5846_v59 }
  0x1e   :  { %304 = vmatpush.bf16.msra.mxu1 %v5927_v45  ;;  %v5912_v3 = vld [vmem:[%s11475_s6 + $0xa8] sm:$0xf0]  ;;  %v5911_v5 = vor.u32 %v8526_v63, %v5910_v61  ;;  %v5851_v6 = vor.u32 %v8509_v0, %v5848_v1  ;;  %v5838_v7 = vld [vmem:[%s11475_s6 + $0x10] sm:$0xf]  ;;  %v8508_v8 = vld [vmem:[%s11475_s6 + $0x14] sm:$0xf0] }
  0x1f   :  { %317 = vmatpush.bf16.msra.mxu2 %v5867_v46  ;;  %v5902_v9 = vld [vmem:[%s11475_s6 + $0x90] sm:$0xf]  ;;  %v5915_v10 = vor.u32 %v8525_v2, %v5912_v3  ;;  %v8524_v11 = vld [vmem:[%s11475_s6 + $0x94] sm:$0xf0]  ;;  %v8507_v12 = vld [vmem:[%s11475_s6 + $0x14] sm:$0xf]  ;;  %v5839_v16 = vor.u32 %v8508_v8, %v5838_v7 }
  0x20   :  { %330 = vmatpush.bf16.msra.mxu3 %v5931_v50  ;;  %v5840_v13 = vld [vmem:[%s11475_s6 + $0x18] sm:$0xf0]  ;;  %v8523_v14 = vld [vmem:[%s11475_s6 + $0x94] sm:$0xf]  ;;  %v5830_v17 = vld [vmem:[%s11475_s6] sm:$0xf]  ;;  %v5903_v19 = vor.u32 %v8524_v11, %v5902_v9 }
  0x21   :  { %292 = vmatpush.bf16.msra.mxu0 %v5855_v56  ;;  %v5904_v15 = vld [vmem:[%s11475_s6 + $0x98] sm:$0xf0]  ;;  %v8506_v18 = vld [vmem:[%s11475_s6 + $0x4] sm:$0xf0]  ;;  %v5843_v20 = vor.u32 %v8507_v12, %v5840_v13  ;;  %v5894_v21 = vld [vmem:[%s11475_s6 + $0x80] sm:$0xf] }
  0x22   :  { %305 = vmatpush.bf16.msra.mxu1 %v5919_v57  ;;  %v8522_v22 = vld [vmem:[%s11475_s6 + $0x84] sm:$0xf0]  ;;  %v8505_v23 = vld [vmem:[%s11475_s6 + $0x4] sm:$0xf]  ;;  %v5907_v24 = vor.u32 %v8523_v14, %v5904_v15  ;;  %v5832_v25 = vld [vmem:[%s11475_s6 + $0x8] sm:$0xf0]  ;;  %v5831_v31 = vor.u32 %v8506_v18, %v5830_v17 }
  0x23   :  { %318 = vmatpush.bf16.msra.mxu2 %v5859_v58  ;;  %v8521_v26 = vld [vmem:[%s11475_s6 + $0x84] sm:$0xf]  ;;  %v5896_v27 = vld [vmem:[%s11475_s6 + $0x88] sm:$0xf0]  ;;  %v6046_v28 = vld [vmem:[%s11475_s6 + $0x170] sm:$0xf]  ;;  %v5895_v35 = vor.u32 %v8522_v22, %v5894_v21  ;;  %v5835_v36 = vor.u32 %v8505_v23, %v5832_v25 }
  0x24   :  { %331 = vmatpush.bf16.msra.mxu3 %v5923_v62  ;;  %v8552_v29 = vld [vmem:[%s11475_s6 + $0x174] sm:$0xf0]  ;;  %v6110_v30 = vld [vmem:[%s11475_s6 + $0x1f0] sm:$0xf]  ;;  %v8551_v33 = vld [vmem:[%s11475_s6 + $0x174] sm:$0xf]  ;;  %v5899_v39 = vor.u32 %v8521_v26, %v5896_v27 }
  0x25   :  { %293 = vmatpush.bf16.msra.mxu0 %v5847_v4  ;;  %v8568_v32 = vld [vmem:[%s11475_s6 + $0x1f4] sm:$0xf0]  ;;  %v6048_v34 = vld [vmem:[%s11475_s6 + $0x178] sm:$0xf0]  ;;  %v8567_v37 = vld [vmem:[%s11475_s6 + $0x1f4] sm:$0xf]  ;;  %v6047_v40 = vor.u32 %v8552_v29, %v6046_v28 }
  0x26   :  { %306 = vmatpush.bf16.msra.mxu1 %v5911_v5  ;;  %v6112_v38 = vld [vmem:[%s11475_s6 + $0x1f8] sm:$0xf0]  ;;  %v6111_v41 = vor.u32 %v8568_v32, %v6110_v30  ;;  %v6051_v42 = vor.u32 %v8551_v33, %v6048_v34  ;;  %v6038_v43 = vld [vmem:[%s11475_s6 + $0x160] sm:$0xf]  ;;  %v8550_v44 = vld [vmem:[%s11475_s6 + $0x164] sm:$0xf0] }
  0x27   :  { %319 = vmatpush.bf16.msra.mxu2 %v5851_v6  ;;  %v6102_v45 = vld [vmem:[%s11475_s6 + $0x1e0] sm:$0xf]  ;;  %v6115_v46 = vor.u32 %v8567_v37, %v6112_v38  ;;  %v8566_v47 = vld [vmem:[%s11475_s6 + $0x1e4] sm:$0xf0]  ;;  %v8549_v48 = vld [vmem:[%s11475_s6 + $0x164] sm:$0xf]  ;;  %v6039_v52 = vor.u32 %v8550_v44, %v6038_v43 }
  0x28   :  { %332 = vmatpush.bf16.msra.mxu3 %v5915_v10  ;;  %v6040_v49 = vld [vmem:[%s11475_s6 + $0x168] sm:$0xf0]  ;;  %v8565_v50 = vld [vmem:[%s11475_s6 + $0x1e4] sm:$0xf]  ;;  %v6030_v53 = vld [vmem:[%s11475_s6 + $0x150] sm:$0xf]  ;;  %v6103_v54 = vor.u32 %v8566_v47, %v6102_v45 }
  0x29   :  { %294 = vmatpush.bf16.msra.mxu0 %v5839_v16  ;;  %v6104_v51 = vld [vmem:[%s11475_s6 + $0x1e8] sm:$0xf0]  ;;  %v6043_v55 = vor.u32 %v8549_v48, %v6040_v49  ;;  %v8548_v56 = vld [vmem:[%s11475_s6 + $0x154] sm:$0xf0]  ;;  %v6094_v57 = vld [vmem:[%s11475_s6 + $0x1d0] sm:$0xf] }
  0x2a   :  { %307 = vmatpush.bf16.msra.mxu1 %v5903_v19  ;;  %v8564_v58 = vld [vmem:[%s11475_s6 + $0x1d4] sm:$0xf0]  ;;  %v6107_v59 = vor.u32 %v8565_v50, %v6104_v51  ;;  %v8547_v60 = vld [vmem:[%s11475_s6 + $0x154] sm:$0xf]  ;;  %v6032_v61 = vld [vmem:[%s11475_s6 + $0x158] sm:$0xf0]  ;;  %v6031_v0 = vor.u32 %v8548_v56, %v6030_v53 }
  0x2b   :  { %320 = vmatpush.bf16.msra.mxu2 %v5843_v20  ;;  %v8563_v62 = vld [vmem:[%s11475_s6 + $0x1d4] sm:$0xf]  ;;  %v6096_v63 = vld [vmem:[%s11475_s6 + $0x1d8] sm:$0xf0]  ;;  %v6095_v1 = vor.u32 %v8564_v58, %v6094_v57  ;;  %v92_v2 = vld [vmem:[%s11469_s0] sm:$0xff]  ;;  %v6035_v4 = vor.u32 %v8547_v60, %v6032_v61  ;;  %vm2354_vm1 = vcmask 1040384  }
  0x2c   :  { %333 = vmatpush.bf16.msra.mxu3 %v5907_v24  ;;  %v93_v3 = vld [vmem:[%s11469_s0 + $0x8] sm:$0xff]  ;;  %v6022_v5 = vld [vmem:[%s11475_s6 + $0x140] sm:$0xf]  ;;  %v9531_v8 = vpack.c.bf16 %v92_v2, %v92_v2  ;;  %v6099_v10 = vor.u32 %v8563_v62, %v6096_v63  ;;  %v8545_v12 = vld [vmem:[%s11475_s6 + $0x144] sm:$0xf]  ;;  %vm2347_vm2 = vcmask 596992  }
  0x2d   :  { %295 = vmatpush.bf16.msra.mxu0 %v5831_v31  ;;  %v8546_v6 = vld [vmem:[%s11475_s6 + $0x144] sm:$0xf0]  ;;  %v6086_v7 = vld [vmem:[%s11475_s6 + $0x1c0] sm:$0xf]  ;;  %v9533_v9 = vpack.c.bf16 %v93_v3, %v93_v3  ;;  %v6024_v13 = vld [vmem:[%s11475_s6 + $0x148] sm:$0xf0] }
  0x2e   :  { %308 = vmatpush.bf16.msra.mxu1 %v5895_v35  ;;  %v8562_v11 = vld [vmem:[%s11475_s6 + $0x1c4] sm:$0xf0]  ;;  %v8561_v14 = vld [vmem:[%s11475_s6 + $0x1c4] sm:$0xf]  ;;  %v6088_v15 = vld [vmem:[%s11475_s6 + $0x1c8] sm:$0xf0]  ;;  %v6023_v16 = vor.u32 %v8546_v6, %v6022_v5  ;;  %v6027_v18 = vor.u32 %v8545_v12, %v6024_v13 }
  0x2f   :  { %321 = vmatpush.bf16.msra.mxu2 %v5835_v36  ;;  %v6087_v17 = vor.u32 %v8562_v11, %v6086_v7  ;;  %v6014_v19 = vld [vmem:[%s11475_s6 + $0x130] sm:$0xf]  ;;  %v8544_v20 = vld [vmem:[%s11475_s6 + $0x134] sm:$0xf0]  ;;  %v6091_v22 = vor.u32 %v8561_v14, %v6088_v15  ;;  %v8543_v24 = vld [vmem:[%s11475_s6 + $0x134] sm:$0xf] }
  0x30   :  { %334 = vmatpush.bf16.msra.mxu3 %v5899_v39  ;;  %v6078_v21 = vld [vmem:[%s11475_s6 + $0x1b0] sm:$0xf]  ;;  %v8560_v23 = vld [vmem:[%s11475_s6 + $0x1b4] sm:$0xf0]  ;;  %v6016_v25 = vld [vmem:[%s11475_s6 + $0x138] sm:$0xf0]  ;;  %296 = vmatmul.bf16.vlgmr.msra.gmra.mxu0 %v9531_v8  ;;  %v6015_v28 = vor.u32 %v8544_v20, %v6014_v19 }
  0x31   :  { %535 = vmatpush.bf16.msrb.mxu0 %v6047_v40  ;;  %309 = vmatmul.bf16.vlgmr.msra.gmra.mxu1 %v9533_v9  ;;  %v8559_v26 = vld [vmem:[%s11475_s6 + $0x1b4] sm:$0xf]  ;;  %v6080_v27 = vld [vmem:[%s11475_s6 + $0x1b8] sm:$0xf0]  ;;  %v6079_v29 = vor.u32 %v8560_v23, %v6078_v21  ;;  %v6019_v30 = vor.u32 %v8543_v24, %v6016_v25  ;;  %v6006_v31 = vld [vmem:[%s11475_s6 + $0x120] sm:$0xf] }
  0x32   :  { %548 = vmatpush.bf16.msrb.mxu1 %v6111_v41  ;;  %322 = vmatmul.bf16.vlgmr.msra.gmra.mxu2 %v9531_v8  ;;  %v8542_v32 = vld [vmem:[%s11475_s6 + $0x124] sm:$0xf0]  ;;  %v6070_v33 = vld [vmem:[%s11475_s6 + $0x1a0] sm:$0xf]  ;;  %v6083_v34 = vor.u32 %v8559_v26, %v6080_v27  ;;  %v8541_v36 = vld [vmem:[%s11475_s6 + $0x124] sm:$0xf] }
  0x33   :  { %561 = vmatpush.bf16.msrb.mxu2 %v6051_v42  ;;  %335 = vmatmul.bf16.vlgmr.msra.gmra.mxu3 %v9533_v9  ;;  %v8558_v35 = vld [vmem:[%s11475_s6 + $0x1a4] sm:$0xf0]  ;;  %v6008_v37 = vld [vmem:[%s11475_s6 + $0x128] sm:$0xf0]  ;;  %v8557_v38 = vld [vmem:[%s11475_s6 + $0x1a4] sm:$0xf]  ;;  %v6007_v40 = vor.u32 %v8542_v32, %v6006_v31 }
  0x34   :  { %574 = vmatpush.bf16.msrb.mxu3 %v6115_v46  ;;  %v6072_v39 = vld [vmem:[%s11475_s6 + $0x1a8] sm:$0xf0]  ;;  %v6071_v41 = vor.u32 %v8558_v35, %v6070_v33  ;;  %v6011_v42 = vor.u32 %v8541_v36, %v6008_v37  ;;  %v5998_v43 = vld [vmem:[%s11475_s6 + $0x110] sm:$0xf]  ;;  %v8540_v44 = vld [vmem:[%s11475_s6 + $0x114] sm:$0xf0] }
  0x35   :  { %536 = vmatpush.bf16.msrb.mxu0 %v6039_v52  ;;  %v6062_v45 = vld [vmem:[%s11475_s6 + $0x190] sm:$0xf]  ;;  %v6075_v46 = vor.u32 %v8557_v38, %v6072_v39  ;;  %v8556_v47 = vld [vmem:[%s11475_s6 + $0x194] sm:$0xf0]  ;;  %v8539_v48 = vld [vmem:[%s11475_s6 + $0x114] sm:$0xf]  ;;  %v5999_v52 = vor.u32 %v8540_v44, %v5998_v43 }
  0x36   :  { %549 = vmatpush.bf16.msrb.mxu1 %v6103_v54  ;;  %v6000_v49 = vld [vmem:[%s11475_s6 + $0x118] sm:$0xf0]  ;;  %v8555_v50 = vld [vmem:[%s11475_s6 + $0x194] sm:$0xf]  ;;  %v5990_v53 = vld [vmem:[%s11475_s6 + $0x100] sm:$0xf] }
  0x37   :  { %562 = vmatpush.bf16.msrb.mxu2 %v6043_v55  ;;  %v6064_v51 = vld [vmem:[%s11475_s6 + $0x198] sm:$0xf0]  ;;  %v8538_v54 = vld [vmem:[%s11475_s6 + $0x104] sm:$0xf0]  ;;  %v6063_v55 = vor.u32 %v8556_v47, %v6062_v45  ;;  %v6003_v56 = vor.u32 %v8539_v48, %v6000_v49  ;;  %v6054_v57 = vld [vmem:[%s11475_s6 + $0x180] sm:$0xf] }
  0x38   :  { %575 = vmatpush.bf16.msrb.mxu3 %v6107_v59  ;;  %v8554_v58 = vld [vmem:[%s11475_s6 + $0x184] sm:$0xf0]  ;;  %v8537_v59 = vld [vmem:[%s11475_s6 + $0x104] sm:$0xf]  ;;  %v6067_v60 = vor.u32 %v8555_v50, %v6064_v51  ;;  %v5992_v61 = vld [vmem:[%s11475_s6 + $0x108] sm:$0xf0]  ;;  %v5991_v3 = vor.u32 %v8538_v54, %v5990_v53 }
  0x39   :  { %537 = vmatpush.bf16.msrb.mxu0 %v6031_v0  ;;  %v8553_v62 = vld [vmem:[%s11475_s6 + $0x184] sm:$0xf]  ;;  %v6056_v63 = vld [vmem:[%s11475_s6 + $0x188] sm:$0xf0]  ;;  %v6206_v0 = vld [vmem:[%s11475_s6 + $0x270] sm:$0xf]  ;;  %v6055_v7 = vor.u32 %v8554_v58, %v6054_v57 }
  0x3a   :  { %550 = vmatpush.bf16.msrb.mxu1 %v6095_v1  ;;  %v8584_v1 = vld [vmem:[%s11475_s6 + $0x274] sm:$0xf0]  ;;  %v6270_v2 = vld [vmem:[%s11475_s6 + $0x2f0] sm:$0xf]  ;;  %v8583_v5 = vld [vmem:[%s11475_s6 + $0x274] sm:$0xf]  ;;  %v6059_v13 = vor.u32 %v8553_v62, %v6056_v63 }
  0x3b   :  { %563 = vmatpush.bf16.msrb.mxu2 %v6035_v4  ;;  %v8600_v4 = vld [vmem:[%s11475_s6 + $0x2f4] sm:$0xf0]  ;;  %v6208_v6 = vld [vmem:[%s11475_s6 + $0x278] sm:$0xf0]  ;;  %v8599_v11 = vld [vmem:[%s11475_s6 + $0x2f4] sm:$0xf]  ;;  %v6207_v14 = vor.u32 %v8584_v1, %v6206_v0 }
  0x3c   :  { %576 = vmatpush.bf16.msrb.mxu3 %v6099_v10  ;;  %v5995_v10 = vor.u32 %v8537_v59, %v5992_v61  ;;  %v6272_v12 = vld [vmem:[%s11475_s6 + $0x2f8] sm:$0xf0]  ;;  %v6271_v15 = vor.u32 %v8600_v4, %v6270_v2  ;;  %v6262_v19 = vld [vmem:[%s11475_s6 + $0x2e0] sm:$0xf]  ;;  %v8598_v21 = vld [vmem:[%s11475_s6 + $0x2e4] sm:$0xf0] }
  0x3d   :  { %538 = vmatpush.bf16.msrb.mxu0 %v6023_v16  ;;  %v6211_v16 = vor.u32 %v8583_v5, %v6208_v6  ;;  %v6275_v20 = vor.u32 %v8599_v11, %v6272_v12  ;;  %v6200_v23 = vld [vmem:[%s11475_s6 + $0x268] sm:$0xf0]  ;;  %v8597_v24 = vld [vmem:[%s11475_s6 + $0x2e4] sm:$0xf]  ;;  %v6263_v27 = vor.u32 %v8598_v21, %v6262_v19  ;;  %v6254_v31 = vld [vmem:[%s11475_s6 + $0x2d0] sm:$0xf] }
  0x3e   :  { %551 = vmatpush.bf16.msrb.mxu1 %v6087_v17  ;;  %v6198_v17 = vld [vmem:[%s11475_s6 + $0x260] sm:$0xf]  ;;  %v6264_v25 = vld [vmem:[%s11475_s6 + $0x2e8] sm:$0xf0]  ;;  %v8596_v33 = vld [vmem:[%s11475_s6 + $0x2d4] sm:$0xf0] }
  0x3f   :  { %564 = vmatpush.bf16.msrb.mxu2 %v6027_v18  ;;  %v8582_v18 = vld [vmem:[%s11475_s6 + $0x264] sm:$0xf0]  ;;  %v6267_v32 = vor.u32 %v8597_v24, %v6264_v25  ;;  %v6192_v35 = vld [vmem:[%s11475_s6 + $0x258] sm:$0xf0]  ;;  %v8595_v36 = vld [vmem:[%s11475_s6 + $0x2d4] sm:$0xf]  ;;  %v6255_v39 = vor.u32 %v8596_v33, %v6254_v31 }
  0x40   :  { %577 = vmatpush.bf16.msrb.mxu3 %v6091_v22  ;;  %v8581_v22 = vld [vmem:[%s11475_s6 + $0x264] sm:$0xf]  ;;  %v6199_v26 = vor.u32 %v8582_v18, %v6198_v17  ;;  %v6256_v37 = vld [vmem:[%s11475_s6 + $0x2d8] sm:$0xf0]  ;;  %v6246_v43 = vld [vmem:[%s11475_s6 + $0x2c0] sm:$0xf] }
  0x41   :  { %539 = vmatpush.bf16.msrb.mxu0 %v6015_v28  ;;  %v6203_v28 = vor.u32 %v8581_v22, %v6200_v23  ;;  %v6259_v44 = vor.u32 %v8595_v36, %v6256_v37  ;;  %v8594_v45 = vld [vmem:[%s11475_s6 + $0x2c4] sm:$0xf0]  ;;  %v6184_v47 = vld [vmem:[%s11475_s6 + $0x248] sm:$0xf0]  ;;  %v8593_v48 = vld [vmem:[%s11475_s6 + $0x2c4] sm:$0xf] }
  0x42   :  { %552 = vmatpush.bf16.msrb.mxu1 %v6079_v29  ;;  %v6190_v29 = vld [vmem:[%s11475_s6 + $0x250] sm:$0xf]  ;;  %v6248_v49 = vld [vmem:[%s11475_s6 + $0x2c8] sm:$0xf0]  ;;  %v6247_v51 = vor.u32 %v8594_v45, %v6246_v43  ;;  %v8576_v54 = vld [vmem:[%s11475_s6 + $0x234] sm:$0xf0] }
  0x43   :  { %565 = vmatpush.bf16.msrb.mxu2 %v6019_v30  ;;  %v8580_v30 = vld [vmem:[%s11475_s6 + $0x254] sm:$0xf0]  ;;  %v6174_v53 = vld [vmem:[%s11475_s6 + $0x230] sm:$0xf]  ;;  %v8575_v58 = vld [vmem:[%s11475_s6 + $0x234] sm:$0xf] }
  0x44   :  { %578 = vmatpush.bf16.msrb.mxu3 %v6083_v34  ;;  %v8579_v34 = vld [vmem:[%s11475_s6 + $0x254] sm:$0xf]  ;;  %v6191_v38 = vor.u32 %v8580_v30, %v6190_v29  ;;  %v8592_v57 = vld [vmem:[%s11475_s6 + $0x2b4] sm:$0xf0]  ;;  %v6176_v59 = vld [vmem:[%s11475_s6 + $0x238] sm:$0xf0]  ;;  %v6175_v62 = vor.u32 %v8576_v54, %v6174_v53 }
  0x45   :  { %540 = vmatpush.bf16.msrb.mxu0 %v6007_v40  ;;  %v6195_v40 = vor.u32 %v8579_v34, %v6192_v35  ;;  %v6240_v61 = vld [vmem:[%s11475_s6 + $0x2b8] sm:$0xf0]  ;;  %v6179_v0 = vor.u32 %v8575_v58, %v6176_v59  ;;  %v6166_v1 = vld [vmem:[%s11475_s6 + $0x220] sm:$0xf]  ;;  %v8574_v2 = vld [vmem:[%s11475_s6 + $0x224] sm:$0xf0] }
  0x46   :  { %553 = vmatpush.bf16.msrb.mxu1 %v6071_v41  ;;  %v6182_v41 = vld [vmem:[%s11475_s6 + $0x240] sm:$0xf]  ;;  %v8590_v5 = vld [vmem:[%s11475_s6 + $0x2a4] sm:$0xf0]  ;;  %v8573_v6 = vld [vmem:[%s11475_s6 + $0x224] sm:$0xf]  ;;  %v6167_v12 = vor.u32 %v8574_v2, %v6166_v1 }
  0x47   :  { %566 = vmatpush.bf16.msrb.mxu2 %v6011_v42  ;;  %v8578_v42 = vld [vmem:[%s11475_s6 + $0x244] sm:$0xf0]  ;;  %v6232_v11 = vld [vmem:[%s11475_s6 + $0x2a8] sm:$0xf0]  ;;  %v6222_v17 = vld [vmem:[%s11475_s6 + $0x290] sm:$0xf] }
  0x48   :  { %579 = vmatpush.bf16.msrb.mxu3 %v6075_v46  ;;  %v8577_v46 = vld [vmem:[%s11475_s6 + $0x244] sm:$0xf]  ;;  %v6183_v50 = vor.u32 %v8578_v42, %v6182_v41  ;;  %v8588_v19 = vld [vmem:[%s11475_s6 + $0x294] sm:$0xf0]  ;;  %v6160_v21 = vld [vmem:[%s11475_s6 + $0x218] sm:$0xf0] }
  0x49   :  { %541 = vmatpush.bf16.msrb.mxu0 %v5999_v52  ;;  %v6187_v52 = vor.u32 %v8577_v46, %v6184_v47  ;;  %v8587_v22 = vld [vmem:[%s11475_s6 + $0x294] sm:$0xf]  ;;  %v6224_v23 = vld [vmem:[%s11475_s6 + $0x298] sm:$0xf0]  ;;  %v6150_v25 = vld [vmem:[%s11475_s6 + $0x200] sm:$0xf] }
  0x4a   :  { %554 = vmatpush.bf16.msrb.mxu1 %v6063_v55  ;;  %v6238_v55 = vld [vmem:[%s11475_s6 + $0x2b0] sm:$0xf]  ;;  %v6214_v29 = vld [vmem:[%s11475_s6 + $0x280] sm:$0xf]  ;;  %v8586_v30 = vld [vmem:[%s11475_s6 + $0x284] sm:$0xf0] }
  0x4b   :  { %567 = vmatpush.bf16.msrb.mxu2 %v6003_v56  ;;  %v6251_v56 = vor.u32 %v8593_v48, %v6248_v49  ;;  %v6239_v63 = vor.u32 %v8592_v57, %v6238_v55  ;;  %v8569_v31 = vld [vmem:[%s11475_s6 + $0x204] sm:$0xf]  ;;  %v6152_v33 = vld [vmem:[%s11475_s6 + $0x208] sm:$0xf0]  ;;  %v6366_v36 = vld [vmem:[%s11475_s6 + $0x370] sm:$0xf]  ;;  %v6215_v43 = vor.u32 %v8586_v30, %v6214_v29 }
  0x4c   :  { %580 = vmatpush.bf16.msrb.mxu3 %v6067_v60  ;;  %v8591_v60 = vld [vmem:[%s11475_s6 + $0x2b4] sm:$0xf]  ;;  %v8585_v34 = vld [vmem:[%s11475_s6 + $0x284] sm:$0xf]  ;;  %v6216_v35 = vld [vmem:[%s11475_s6 + $0x288] sm:$0xf0] }
  0x4d   :  { %542 = vmatpush.bf16.msrb.mxu0 %v5991_v3  ;;  %v6230_v3 = vld [vmem:[%s11475_s6 + $0x2a0] sm:$0xf]  ;;  %v6243_v4 = vor.u32 %v8591_v60, %v6240_v61  ;;  %v8616_v37 = vld [vmem:[%s11475_s6 + $0x374] sm:$0xf0]  ;;  %v8615_v41 = vld [vmem:[%s11475_s6 + $0x374] sm:$0xf]  ;;  %v6219_v47 = vor.u32 %v8585_v34, %v6216_v35 }
  0x4e   :  { %555 = vmatpush.bf16.msrb.mxu1 %v6055_v7  ;;  %v6168_v7 = vld [vmem:[%s11475_s6 + $0x228] sm:$0xf0]  ;;  %v6368_v42 = vld [vmem:[%s11475_s6 + $0x378] sm:$0xf0]  ;;  %v8631_v45 = vld [vmem:[%s11475_s6 + $0x3f4] sm:$0xf]  ;;  %v6367_v48 = vor.u32 %v8616_v37, %v6366_v36 }
  0x4f   :  { %568 = vmatpush.bf16.msrb.mxu2 %v5995_v10  ;;  %v8589_v10 = vld [vmem:[%s11475_s6 + $0x2a4] sm:$0xf]  ;;  %v6432_v46 = vld [vmem:[%s11475_s6 + $0x3f8] sm:$0xf0]  ;;  %v6422_v53 = vld [vmem:[%s11475_s6 + $0x3e0] sm:$0xf] }
  0x50   :  { %581 = vmatpush.bf16.msrb.mxu3 %v6059_v13  ;;  %543 = vmatmul.bf16.vlgmr.msrb.gmra.mxu0 %v9531_v8  ;;  %v6231_v13 = vor.u32 %v8590_v5, %v6230_v3  ;;  %v6235_v18 = vor.u32 %v8589_v10, %v6232_v11  ;;  %v6435_v54 = vor.u32 %v8631_v45, %v6432_v46  ;;  %v8630_v55 = vld [vmem:[%s11475_s6 + $0x3e4] sm:$0xf0]  ;;  %v6360_v57 = vld [vmem:[%s11475_s6 + $0x368] sm:$0xf0]  ;;  %v8629_v58 = vld [vmem:[%s11475_s6 + $0x3e4] sm:$0xf] }
  0x51   :  { %782 = vmatpush.bf16.msra.mxu0 %v6207_v14  ;;  %556 = vmatmul.bf16.vlgmr.msrb.gmra.mxu1 %v9533_v9  ;;  %v6171_v14 = vor.u32 %v8573_v6, %v6168_v7  ;;  %v6424_v59 = vld [vmem:[%s11475_s6 + $0x3e8] sm:$0xf0]  ;;  %v6423_v61 = vor.u32 %v8630_v55, %v6422_v53  ;;  %v6414_v1 = vld [vmem:[%s11475_s6 + $0x3d0] sm:$0xf]  ;;  %v8628_v3 = vld [vmem:[%s11475_s6 + $0x3d4] sm:$0xf0] }
  0x52   :  { %795 = vmatpush.bf16.msra.mxu1 %v6271_v15  ;;  %569 = vmatmul.bf16.vlgmr.msrb.gmra.mxu2 %v9531_v8  ;;  %v6158_v15 = vld [vmem:[%s11475_s6 + $0x210] sm:$0xf]  ;;  %v6427_v2 = vor.u32 %v8629_v58, %v6424_v59  ;;  %v6352_v5 = vld [vmem:[%s11475_s6 + $0x358] sm:$0xf0]  ;;  %v8627_v6 = vld [vmem:[%s11475_s6 + $0x3d4] sm:$0xf]  ;;  %v6415_v11 = vor.u32 %v8628_v3, %v6414_v1 }
  0x53   :  { %808 = vmatpush.bf16.msra.mxu2 %v6211_v16  ;;  %582 = vmatmul.bf16.vlgmr.msrb.gmra.mxu3 %v9533_v9  ;;  %v8572_v16 = vld [vmem:[%s11475_s6 + $0x214] sm:$0xf0]  ;;  %v6416_v7 = vld [vmem:[%s11475_s6 + $0x3d8] sm:$0xf0]  ;;  %v8607_v30 = vld [vmem:[%s11475_s6 + $0x334] sm:$0xf] }
  0x54   :  { %821 = vmatpush.bf16.msra.mxu3 %v6275_v20  ;;  %v8571_v20 = vld [vmem:[%s11475_s6 + $0x214] sm:$0xf]  ;;  %v6159_v24 = vor.u32 %v8572_v16, %v6158_v15  ;;  %v6406_v15 = vld [vmem:[%s11475_s6 + $0x3c0] sm:$0xf]  ;;  %v6419_v16 = vor.u32 %v8627_v6, %v6416_v7  ;;  %v8624_v29 = vld [vmem:[%s11475_s6 + $0x3b4] sm:$0xf0] }
  0x55   :  { %783 = vmatpush.bf16.msra.mxu0 %v6199_v26  ;;  %v8570_v26 = vld [vmem:[%s11475_s6 + $0x204] sm:$0xf0]  ;;  %v6326_v37 = vld [vmem:[%s11475_s6 + $0x320] sm:$0xf]  ;;  %v6392_v45 = vld [vmem:[%s11475_s6 + $0x3a8] sm:$0xf0] }
  0x56   :  { %796 = vmatpush.bf16.msra.mxu1 %v6263_v27  ;;  %v6223_v27 = vor.u32 %v8588_v19, %v6222_v17  ;;  %v8626_v17 = vld [vmem:[%s11475_s6 + $0x3c4] sm:$0xf0]  ;;  %v6344_v19 = vld [vmem:[%s11475_s6 + $0x348] sm:$0xf0]  ;;  %v8620_v53 = vld [vmem:[%s11475_s6 + $0x394] sm:$0xf0] }
  0x57   :  { %809 = vmatpush.bf16.msra.mxu2 %v6203_v28  ;;  %v6163_v28 = vor.u32 %v8571_v20, %v6160_v21  ;;  %v8625_v20 = vld [vmem:[%s11475_s6 + $0x3c4] sm:$0xf]  ;;  %v6408_v21 = vld [vmem:[%s11475_s6 + $0x3c8] sm:$0xf0]  ;;  %v6320_v55 = vld [vmem:[%s11475_s6 + $0x318] sm:$0xf0] }
  0x58   :  { %822 = vmatpush.bf16.msra.mxu3 %v6267_v32  ;;  %v6227_v32 = vor.u32 %v8587_v22, %v6224_v23  ;;  %v6407_v23 = vor.u32 %v8626_v17, %v6406_v15  ;;  %v6310_v59 = vld [vmem:[%s11475_s6 + $0x300] sm:$0xf]  ;;  %v8601_v1 = vld [vmem:[%s11475_s6 + $0x304] sm:$0xf]  ;;  %v6312_v3 = vld [vmem:[%s11475_s6 + $0x308] sm:$0xf0] }
  0x59   :  { %784 = vmatpush.bf16.msra.mxu0 %v6191_v38  ;;  %v6430_v38 = vld [vmem:[%s11475_s6 + $0x3f0] sm:$0xf]  ;;  %v8648_v7 = vld [vmem:[%s11475_s6 + $0x474] sm:$0xf0]  ;;  %v8663_v17 = vld [vmem:[%s11475_s6 + $0x4f4] sm:$0xf] }
  0x5a   :  { %797 = vmatpush.bf16.msra.mxu1 %v6255_v39  ;;  %v6151_v39 = vor.u32 %v8570_v26, %v6150_v25  ;;  %v6334_v25 = vld [vmem:[%s11475_s6 + $0x330] sm:$0xf]  ;;  %v8608_v26 = vld [vmem:[%s11475_s6 + $0x334] sm:$0xf0]  ;;  %vm3079_vm3 = vcmask 523264   ;;  %vm3492_vm4 = vcmask 122880  }
  0x5b   :  { %810 = vmatpush.bf16.msra.mxu2 %v6195_v40  ;;  %v8632_v40 = vld [vmem:[%s11475_s6 + $0x3f4] sm:$0xf0]  ;;  %v6335_v34 = vor.u32 %v8608_v26, %v6334_v25  ;;  %v6526_v6 = vld [vmem:[%s11475_s6 + $0x470] sm:$0xf]  ;;  %v6582_v25 = vld [vmem:[%s11475_s6 + $0x4e0] sm:$0xf] }
  0x5c   :  { %823 = vmatpush.bf16.msra.mxu3 %v6259_v44  ;;  %v6155_v44 = vor.u32 %v8569_v31, %v6152_v33  ;;  %v6431_v49 = vor.u32 %v8632_v40, %v6430_v38  ;;  %v6336_v31 = vld [vmem:[%s11475_s6 + $0x338] sm:$0xf0]  ;;  %v8606_v38 = vld [vmem:[%s11475_s6 + $0x324] sm:$0xf0]  ;;  %vm3097_vm5 = vcmask 130048   ;;  %vm3515_vm6 = vcmask 138240  }
  0x5d   :  { %785 = vmatpush.bf16.msra.mxu0 %v6183_v50  ;;  %v6371_v50 = vor.u32 %v8615_v41, %v6368_v42  ;;  %v6400_v33 = vld [vmem:[%s11475_s6 + $0x3b8] sm:$0xf0]  ;;  %v6339_v36 = vor.u32 %v8607_v30, %v6336_v31  ;;  %v8622_v41 = vld [vmem:[%s11475_s6 + $0x3a4] sm:$0xf0]  ;;  %v8605_v42 = vld [vmem:[%s11475_s6 + $0x324] sm:$0xf]  ;;  %v6327_v46 = vor.u32 %v8606_v38, %v6326_v37 }
  0x5e   :  { %798 = vmatpush.bf16.msra.mxu1 %v6247_v51  ;;  %v6358_v51 = vld [vmem:[%s11475_s6 + $0x360] sm:$0xf]  ;;  %v8661_v30 = vld [vmem:[%s11475_s6 + $0x4e4] sm:$0xf]  ;;  %v6584_v31 = vld [vmem:[%s11475_s6 + $0x4e8] sm:$0xf0] }
  0x5f   :  { %811 = vmatpush.bf16.msra.mxu2 %v6187_v52  ;;  %v8614_v52 = vld [vmem:[%s11475_s6 + $0x364] sm:$0xf0]  ;;  %v6574_v37 = vld [vmem:[%s11475_s6 + $0x4d0] sm:$0xf]  ;;  %v6587_v38 = vor.u32 %v8661_v30, %v6584_v31  ;;  %v6470_v31 = vld [vmem:[%s11475_s6 + $0x400] sm:$0xf] }
  0x60   :  { %824 = vmatpush.bf16.msra.mxu3 %v6251_v56  ;;  %v8613_v56 = vld [vmem:[%s11475_s6 + $0x364] sm:$0xf]  ;;  %v6359_v60 = vor.u32 %v8614_v52, %v6358_v51  ;;  %v6382_v51 = vld [vmem:[%s11475_s6 + $0x390] sm:$0xf]  ;;  %vm3669_vm7 = vcmask 1043456   ;;  %vm3670_vm8 = vcmask 1044480  }
  0x61   :  { %786 = vmatpush.bf16.msra.mxu0 %v6175_v62  ;;  %v6363_v62 = vor.u32 %v8613_v56, %v6360_v57  ;;  %v8619_v56 = vld [vmem:[%s11475_s6 + $0x394] sm:$0xf]  ;;  %v6384_v57 = vld [vmem:[%s11475_s6 + $0x398] sm:$0xf0]  ;;  %vm3665_vm9 = vcmask 72704   ;;  %vm3689_vm10 = vcmask 400384  }
  0x62   :  { %799 = vmatpush.bf16.msra.mxu1 %v6239_v63  ;;  %v6350_v63 = vld [vmem:[%s11475_s6 + $0x350] sm:$0xf]  ;;  %vm3891_vm11 = vcmask 393216   ;;  %vm4022_vm12 = vcmask 793600   ;;  %vm5768_vm14 = vcmask 269312  }
  0x63   :  { %812 = vmatpush.bf16.msra.mxu2 %v6179_v0  ;;  %v8612_v0 = vld [vmem:[%s11475_s6 + $0x354] sm:$0xf0] }
  0x64   :  { %825 = vmatpush.bf16.msra.mxu3 %v6243_v4  ;;  %v8611_v4 = vld [vmem:[%s11475_s6 + $0x354] sm:$0xf]  ;;  %v6351_v10 = vor.u32 %v8612_v0, %v6350_v63  ;;  %v6374_v63 = vld [vmem:[%s11475_s6 + $0x380] sm:$0xf]  ;;  %v8618_v0 = vld [vmem:[%s11475_s6 + $0x384] sm:$0xf0] }
  0x65   :  { %787 = vmatpush.bf16.msra.mxu0 %v6167_v12  ;;  %v6355_v12 = vor.u32 %v8611_v4, %v6352_v5  ;;  %v8617_v4 = vld [vmem:[%s11475_s6 + $0x384] sm:$0xf]  ;;  %v6376_v5 = vld [vmem:[%s11475_s6 + $0x388] sm:$0xf0]  ;;  %v6375_v15 = vor.u32 %v8618_v0, %v6374_v63  ;;  %v8656_v63 = vld [vmem:[%s11475_s6 + $0x4b4] sm:$0xf0] }
  0x66   :  { %800 = vmatpush.bf16.msra.mxu1 %v6231_v13  ;;  %v6342_v13 = vld [vmem:[%s11475_s6 + $0x340] sm:$0xf]  ;;  %v8639_v0 = vld [vmem:[%s11475_s6 + $0x434] sm:$0xf] }
  0x67   :  { %813 = vmatpush.bf16.msra.mxu2 %v6171_v14  ;;  %v8610_v14 = vld [vmem:[%s11475_s6 + $0x344] sm:$0xf0] }
  0x68   :  { %826 = vmatpush.bf16.msra.mxu3 %v6235_v18  ;;  %v8609_v18 = vld [vmem:[%s11475_s6 + $0x344] sm:$0xf]  ;;  %v6343_v22 = vor.u32 %v8610_v14, %v6342_v13  ;;  %v8647_v13 = vld [vmem:[%s11475_s6 + $0x474] sm:$0xf]  ;;  %v6528_v14 = vld [vmem:[%s11475_s6 + $0x478] sm:$0xf0] }
  0x69   :  { %788 = vmatpush.bf16.msra.mxu0 %v6159_v24  ;;  %v6347_v24 = vor.u32 %v8609_v18, %v6344_v19  ;;  %v6592_v18 = vld [vmem:[%s11475_s6 + $0x4f8] sm:$0xf0]  ;;  %v6379_v19 = vor.u32 %v8617_v4, %v6376_v5 }
  0x6a   :  { %801 = vmatpush.bf16.msra.mxu1 %v6223_v27  ;;  %v6398_v27 = vld [vmem:[%s11475_s6 + $0x3b0] sm:$0xf]  ;;  %v6595_v26 = vor.u32 %v8663_v17, %v6592_v18  ;;  %v6552_v17 = vld [vmem:[%s11475_s6 + $0x4a8] sm:$0xf0] }
  0x6b   :  { %814 = vmatpush.bf16.msra.mxu2 %v6163_v28  ;;  %v6411_v28 = vor.u32 %v8625_v20, %v6408_v21  ;;  %v6399_v35 = vor.u32 %v8624_v29, %v6398_v27  ;;  %v6527_v20 = vor.u32 %v8648_v7, %v6526_v6  ;;  %v8662_v27 = vld [vmem:[%s11475_s6 + $0x4e4] sm:$0xf0]  ;;  %v6520_v29 = vld [vmem:[%s11475_s6 + $0x468] sm:$0xf0]  ;;  %v6486_v7 = vld [vmem:[%s11475_s6 + $0x420] sm:$0xf] }
  0x6c   :  { %827 = vmatpush.bf16.msra.mxu3 %v6227_v32  ;;  %v8623_v32 = vld [vmem:[%s11475_s6 + $0x3b4] sm:$0xf] }
  0x6d   :  { %789 = vmatpush.bf16.msra.mxu0 %v6151_v39  ;;  %v6390_v39 = vld [vmem:[%s11475_s6 + $0x3a0] sm:$0xf]  ;;  %v6403_v40 = vor.u32 %v8623_v32, %v6400_v33  ;;  %v6583_v33 = vor.u32 %v8662_v27, %v6582_v25  ;;  %v8652_v25 = vld [vmem:[%s11475_s6 + $0x494] sm:$0xf0]  ;;  %v6480_v27 = vld [vmem:[%s11475_s6 + $0x418] sm:$0xf0] }
  0x6e   :  { %802 = vmatpush.bf16.msra.mxu1 %v6215_v43  ;;  %v6328_v43 = vld [vmem:[%s11475_s6 + $0x328] sm:$0xf0] }
  0x6f   :  { %815 = vmatpush.bf16.msra.mxu2 %v6155_v44  ;;  %v8621_v44 = vld [vmem:[%s11475_s6 + $0x3a4] sm:$0xf] }
  0x70   :  { %828 = vmatpush.bf16.msra.mxu3 %v6219_v47  ;;  %790 = vmatmul.bf16.vlgmr.msra.gmra.mxu0 %v9531_v8  ;;  %v6391_v47 = vor.u32 %v8622_v41, %v6390_v39  ;;  %v6395_v52 = vor.u32 %v8621_v44, %v6392_v45  ;;  %v8660_v39 = vld [vmem:[%s11475_s6 + $0x4d4] sm:$0xf0]  ;;  %v6512_v41 = vld [vmem:[%s11475_s6 + $0x458] sm:$0xf0] }
  0x71   :  { %1029 = vmatpush.bf16.msrb.mxu0 %v6367_v48  ;;  %803 = vmatmul.bf16.vlgmr.msra.gmra.mxu1 %v9533_v9  ;;  %v6331_v48 = vor.u32 %v8605_v42, %v6328_v43  ;;  %v8659_v42 = vld [vmem:[%s11475_s6 + $0x4d4] sm:$0xf]  ;;  %v6576_v43 = vld [vmem:[%s11475_s6 + $0x4d8] sm:$0xf0]  ;;  %v6575_v45 = vor.u32 %v8660_v39, %v6574_v37  ;;  %v8633_v37 = vld [vmem:[%s11475_s6 + $0x404] sm:$0xf] }
  0x72   :  { %1042 = vmatpush.bf16.msrb.mxu1 %v6431_v49  ;;  %816 = vmatmul.bf16.vlgmr.msra.gmra.mxu2 %v9531_v8  ;;  %v6318_v49 = vld [vmem:[%s11475_s6 + $0x310] sm:$0xf]  ;;  %v6472_v39 = vld [vmem:[%s11475_s6 + $0x408] sm:$0xf0] }
  0x73   :  { %1055 = vmatpush.bf16.msrb.mxu2 %v6371_v50  ;;  %829 = vmatmul.bf16.vlgmr.msra.gmra.mxu3 %v9533_v9  ;;  %v8604_v50 = vld [vmem:[%s11475_s6 + $0x314] sm:$0xf0] }
  0x74   :  { %1068 = vmatpush.bf16.msrb.mxu3 %v6435_v54  ;;  %v8603_v54 = vld [vmem:[%s11475_s6 + $0x314] sm:$0xf]  ;;  %v6319_v58 = vor.u32 %v8604_v50, %v6318_v49  ;;  %v6566_v49 = vld [vmem:[%s11475_s6 + $0x4c0] sm:$0xf]  ;;  %v6579_v50 = vor.u32 %v8659_v42, %v6576_v43  ;;  %v6686_v42 = vld [vmem:[%s11475_s6 + $0x570] sm:$0xf] }
  0x75   :  { %1030 = vmatpush.bf16.msrb.mxu0 %v6359_v60  ;;  %v8602_v60 = vld [vmem:[%s11475_s6 + $0x304] sm:$0xf0]  ;;  %v8680_v43 = vld [vmem:[%s11475_s6 + $0x574] sm:$0xf0] }
  0x76   :  { %1043 = vmatpush.bf16.msrb.mxu1 %v6423_v61  ;;  %v6383_v61 = vor.u32 %v8620_v53, %v6382_v51  ;;  %v8658_v51 = vld [vmem:[%s11475_s6 + $0x4c4] sm:$0xf0]  ;;  %v6504_v53 = vld [vmem:[%s11475_s6 + $0x448] sm:$0xf0] }
  0x77   :  { %1056 = vmatpush.bf16.msrb.mxu2 %v6363_v62  ;;  %v6323_v62 = vor.u32 %v8603_v54, %v6320_v55  ;;  %v8657_v54 = vld [vmem:[%s11475_s6 + $0x4c4] sm:$0xf]  ;;  %v6568_v55 = vld [vmem:[%s11475_s6 + $0x4c8] sm:$0xf0] }
  0x78   :  { %1069 = vmatpush.bf16.msrb.mxu3 %v6427_v2  ;;  %v6387_v2 = vor.u32 %v8619_v56, %v6384_v57  ;;  %v6567_v57 = vor.u32 %v8658_v51, %v6566_v49  ;;  %v8695_v51 = vld [vmem:[%s11475_s6 + $0x5f4] sm:$0xf] }
  0x79   :  { %1031 = vmatpush.bf16.msrb.mxu0 %v6351_v10  ;;  %v6590_v10 = vld [vmem:[%s11475_s6 + $0x4f0] sm:$0xf] }
  0x7a   :  { %1044 = vmatpush.bf16.msrb.mxu1 %v6415_v11  ;;  %v6311_v11 = vor.u32 %v8602_v60, %v6310_v59  ;;  %v6494_v59 = vld [vmem:[%s11475_s6 + $0x430] sm:$0xf]  ;;  %v8640_v60 = vld [vmem:[%s11475_s6 + $0x434] sm:$0xf0] }
  0x7b   :  { %1057 = vmatpush.bf16.msrb.mxu2 %v6355_v12  ;;  %v8664_v12 = vld [vmem:[%s11475_s6 + $0x4f4] sm:$0xf0]  ;;  %v6495_v4 = vor.u32 %v8640_v60, %v6494_v59  ;;  %v6742_v59 = vld [vmem:[%s11475_s6 + $0x5e0] sm:$0xf] }
  0x7c   :  { %1070 = vmatpush.bf16.msrb.mxu3 %v6419_v16  ;;  %v6315_v16 = vor.u32 %v8601_v1, %v6312_v3  ;;  %v6591_v21 = vor.u32 %v8664_v12, %v6590_v10  ;;  %v6496_v1 = vld [vmem:[%s11475_s6 + $0x438] sm:$0xf0]  ;;  %v8638_v10 = vld [vmem:[%s11475_s6 + $0x424] sm:$0xf0] }
  0x7d   :  { %1032 = vmatpush.bf16.msrb.mxu0 %v6343_v22  ;;  %v6531_v22 = vor.u32 %v8647_v13, %v6528_v14  ;;  %v6560_v3 = vld [vmem:[%s11475_s6 + $0x4b8] sm:$0xf0]  ;;  %v6499_v6 = vor.u32 %v8639_v0, %v6496_v1  ;;  %v8654_v13 = vld [vmem:[%s11475_s6 + $0x4a4] sm:$0xf0]  ;;  %v8637_v14 = vld [vmem:[%s11475_s6 + $0x424] sm:$0xf]  ;;  %v6487_v18 = vor.u32 %v8638_v10, %v6486_v7 }
  0x7e   :  { %1045 = vmatpush.bf16.msrb.mxu1 %v6407_v23  ;;  %v6518_v23 = vld [vmem:[%s11475_s6 + $0x460] sm:$0xf]  ;;  %v8693_v0 = vld [vmem:[%s11475_s6 + $0x5e4] sm:$0xf]  ;;  %v6744_v1 = vld [vmem:[%s11475_s6 + $0x5e8] sm:$0xf0] }
  0x7f   :  { %1058 = vmatpush.bf16.msrb.mxu2 %v6347_v24  ;;  %v8646_v24 = vld [vmem:[%s11475_s6 + $0x464] sm:$0xf0]  ;;  %v6734_v7 = vld [vmem:[%s11475_s6 + $0x5d0] sm:$0xf]  ;;  %v6747_v10 = vor.u32 %v8693_v0, %v6744_v1  ;;  %v6640_v0 = vld [vmem:[%s11475_s6 + $0x518] sm:$0xf0] }
  0x80   :  { %1071 = vmatpush.bf16.msrb.mxu3 %v6411_v28  ;;  %v8645_v28 = vld [vmem:[%s11475_s6 + $0x464] sm:$0xf]  ;;  %v6519_v32 = vor.u32 %v8646_v24, %v6518_v23  ;;  %v6542_v23 = vld [vmem:[%s11475_s6 + $0x490] sm:$0xf] }
  0x81   :  { %1033 = vmatpush.bf16.msrb.mxu0 %v6335_v34  ;;  %v6523_v34 = vor.u32 %v8645_v28, %v6520_v29  ;;  %v8651_v28 = vld [vmem:[%s11475_s6 + $0x494] sm:$0xf]  ;;  %v6544_v29 = vld [vmem:[%s11475_s6 + $0x498] sm:$0xf0] }
  0x82   :  { %1046 = vmatpush.bf16.msrb.mxu1 %v6399_v35  ;;  %v6510_v35 = vld [vmem:[%s11475_s6 + $0x450] sm:$0xf] }
  0x83   :  { %1059 = vmatpush.bf16.msrb.mxu2 %v6339_v36  ;;  %v8644_v36 = vld [vmem:[%s11475_s6 + $0x454] sm:$0xf0] }
  0x84   :  { %1072 = vmatpush.bf16.msrb.mxu3 %v6403_v40  ;;  %v8643_v40 = vld [vmem:[%s11475_s6 + $0x454] sm:$0xf]  ;;  %v6511_v44 = vor.u32 %v8644_v36, %v6510_v35  ;;  %v6534_v35 = vld [vmem:[%s11475_s6 + $0x480] sm:$0xf]  ;;  %v8650_v36 = vld [vmem:[%s11475_s6 + $0x484] sm:$0xf0] }
  0x85   :  { %1034 = vmatpush.bf16.msrb.mxu0 %v6327_v46  ;;  %v6515_v46 = vor.u32 %v8643_v40, %v6512_v41  ;;  %v8649_v40 = vld [vmem:[%s11475_s6 + $0x484] sm:$0xf]  ;;  %v6536_v41 = vld [vmem:[%s11475_s6 + $0x488] sm:$0xf0]  ;;  %v6535_v49 = vor.u32 %v8650_v36, %v6534_v35  ;;  %v8688_v35 = vld [vmem:[%s11475_s6 + $0x5b4] sm:$0xf0] }
  0x86   :  { %1047 = vmatpush.bf16.msrb.mxu1 %v6391_v47  ;;  %v6502_v47 = vld [vmem:[%s11475_s6 + $0x440] sm:$0xf]  ;;  %v8671_v36 = vld [vmem:[%s11475_s6 + $0x534] sm:$0xf] }
  0x87   :  { %1060 = vmatpush.bf16.msrb.mxu2 %v6331_v48  ;;  %v8642_v48 = vld [vmem:[%s11475_s6 + $0x444] sm:$0xf0] }
  0x88   :  { %1073 = vmatpush.bf16.msrb.mxu3 %v6395_v52  ;;  %v8641_v52 = vld [vmem:[%s11475_s6 + $0x444] sm:$0xf]  ;;  %v6503_v56 = vor.u32 %v8642_v48, %v6502_v47  ;;  %v8679_v47 = vld [vmem:[%s11475_s6 + $0x574] sm:$0xf]  ;;  %v6688_v48 = vld [vmem:[%s11475_s6 + $0x578] sm:$0xf0] }
  0x89   :  { %1035 = vmatpush.bf16.msrb.mxu0 %v6319_v58  ;;  %v6507_v58 = vor.u32 %v8641_v52, %v6504_v53  ;;  %v6752_v52 = vld [vmem:[%s11475_s6 + $0x5f8] sm:$0xf0]  ;;  %v6539_v53 = vor.u32 %v8649_v40, %v6536_v41 }
  0x8a   :  { %1048 = vmatpush.bf16.msrb.mxu1 %v6383_v61  ;;  %v6558_v61 = vld [vmem:[%s11475_s6 + $0x4b0] sm:$0xf]  ;;  %v6755_v60 = vor.u32 %v8695_v51, %v6752_v52  ;;  %v8685_v51 = vld [vmem:[%s11475_s6 + $0x5a4] sm:$0xf]  ;;  %v6712_v52 = vld [vmem:[%s11475_s6 + $0x5a8] sm:$0xf0] }
  0x8b   :  { %1061 = vmatpush.bf16.msrb.mxu2 %v6323_v62  ;;  %v6571_v62 = vor.u32 %v8657_v54, %v6568_v55  ;;  %v6559_v5 = vor.u32 %v8656_v63, %v6558_v61  ;;  %v6687_v54 = vor.u32 %v8680_v43, %v6686_v42  ;;  %v8694_v61 = vld [vmem:[%s11475_s6 + $0x5e4] sm:$0xf0]  ;;  %v6680_v63 = vld [vmem:[%s11475_s6 + $0x568] sm:$0xf0]  ;;  %v6646_v43 = vld [vmem:[%s11475_s6 + $0x520] sm:$0xf] }
  0x8c   :  { %1074 = vmatpush.bf16.msrb.mxu3 %v6387_v2  ;;  %v8655_v2 = vld [vmem:[%s11475_s6 + $0x4b4] sm:$0xf] }
  0x8d   :  { %1036 = vmatpush.bf16.msrb.mxu0 %v6311_v11  ;;  %v6550_v11 = vld [vmem:[%s11475_s6 + $0x4a0] sm:$0xf]  ;;  %v6563_v12 = vor.u32 %v8655_v2, %v6560_v3  ;;  %v6743_v3 = vor.u32 %v8694_v61, %v6742_v59  ;;  %v8668_v59 = vld [vmem:[%s11475_s6 + $0x514] sm:$0xf0] }
  0x8e   :  { %1049 = vmatpush.bf16.msrb.mxu1 %v6375_v15  ;;  %v6488_v15 = vld [vmem:[%s11475_s6 + $0x428] sm:$0xf0]  ;;  %v8684_v61 = vld [vmem:[%s11475_s6 + $0x594] sm:$0xf0] }
  0x8f   :  { %1062 = vmatpush.bf16.msrb.mxu2 %v6315_v16  ;;  %v8653_v16 = vld [vmem:[%s11475_s6 + $0x4a4] sm:$0xf] }
  0x90   :  { %1075 = vmatpush.bf16.msrb.mxu3 %v6379_v19  ;;  %1037 = vmatmul.bf16.vlgmr.msrb.gmra.mxu0 %v9531_v8  ;;  %v6551_v19 = vor.u32 %v8654_v13, %v6550_v11  ;;  %v6555_v24 = vor.u32 %v8653_v16, %v6552_v17  ;;  %v8692_v11 = vld [vmem:[%s11475_s6 + $0x5d4] sm:$0xf0]  ;;  %v6672_v13 = vld [vmem:[%s11475_s6 + $0x558] sm:$0xf0] }
  0x91   :  { %1276 = vmatpush.bf16.msra.mxu0 %v6527_v20  ;;  %1050 = vmatmul.bf16.vlgmr.msrb.gmra.mxu1 %v9533_v9  ;;  %v6491_v20 = vor.u32 %v8637_v14, %v6488_v15  ;;  %v8691_v14 = vld [vmem:[%s11475_s6 + $0x5d4] sm:$0xf]  ;;  %v6736_v15 = vld [vmem:[%s11475_s6 + $0x5d8] sm:$0xf0]  ;;  %v6735_v17 = vor.u32 %v8692_v11, %v6734_v7  ;;  %v6630_v7 = vld [vmem:[%s11475_s6 + $0x500] sm:$0xf] }
  0x92   :  { %1289 = vmatpush.bf16.msra.mxu1 %v6591_v21  ;;  %1063 = vmatmul.bf16.vlgmr.msrb.gmra.mxu2 %v9531_v8  ;;  %v6478_v21 = vld [vmem:[%s11475_s6 + $0x410] sm:$0xf]  ;;  %v6694_v11 = vld [vmem:[%s11475_s6 + $0x580] sm:$0xf] }
  0x93   :  { %1302 = vmatpush.bf16.msra.mxu2 %v6531_v22  ;;  %1076 = vmatmul.bf16.vlgmr.msrb.gmra.mxu3 %v9533_v9  ;;  %v8636_v22 = vld [vmem:[%s11475_s6 + $0x414] sm:$0xf0] }
  0x94   :  { %1315 = vmatpush.bf16.msra.mxu3 %v6595_v26  ;;  %v8635_v26 = vld [vmem:[%s11475_s6 + $0x414] sm:$0xf]  ;;  %v6479_v30 = vor.u32 %v8636_v22, %v6478_v21  ;;  %v6726_v21 = vld [vmem:[%s11475_s6 + $0x5c0] sm:$0xf]  ;;  %v6739_v22 = vor.u32 %v8691_v14, %v6736_v15  ;;  %v8682_v14 = vld [vmem:[%s11475_s6 + $0x584] sm:$0xf0] }
  0x95   :  { %1277 = vmatpush.bf16.msra.mxu0 %v6519_v32  ;;  %v8634_v32 = vld [vmem:[%s11475_s6 + $0x404] sm:$0xf0]  ;;  %v8665_v15 = vld [vmem:[%s11475_s6 + $0x504] sm:$0xf] }
  0x96   :  { %1290 = vmatpush.bf16.msra.mxu1 %v6583_v33  ;;  %v6543_v33 = vor.u32 %v8652_v25, %v6542_v23  ;;  %v8690_v23 = vld [vmem:[%s11475_s6 + $0x5c4] sm:$0xf0]  ;;  %v6664_v25 = vld [vmem:[%s11475_s6 + $0x548] sm:$0xf0] }
  0x97   :  { %1303 = vmatpush.bf16.msra.mxu2 %v6523_v34  ;;  %v6483_v34 = vor.u32 %v8635_v26, %v6480_v27  ;;  %v8689_v26 = vld [vmem:[%s11475_s6 + $0x5c4] sm:$0xf]  ;;  %v6728_v27 = vld [vmem:[%s11475_s6 + $0x5c8] sm:$0xf0] }
  0x98   :  { %1316 = vmatpush.bf16.msra.mxu3 %v6587_v38  ;;  %v6547_v38 = vor.u32 %v8651_v28, %v6544_v29  ;;  %v6727_v29 = vor.u32 %v8690_v23, %v6726_v21  ;;  %v6846_v21 = vld [vmem:[%s11475_s6 + $0x670] sm:$0xf] }
  0x99   :  { %1278 = vmatpush.bf16.msra.mxu0 %v6511_v44  ;;  %v6750_v44 = vld [vmem:[%s11475_s6 + $0x5f0] sm:$0xf] }
  0x9a   :  { %1291 = vmatpush.bf16.msra.mxu1 %v6575_v45  ;;  %v6471_v45 = vor.u32 %v8634_v32, %v6470_v31  ;;  %v6654_v31 = vld [vmem:[%s11475_s6 + $0x530] sm:$0xf]  ;;  %v8672_v32 = vld [vmem:[%s11475_s6 + $0x534] sm:$0xf0] }
  0x9b   :  { %1304 = vmatpush.bf16.msra.mxu2 %v6515_v46  ;;  %v8696_v46 = vld [vmem:[%s11475_s6 + $0x5f4] sm:$0xf0]  ;;  %v6655_v40 = vor.u32 %v8672_v32, %v6654_v31  ;;  %v6910_v23 = vld [vmem:[%s11475_s6 + $0x6f0] sm:$0xf]  ;;  %v8727_v31 = vld [vmem:[%s11475_s6 + $0x6f4] sm:$0xf] }
  0x9c   :  { %1317 = vmatpush.bf16.msra.mxu3 %v6579_v50  ;;  %v6475_v50 = vor.u32 %v8633_v37, %v6472_v39  ;;  %v6751_v55 = vor.u32 %v8696_v46, %v6750_v44  ;;  %v6656_v37 = vld [vmem:[%s11475_s6 + $0x538] sm:$0xf0]  ;;  %v8670_v44 = vld [vmem:[%s11475_s6 + $0x524] sm:$0xf0] }
  0x9d   :  { %1279 = vmatpush.bf16.msra.mxu0 %v6503_v56  ;;  %v6691_v56 = vor.u32 %v8679_v47, %v6688_v48  ;;  %v6720_v39 = vld [vmem:[%s11475_s6 + $0x5b8] sm:$0xf0]  ;;  %v6659_v42 = vor.u32 %v8671_v36, %v6656_v37  ;;  %v8686_v48 = vld [vmem:[%s11475_s6 + $0x5a4] sm:$0xf0] }
  0x9e   :  { %1292 = vmatpush.bf16.msra.mxu1 %v6567_v57  ;;  %v6678_v57 = vld [vmem:[%s11475_s6 + $0x560] sm:$0xf]  ;;  %v6912_v32 = vld [vmem:[%s11475_s6 + $0x6f8] sm:$0xf0] }
  0x9f   :  { %1305 = vmatpush.bf16.msra.mxu2 %v6507_v58  ;;  %v8678_v58 = vld [vmem:[%s11475_s6 + $0x564] sm:$0xf0] }
  0xa0   :  { %1318 = vmatpush.bf16.msra.mxu3 %v6571_v62  ;;  %v8677_v62 = vld [vmem:[%s11475_s6 + $0x564] sm:$0xf]  ;;  %v6679_v2 = vor.u32 %v8678_v58, %v6678_v57 }
  0xa1   :  { %1280 = vmatpush.bf16.msra.mxu0 %v6495_v4  ;;  %v6683_v4 = vor.u32 %v8677_v62, %v6680_v63  ;;  %v6715_v62 = vor.u32 %v8685_v51, %v6712_v52  ;;  %v8667_v63 = vld [vmem:[%s11475_s6 + $0x514] sm:$0xf]  ;;  %v6830_v51 = vld [vmem:[%s11475_s6 + $0x650] sm:$0xf]  ;;  %v8708_v52 = vld [vmem:[%s11475_s6 + $0x654] sm:$0xf0] }
  0xa2   :  { %1293 = vmatpush.bf16.msra.mxu1 %v6559_v5  ;;  %v6670_v5 = vld [vmem:[%s11475_s6 + $0x550] sm:$0xf] }
  0xa3   :  { %1306 = vmatpush.bf16.msra.mxu2 %v6499_v6  ;;  %v8676_v6 = vld [vmem:[%s11475_s6 + $0x554] sm:$0xf0] }
  0xa4   :  { %1319 = vmatpush.bf16.msra.mxu3 %v6563_v12  ;;  %v8675_v12 = vld [vmem:[%s11475_s6 + $0x554] sm:$0xf]  ;;  %v6671_v16 = vor.u32 %v8676_v6, %v6670_v5 }
  0xa5   :  { %1281 = vmatpush.bf16.msra.mxu0 %v6487_v18  ;;  %v6675_v18 = vor.u32 %v8675_v12, %v6672_v13  ;;  %v6643_v13 = vor.u32 %v8667_v63, %v6640_v0  ;;  %v6822_v63 = vld [vmem:[%s11475_s6 + $0x640] sm:$0xf]  ;;  %v8706_v0 = vld [vmem:[%s11475_s6 + $0x644] sm:$0xf0] }
  0xa6   :  { %1294 = vmatpush.bf16.msra.mxu1 %v6551_v19  ;;  %v6662_v19 = vld [vmem:[%s11475_s6 + $0x540] sm:$0xf] }
  0xa7   :  { %1307 = vmatpush.bf16.msra.mxu2 %v6491_v20  ;;  %v8674_v20 = vld [vmem:[%s11475_s6 + $0x544] sm:$0xf0] }
  0xa8   :  { %1320 = vmatpush.bf16.msra.mxu3 %v6555_v24  ;;  %v8673_v24 = vld [vmem:[%s11475_s6 + $0x544] sm:$0xf]  ;;  %v6663_v28 = vor.u32 %v8674_v20, %v6662_v19  ;;  %v6696_v20 = vld [vmem:[%s11475_s6 + $0x588] sm:$0xf0] }
  0xa9   :  { %1282 = vmatpush.bf16.msra.mxu0 %v6479_v30  ;;  %v6667_v30 = vor.u32 %v8673_v24, %v6664_v25  ;;  %v8681_v19 = vld [vmem:[%s11475_s6 + $0x584] sm:$0xf] }
  0xaa   :  { %1295 = vmatpush.bf16.msra.mxu1 %v6543_v33  ;;  %v6718_v33 = vld [vmem:[%s11475_s6 + $0x5b0] sm:$0xf] }
  0xab   :  { %1308 = vmatpush.bf16.msra.mxu2 %v6483_v34  ;;  %v6731_v34 = vor.u32 %v8689_v26, %v6728_v27  ;;  %v6719_v41 = vor.u32 %v8688_v35, %v6718_v33  ;;  %v8728_v26 = vld [vmem:[%s11475_s6 + $0x6f4] sm:$0xf0]  ;;  %v8711_v27 = vld [vmem:[%s11475_s6 + $0x674] sm:$0xf]  ;;  %v6699_v33 = vor.u32 %v8681_v19, %v6696_v20 }
  0xac   :  { %1321 = vmatpush.bf16.msra.mxu3 %v6547_v38  ;;  %v8687_v38 = vld [vmem:[%s11475_s6 + $0x5b4] sm:$0xf]  ;;  %v6911_v37 = vor.u32 %v8728_v26, %v6910_v23  ;;  %v8720_v19 = vld [vmem:[%s11475_s6 + $0x6b4] sm:$0xf0] }
  0xad   :  { %1283 = vmatpush.bf16.msra.mxu0 %v6471_v45  ;;  %v6710_v45 = vld [vmem:[%s11475_s6 + $0x5a0] sm:$0xf]  ;;  %v6723_v47 = vor.u32 %v8687_v38, %v6720_v39  ;;  %v8703_v20 = vld [vmem:[%s11475_s6 + $0x634] sm:$0xf] }
  0xae   :  { %1296 = vmatpush.bf16.msra.mxu1 %v6535_v49  ;;  %v310_v46 = vpop.f32.mrf.mxu1  ;;  %v8669_v49 = vld [vmem:[%s11475_s6 + $0x524] sm:$0xf]  ;;  %v6711_v57 = vor.u32 %v8686_v48, %v6710_v45  ;;  %v6838_v39 = vld [vmem:[%s11475_s6 + $0x660] sm:$0xf]  ;;  %v6840_v45 = vld [vmem:[%s11475_s6 + $0x668] sm:$0xf0] }
  0xaf   :  { %1309 = vmatpush.bf16.msra.mxu2 %v6475_v50  ;;  %v6648_v50 = vld [vmem:[%s11475_s6 + $0x528] sm:$0xf0]  ;;  %v8719_v23 = vld [vmem:[%s11475_s6 + $0x6b4] sm:$0xf] }
  0xb0   :  { %1322 = vmatpush.bf16.msra.mxu3 %v6539_v53  ;;  %1284 = vmatmul.bf16.vlgmr.msra.gmra.mxu0 %v9531_v8  ;;  %v297_v53 = vpop.f32.mrf.mxu0  ;;  %v6651_v58 = vor.u32 %v8669_v49, %v6648_v50 }
  0xb1   :  { %1523 = vmatpush.bf16.msrb.mxu0 %v6687_v54  ;;  %1297 = vmatmul.bf16.vlgmr.msra.gmra.mxu1 %v9533_v9  ;;  %v6647_v54 = vor.u32 %v8670_v44, %v6646_v43  ;;  %v8726_v43 = vld [vmem:[%s11475_s6 + $0x6e4] sm:$0xf0]  ;;  %v8709_v44 = vld [vmem:[%s11475_s6 + $0x664] sm:$0xf] }
  0xb2   :  { %1536 = vmatpush.bf16.msrb.mxu1 %v6751_v55  ;;  %1310 = vmatmul.bf16.vlgmr.msra.gmra.mxu2 %v9531_v8  ;;  %v6638_v55 = vld [vmem:[%s11475_s6 + $0x510] sm:$0xf]  ;;  %v6843_v50 = vor.u32 %v8709_v44, %v6840_v45  ;;  %v8700_v45 = vld [vmem:[%s11475_s6 + $0x614] sm:$0xf0] }
  0xb3   :  { %1549 = vmatpush.bf16.msrb.mxu2 %v6691_v56  ;;  %1323 = vmatmul.bf16.vlgmr.msra.gmra.mxu3 %v9533_v9  ;;  %v311_v56 = vadd.f32 %v310_v46, %v297_v53  ;;  %v6639_v6 = vor.u32 %v8668_v59, %v6638_v55  ;;  %v8725_v46 = vld [vmem:[%s11475_s6 + $0x6e4] sm:$0xf]  ;;  %v6894_v53 = vld [vmem:[%s11475_s6 + $0x6d0] sm:$0xf]  ;;  %v8724_v55 = vld [vmem:[%s11475_s6 + $0x6d4] sm:$0xf0] }
  0xb4   :  { %1562 = vmatpush.bf16.msrb.mxu3 %v6755_v60  ;;  %v6702_v60 = vld [vmem:[%s11475_s6 + $0x590] sm:$0xf]  ;;  %v6896_v59 = vld [vmem:[%s11475_s6 + $0x6d8] sm:$0xf0] }
  0xb5   :  { %1524 = vmatpush.bf16.msrb.mxu0 %v6679_v2  ;;  %340 = vst [vmem:[#allocation2] sm:$0xff] %v311_v56  ;;  %v323_v1 = vpop.f32.mrf.mxu2  ;;  %v6703_v12 = vor.u32 %v8684_v61, %v6702_v60  ;;  %v8707_v56 = vld [vmem:[%s11475_s6 + $0x654] sm:$0xf]  ;;  %v6831_v60 = vor.u32 %v8708_v52, %v6830_v51  ;;  %v6895_v61 = vor.u32 %v8724_v55, %v6894_v53  ;;  %v6800_v51 = vld [vmem:[%s11475_s6 + $0x618] sm:$0xf0] }
  0xb6   :  { %1537 = vmatpush.bf16.msrb.mxu1 %v6743_v3  ;;  %v336_v2 = vpop.f32.mrf.mxu3  ;;  %v8683_v3 = vld [vmem:[%s11475_s6 + $0x594] sm:$0xf]  ;;  %v6864_v53 = vld [vmem:[%s11475_s6 + $0x698] sm:$0xf0]  ;;  %v6790_v55 = vld [vmem:[%s11475_s6 + $0x600] sm:$0xf] }
  0xb7   :  { %1550 = vmatpush.bf16.msrb.mxu2 %v6683_v4  ;;  %v6704_v4 = vld [vmem:[%s11475_s6 + $0x598] sm:$0xf0]  ;;  %v337_v5 = vadd.f32 %v336_v2, %v323_v1  ;;  %v6886_v1 = vld [vmem:[%s11475_s6 + $0x6c0] sm:$0xf]  ;;  %v8715_v52 = vld [vmem:[%s11475_s6 + $0x694] sm:$0xf] }
  0xb8   :  { %1563 = vmatpush.bf16.msrb.mxu3 %v6747_v10  ;;  %v8666_v10 = vld [vmem:[%s11475_s6 + $0x504] sm:$0xf0]  ;;  %v299_v24 = vpop.f32.mrf.mxu0 }
  0xb9   :  { %1525 = vmatpush.bf16.msrb.mxu0 %v6671_v16  ;;  %341 = vst [vmem:[#allocation2 + $0x8] sm:$0xff] %v337_v5  ;;  %v312_v16 = vpop.f32.mrf.mxu1  ;;  %v6631_v25 = vor.u32 %v8666_v10, %v6630_v7  ;;  %v6824_v5 = vld [vmem:[%s11475_s6 + $0x648] sm:$0xf0]  ;;  %v6823_v10 = vor.u32 %v8706_v0, %v6822_v63  ;;  %v6880_v24 = vld [vmem:[%s11475_s6 + $0x6b8] sm:$0xf0]  ;;  %v6867_v63 = vor.u32 %v8715_v52, %v6864_v53 }
  0xba   :  { %1538 = vmatpush.bf16.msrb.mxu1 %v6735_v17  ;;  %v6707_v17 = vor.u32 %v8683_v3, %v6704_v4  ;;  %v8722_v3 = vld [vmem:[%s11475_s6 + $0x6c4] sm:$0xf0]  ;;  %v8705_v4 = vld [vmem:[%s11475_s6 + $0x644] sm:$0xf]  ;;  %v6888_v7 = vld [vmem:[%s11475_s6 + $0x6c8] sm:$0xf0] }
  0xbb   :  { %1551 = vmatpush.bf16.msrb.mxu2 %v6675_v18  ;;  %v6632_v18 = vld [vmem:[%s11475_s6 + $0x508] sm:$0xf0]  ;;  %v6878_v16 = vld [vmem:[%s11475_s6 + $0x6b0] sm:$0xf]  ;;  %v8737_v52 = vld [vmem:[%s11475_s6 + $0x744] sm:$0xf] }
  0xbc   :  { %1564 = vmatpush.bf16.msrb.mxu3 %v6739_v22  ;;  %v8712_v22 = vld [vmem:[%s11475_s6 + $0x674] sm:$0xf0]  ;;  %v6879_v26 = vor.u32 %v8720_v19, %v6878_v16  ;;  %v6792_v0 = vld [vmem:[%s11475_s6 + $0x608] sm:$0xf0]  ;;  %v7072_v16 = vld [vmem:[%s11475_s6 + $0x7f8] sm:$0xf0] }
  0xbd   :  { %1526 = vmatpush.bf16.msrb.mxu0 %v6663_v28  ;;  %v6848_v28 = vld [vmem:[%s11475_s6 + $0x678] sm:$0xf0]  ;;  %v325_v35 = vpop.f32.mrf.mxu2  ;;  %v6984_v53 = vld [vmem:[%s11475_s6 + $0x748] sm:$0xf0] }
  0xbe   :  { %1539 = vmatpush.bf16.msrb.mxu1 %v6727_v29  ;;  %v6695_v29 = vor.u32 %v8682_v14, %v6694_v11  ;;  %v338_v36 = vpop.f32.mrf.mxu3  ;;  %v6851_v38 = vor.u32 %v8711_v27, %v6848_v28  ;;  %v6814_v14 = vld [vmem:[%s11475_s6 + $0x630] sm:$0xf]  ;;  %v6806_v28 = vld [vmem:[%s11475_s6 + $0x620] sm:$0xf]  ;;  %v6808_v35 = vld [vmem:[%s11475_s6 + $0x628] sm:$0xf0] }
  0xbf   :  { %1552 = vmatpush.bf16.msrb.mxu2 %v6667_v30  ;;  %v6635_v30 = vor.u32 %v8665_v15, %v6632_v18  ;;  %v8704_v15 = vld [vmem:[%s11475_s6 + $0x634] sm:$0xf0] }
  0xc0   :  { %1565 = vmatpush.bf16.msrb.mxu3 %v6731_v34  ;;  %v6847_v34 = vor.u32 %v8712_v22, %v6846_v21  ;;  %v6816_v21 = vld [vmem:[%s11475_s6 + $0x638] sm:$0xf0] }
  0xc1   :  { %1527 = vmatpush.bf16.msrb.mxu0 %v6655_v40  ;;  %v8710_v40 = vld [vmem:[%s11475_s6 + $0x664] sm:$0xf0]  ;;  %v6819_v27 = vor.u32 %v8703_v20, %v6816_v21  ;;  %v6998_v21 = vld [vmem:[%s11475_s6 + $0x760] sm:$0xf] }
  0xc2   :  { %1540 = vmatpush.bf16.msrb.mxu1 %v6719_v41  ;;  %v6902_v41 = vld [vmem:[%s11475_s6 + $0x6e0] sm:$0xf]  ;;  %v6839_v48 = vor.u32 %v8710_v40, %v6838_v39 }
  0xc3   :  { %1553 = vmatpush.bf16.msrb.mxu2 %v6659_v42  ;;  %v6915_v42 = vor.u32 %v8727_v31, %v6912_v32  ;;  %v6903_v49 = vor.u32 %v8726_v43, %v6902_v41  ;;  %v6883_v32 = vor.u32 %v8719_v23, %v6880_v24  ;;  %v6798_v41 = vld [vmem:[%s11475_s6 + $0x610] sm:$0xf]  ;;  %v8742_v23 = vld [vmem:[%s11475_s6 + $0x764] sm:$0xf0]  ;;  %v7062_v24 = vld [vmem:[%s11475_s6 + $0x7e0] sm:$0xf] }
  0xc4   :  { %1566 = vmatpush.bf16.msrb.mxu3 %v6723_v47  ;;  %v6904_v47 = vld [vmem:[%s11475_s6 + $0x6e8] sm:$0xf0] }
  0xc5   :  { %1528 = vmatpush.bf16.msrb.mxu0 %v6647_v54  ;;  %v6907_v54 = vor.u32 %v8725_v46, %v6904_v47  ;;  %v6862_v46 = vld [vmem:[%s11475_s6 + $0x690] sm:$0xf] }
  0xc6   :  { %1541 = vmatpush.bf16.msrb.mxu1 %v6711_v57  ;;  %v6832_v57 = vld [vmem:[%s11475_s6 + $0x658] sm:$0xf0] }
  0xc7   :  { %1554 = vmatpush.bf16.msrb.mxu2 %v6651_v58  ;;  %v8723_v58 = vld [vmem:[%s11475_s6 + $0x6d4] sm:$0xf] }
  0xc8   :  { %1567 = vmatpush.bf16.msrb.mxu3 %v6715_v62  ;;  %v6835_v62 = vor.u32 %v8707_v56, %v6832_v57  ;;  %v6899_v2 = vor.u32 %v8723_v58, %v6896_v59  ;;  %v8698_v56 = vld [vmem:[%s11475_s6 + $0x604] sm:$0xf0]  ;;  %v6854_v59 = vld [vmem:[%s11475_s6 + $0x680] sm:$0xf] }
  0xc9   :  { %1529 = vmatpush.bf16.msrb.mxu0 %v6639_v6  ;;  %v8721_v6 = vld [vmem:[%s11475_s6 + $0x6c4] sm:$0xf] }
  0xca   :  { %1542 = vmatpush.bf16.msrb.mxu1 %v6703_v12  ;;  %v6887_v12 = vor.u32 %v8722_v3, %v6886_v1  ;;  %v6891_v18 = vor.u32 %v8721_v6, %v6888_v7  ;;  %v8713_v1 = vld [vmem:[%s11475_s6 + $0x684] sm:$0xf]  ;;  %v7070_v6 = vld [vmem:[%s11475_s6 + $0x7f0] sm:$0xf]  ;;  %v6791_v7 = vor.u32 %v8698_v56, %v6790_v55  ;;  %v7048_v55 = vld [vmem:[%s11475_s6 + $0x7c8] sm:$0xf0] }
  0xcb   :  { %1555 = vmatpush.bf16.msrb.mxu2 %v6643_v13  ;;  %v6827_v13 = vor.u32 %v8705_v4, %v6824_v5  ;;  %v7006_v4 = vld [vmem:[%s11475_s6 + $0x770] sm:$0xf]  ;;  %v8744_v5 = vld [vmem:[%s11475_s6 + $0x774] sm:$0xf0] }
  0xcc   :  { %1568 = vmatpush.bf16.msrb.mxu3 %v6707_v17 }
  0xcd   :  { %1530 = vmatpush.bf16.msrb.mxu0 %v6631_v25  ;;  %v544_v11 = vpop.f32.mrf.mxu0  ;;  %v6815_v25 = vor.u32 %v8704_v15, %v6814_v14  ;;  %v8759_v15 = vld [vmem:[%s11475_s6 + $0x7f4] sm:$0xf] }
  0xce   :  { %1543 = vmatpush.bf16.msrb.mxu1 %v6695_v29  ;;  %v557_v17 = vpop.f32.mrf.mxu1  ;;  %v8702_v29 = vld [vmem:[%s11475_s6 + $0x624] sm:$0xf0] }
  0xcf   :  { %1556 = vmatpush.bf16.msrb.mxu2 %v6635_v30  ;;  %v10552_v22 = vadd.f32 %v557_v17, %v544_v11  ;;  %v6870_v30 = vld [vmem:[%s11475_s6 + $0x6a0] sm:$0xf]  ;;  %v6807_v40 = vor.u32 %v8702_v29, %v6806_v28  ;;  %v8743_v11 = vld [vmem:[%s11475_s6 + $0x774] sm:$0xf]  ;;  %v7000_v28 = vld [vmem:[%s11475_s6 + $0x768] sm:$0xf0] }
  0xd0   :  { %1569 = vmatpush.bf16.msrb.mxu3 %v6699_v33  ;;  %1531 = vmatmul.bf16.vlgmr.msrb.gmra.mxu0 %v9531_v8  ;;  %v8718_v33 = vld [vmem:[%s11475_s6 + $0x6a4] sm:$0xf0]  ;;  %v8757_v29 = vld [vmem:[%s11475_s6 + $0x7e4] sm:$0xf] }
  0xd1   :  { %1770 = vmatpush.bf16.msra.mxu0 %v6847_v34  ;;  %1544 = vmatmul.bf16.vlgmr.msrb.gmra.mxu1 %v9533_v9  ;;  %v8701_v34 = vld [vmem:[%s11475_s6 + $0x624] sm:$0xf]  ;;  %v6871_v43 = vor.u32 %v8718_v33, %v6870_v30  ;;  %v7064_v30 = vld [vmem:[%s11475_s6 + $0x7e8] sm:$0xf0] }
  0xd2   :  { %1783 = vmatpush.bf16.msra.mxu1 %v6911_v37  ;;  %1557 = vmatmul.bf16.vlgmr.msrb.gmra.mxu2 %v9531_v8  ;;  %v8717_v37 = vld [vmem:[%s11475_s6 + $0x6a4] sm:$0xf]  ;;  %v6811_v44 = vor.u32 %v8701_v34, %v6808_v35  ;;  %v6990_v34 = vld [vmem:[%s11475_s6 + $0x750] sm:$0xf]  ;;  %v8740_v35 = vld [vmem:[%s11475_s6 + $0x754] sm:$0xf0] }
  0xd3   :  { %1796 = vmatpush.bf16.msra.mxu2 %v6851_v38  ;;  %1570 = vmatmul.bf16.vlgmr.msrb.gmra.mxu3 %v9533_v9  ;;  %v6872_v38 = vld [vmem:[%s11475_s6 + $0x6a8] sm:$0xf0] }
  0xd4   :  { %1809 = vmatpush.bf16.msra.mxu3 %v6915_v42 }
  0xd5   :  { %1771 = vmatpush.bf16.msra.mxu0 %v6839_v48  ;;  %v570_v31 = vpop.f32.mrf.mxu2  ;;  %v546_v42 = vpop.f32.mrf.mxu0  ;;  %v6875_v48 = vor.u32 %v8717_v37, %v6872_v38  ;;  %v7067_v37 = vor.u32 %v8757_v29, %v7064_v30  ;;  %v8756_v38 = vld [vmem:[%s11475_s6 + $0x7d4] sm:$0xf0] }
  0xd6   :  { %1784 = vmatpush.bf16.msra.mxu1 %v6903_v49  ;;  %v583_v36 = vpop.f32.mrf.mxu3  ;;  %v559_v47 = vpop.f32.mrf.mxu1  ;;  %v8716_v49 = vld [vmem:[%s11475_s6 + $0x694] sm:$0xf0]  ;;  %v8755_v42 = vld [vmem:[%s11475_s6 + $0x7d4] sm:$0xf] }
  0xd7   :  { %1797 = vmatpush.bf16.msra.mxu2 %v6843_v50  ;;  %v10584_v39 = vadd.f32 %v583_v36, %v570_v31  ;;  %v8699_v50 = vld [vmem:[%s11475_s6 + $0x614] sm:$0xf]  ;;  %v6863_v57 = vor.u32 %v8716_v49, %v6862_v46  ;;  %v6999_v31 = vor.u32 %v8742_v23, %v6998_v21  ;;  %v7054_v36 = vld [vmem:[%s11475_s6 + $0x7d0] sm:$0xf]  ;;  %v6982_v47 = vld [vmem:[%s11475_s6 + $0x740] sm:$0xf] }
  0xd8   :  { %1810 = vmatpush.bf16.msra.mxu3 %v6907_v54  ;;  %v6799_v54 = vor.u32 %v8700_v45, %v6798_v41  ;;  %v6803_v58 = vor.u32 %v8699_v50, %v6800_v51  ;;  %v6992_v41 = vld [vmem:[%s11475_s6 + $0x758] sm:$0xf0]  ;;  %v7055_v45 = vor.u32 %v8756_v38, %v7054_v36  ;;  %v7046_v49 = vld [vmem:[%s11475_s6 + $0x7c0] sm:$0xf]  ;;  %v8754_v51 = vld [vmem:[%s11475_s6 + $0x7c4] sm:$0xf0] }
  0xd9   :  { %1772 = vmatpush.bf16.msra.mxu0 %v6831_v60  ;;  %v8714_v60 = vld [vmem:[%s11475_s6 + $0x684] sm:$0xf0]  ;;  %v8749_v21 = vld [vmem:[%s11475_s6 + $0x7a4] sm:$0xf]  ;;  %v7032_v23 = vld [vmem:[%s11475_s6 + $0x7a8] sm:$0xf0] }
  0xda   :  { %1785 = vmatpush.bf16.msra.mxu1 %v6895_v61  ;;  %v8697_v61 = vld [vmem:[%s11475_s6 + $0x604] sm:$0xf]  ;;  %v8732_v30 = vld [vmem:[%s11475_s6 + $0x714] sm:$0xf0]  ;;  %v6960_v36 = vld [vmem:[%s11475_s6 + $0x718] sm:$0xf0] }
  0xdb   :  { %1798 = vmatpush.bf16.msra.mxu2 %v6835_v62  ;;  %v6795_v14 = vor.u32 %v8697_v61, %v6792_v0  ;;  %v8736_v61 = vld [vmem:[%s11475_s6 + $0x734] sm:$0xf0]  ;;  %v7024_v38 = vld [vmem:[%s11475_s6 + $0x798] sm:$0xf0] }
  0xdc   :  { %1811 = vmatpush.bf16.msra.mxu3 %v6899_v2  ;;  %v6856_v2 = vld [vmem:[%s11475_s6 + $0x688] sm:$0xf0] }
  0xdd   :  { %1773 = vmatpush.bf16.msra.mxu0 %v6823_v10  ;;  %v572_v62 = vpop.f32.mrf.mxu2  ;;  %v8760_v10 = vld [vmem:[%s11475_s6 + $0x7f4] sm:$0xf0]  ;;  %v6859_v17 = vor.u32 %v8713_v1, %v6856_v2  ;;  %v8735_v2 = vld [vmem:[%s11475_s6 + $0x734] sm:$0xf] }
  0xde   :  { %1786 = vmatpush.bf16.msra.mxu1 %v6887_v12  ;;  %v585_v3 = vpop.f32.mrf.mxu3  ;;  %v7008_v12 = vld [vmem:[%s11475_s6 + $0x778] sm:$0xf0]  ;;  %v7071_v19 = vor.u32 %v8760_v10, %v7070_v6  ;;  %v7038_v62 = vld [vmem:[%s11475_s6 + $0x7b0] sm:$0xf]  ;;  %v8752_v1 = vld [vmem:[%s11475_s6 + $0x7b4] sm:$0xf0] }
  0xdf   :  { %1799 = vmatpush.bf16.msra.mxu2 %v6827_v13  ;;  %v6855_v13 = vor.u32 %v8714_v60, %v6854_v59  ;;  %v7011_v20 = vor.u32 %v8743_v11, %v7008_v12  ;;  %v6987_v59 = vor.u32 %v8737_v52, %v6984_v53  ;;  %v6974_v60 = vld [vmem:[%s11475_s6 + $0x730] sm:$0xf]  ;;  %v6976_v3 = vld [vmem:[%s11475_s6 + $0x738] sm:$0xf0]  ;;  %v7039_v10 = vor.u32 %v8752_v1, %v7038_v62  ;;  %v6966_v12 = vld [vmem:[%s11475_s6 + $0x720] sm:$0xf] }
  0xe0   :  { %1812 = vmatpush.bf16.msra.mxu3 %v6891_v18  ;;  %v7007_v18 = vor.u32 %v8744_v5, %v7006_v4  ;;  %v8751_v5 = vld [vmem:[%s11475_s6 + $0x7b4] sm:$0xf]  ;;  %v7040_v6 = vld [vmem:[%s11475_s6 + $0x7b8] sm:$0xf0]  ;;  %v6979_v11 = vor.u32 %v8735_v2, %v6976_v3  ;;  %v7016_v52 = vld [vmem:[%s11475_s6 + $0x788] sm:$0xf0] }
  0xe1   :  { %1774 = vmatpush.bf16.msra.mxu0 %v6815_v25  ;;  %v7075_v25 = vor.u32 %v8759_v15, %v7072_v16  ;;  %v7043_v16 = vor.u32 %v8751_v5, %v7040_v6  ;;  %v7158_v6 = vld [vmem:[%s11475_s6 + $0x860] sm:$0xf] }
  0xe2   :  { %1787 = vmatpush.bf16.msra.mxu1 %v6879_v26  ;;  %v8758_v26 = vld [vmem:[%s11475_s6 + $0x7e4] sm:$0xf0] }
  0xe3   :  { %1800 = vmatpush.bf16.msra.mxu2 %v6819_v27  ;;  %v8741_v27 = vld [vmem:[%s11475_s6 + $0x764] sm:$0xf] }
  0xe4   :  { %1813 = vmatpush.bf16.msra.mxu3 %v6883_v32  ;;  %v7063_v32 = vor.u32 %v8758_v26, %v7062_v24  ;;  %v7003_v33 = vor.u32 %v8741_v27, %v7000_v28  ;;  %v6958_v26 = vld [vmem:[%s11475_s6 + $0x710] sm:$0xf] }
  0xe5   :  { %1775 = vmatpush.bf16.msra.mxu0 %v6807_v40  ;;  %v8739_v40 = vld [vmem:[%s11475_s6 + $0x754] sm:$0xf] }
  0xe6   :  { %1788 = vmatpush.bf16.msra.mxu1 %v6871_v43  ;;  %v7056_v43 = vld [vmem:[%s11475_s6 + $0x7d8] sm:$0xf0]  ;;  %v6995_v46 = vor.u32 %v8739_v40, %v6992_v41  ;;  %v6959_v40 = vor.u32 %v8732_v30, %v6958_v26  ;;  %v6950_v41 = vld [vmem:[%s11475_s6 + $0x700] sm:$0xf]  ;;  %v8788_v26 = vld [vmem:[%s11475_s6 + $0x8d4] sm:$0xf0] }
  0xe7   :  { %1801 = vmatpush.bf16.msra.mxu2 %v6811_v44  ;;  %v6991_v44 = vor.u32 %v8740_v35, %v6990_v34  ;;  %v7059_v50 = vor.u32 %v8755_v42, %v7056_v43  ;;  %v8748_v34 = vld [vmem:[%s11475_s6 + $0x794] sm:$0xf0]  ;;  %v8731_v35 = vld [vmem:[%s11475_s6 + $0x714] sm:$0xf]  ;;  %v8730_v42 = vld [vmem:[%s11475_s6 + $0x704] sm:$0xf0] }
  0xe8   :  { %1814 = vmatpush.bf16.msra.mxu3 %v6875_v48  ;;  %v8738_v48 = vld [vmem:[%s11475_s6 + $0x744] sm:$0xf0]  ;;  %v7216_v30 = vld [vmem:[%s11475_s6 + $0x8d8] sm:$0xf0] }
  0xe9   :  { %1776 = vmatpush.bf16.msra.mxu0 %v6799_v54  ;;  %v8753_v54 = vld [vmem:[%s11475_s6 + $0x7c4] sm:$0xf]  ;;  %v6983_v56 = vor.u32 %v8738_v48, %v6982_v47 }
  0xea   :  { %1789 = vmatpush.bf16.msra.mxu1 %v6863_v57  ;;  %v7051_v0 = vor.u32 %v8753_v54, %v7048_v55  ;;  %v8729_v47 = vld [vmem:[%s11475_s6 + $0x704] sm:$0xf]  ;;  %v7166_v54 = vld [vmem:[%s11475_s6 + $0x870] sm:$0xf]  ;;  %v8776_v55 = vld [vmem:[%s11475_s6 + $0x874] sm:$0xf0] }
  0xeb   :  { %1802 = vmatpush.bf16.msra.mxu2 %v6803_v58  ;;  %v7047_v58 = vor.u32 %v8754_v51, %v7046_v49  ;;  %v8745_v51 = vld [vmem:[%s11475_s6 + $0x784] sm:$0xf]  ;;  %v7167_v2 = vor.u32 %v8776_v55, %v7166_v54  ;;  %v8767_v54 = vld [vmem:[%s11475_s6 + $0x834] sm:$0xf]  ;;  %v7136_v55 = vld [vmem:[%s11475_s6 + $0x838] sm:$0xf0] }
  0xec   :  { %1815 = vmatpush.bf16.msra.mxu3 %v6867_v63  ;;  %v7019_v1 = vor.u32 %v8745_v51, %v7016_v52 }
  0xed   :  { %1777 = vmatpush.bf16.msra.mxu0 %v6791_v7  ;;  %v791_v57 = vpop.f32.mrf.mxu0  ;;  %v6975_v7 = vor.u32 %v8736_v61, %v6974_v60  ;;  %v7168_v60 = vld [vmem:[%s11475_s6 + $0x878] sm:$0xf0] }
  0xee   :  { %1790 = vmatpush.bf16.msra.mxu1 %v6855_v13  ;;  %v804_v63 = vpop.f32.mrf.mxu1  ;;  %v8734_v13 = vld [vmem:[%s11475_s6 + $0x724] sm:$0xf0] }
  0xef   :  { %1803 = vmatpush.bf16.msra.mxu2 %v6795_v14  ;;  %v10752_v4 = vadd.f32 %v804_v63, %v791_v57  ;;  %v7030_v14 = vld [vmem:[%s11475_s6 + $0x7a0] sm:$0xf]  ;;  %v6951_v57 = vor.u32 %v8730_v42, %v6950_v41  ;;  %v8791_v63 = vld [vmem:[%s11475_s6 + $0x8f4] sm:$0xf]  ;;  %v7144_v41 = vld [vmem:[%s11475_s6 + $0x848] sm:$0xf0] }
  0xf0   :  { %1816 = vmatpush.bf16.msra.mxu3 %v6859_v17  ;;  %1778 = vmatmul.bf16.vlgmr.msra.gmra.mxu0 %v9531_v8  ;;  %v8750_v17 = vld [vmem:[%s11475_s6 + $0x7a4] sm:$0xf0]  ;;  %v8785_v42 = vld [vmem:[%s11475_s6 + $0x8c4] sm:$0xf] }
  0xf1   :  { %2017 = vmatpush.bf16.msrb.mxu0 %v7007_v18  ;;  %1791 = vmatmul.bf16.vlgmr.msra.gmra.mxu1 %v9533_v9  ;;  %v8733_v18 = vld [vmem:[%s11475_s6 + $0x724] sm:$0xf]  ;;  %v7031_v28 = vor.u32 %v8750_v17, %v7030_v14  ;;  %v7160_v14 = vld [vmem:[%s11475_s6 + $0x868] sm:$0xf0] }
  0xf2   :  { %2030 = vmatpush.bf16.msrb.mxu1 %v7071_v19  ;;  %1804 = vmatmul.bf16.vlgmr.msra.gmra.mxu2 %v9531_v8  ;;  %v6968_v19 = vld [vmem:[%s11475_s6 + $0x728] sm:$0xf0] }
  0xf3   :  { %2043 = vmatpush.bf16.msrb.mxu2 %v7011_v20  ;;  %1817 = vmatmul.bf16.vlgmr.msra.gmra.mxu3 %v9533_v9  ;;  %v6971_v29 = vor.u32 %v8733_v18, %v6968_v19 }
  0xf4   :  { %2056 = vmatpush.bf16.msrb.mxu3 %v7075_v25  ;;  %v6967_v25 = vor.u32 %v8734_v13, %v6966_v12  ;;  %v8790_v12 = vld [vmem:[%s11475_s6 + $0x8e4] sm:$0xf0]  ;;  %v8773_v13 = vld [vmem:[%s11475_s6 + $0x864] sm:$0xf] }
  0xf5   :  { %2018 = vmatpush.bf16.msrb.mxu0 %v6999_v31  ;;  %v817_v15 = vpop.f32.mrf.mxu2  ;;  %v793_v27 = vpop.f32.mrf.mxu0  ;;  %v7022_v31 = vld [vmem:[%s11475_s6 + $0x790] sm:$0xf]  ;;  %v7163_v19 = vor.u32 %v8773_v13, %v7160_v14 }
  0xf6   :  { %2031 = vmatpush.bf16.msrb.mxu1 %v7063_v32  ;;  %v830_v20 = vpop.f32.mrf.mxu3  ;;  %v806_v32 = vpop.f32.mrf.mxu1  ;;  %v7023_v43 = vor.u32 %v8748_v34, %v7022_v31  ;;  %v8771_v27 = vld [vmem:[%s11475_s6 + $0x854] sm:$0xf]  ;;  %v7142_v34 = vld [vmem:[%s11475_s6 + $0x840] sm:$0xf]  ;;  %v7118_v14 = vld [vmem:[%s11475_s6 + $0x810] sm:$0xf] }
  0xf7   :  { %2044 = vmatpush.bf16.msrb.mxu2 %v7003_v33  ;;  %v10784_v24 = vadd.f32 %v830_v20, %v817_v15  ;;  %v7035_v33 = vor.u32 %v8749_v21, %v7032_v23  ;;  %v8789_v15 = vld [vmem:[%s11475_s6 + $0x8e4] sm:$0xf]  ;;  %v7150_v20 = vld [vmem:[%s11475_s6 + $0x850] sm:$0xf]  ;;  %v8772_v21 = vld [vmem:[%s11475_s6 + $0x854] sm:$0xf0] }
  0xf8   :  { %2057 = vmatpush.bf16.msrb.mxu3 %v7067_v37  ;;  %v8747_v37 = vld [vmem:[%s11475_s6 + $0x794] sm:$0xf]  ;;  %v7214_v23 = vld [vmem:[%s11475_s6 + $0x8d0] sm:$0xf]  ;;  %v7151_v31 = vor.u32 %v8772_v21, %v7150_v20 }
  0xf9   :  { %2019 = vmatpush.bf16.msrb.mxu0 %v6991_v44  ;;  %v6963_v44 = vor.u32 %v8731_v35, %v6960_v36  ;;  %v7027_v49 = vor.u32 %v8747_v37, %v7024_v38  ;;  %v7215_v32 = vor.u32 %v8788_v26, %v7214_v23  ;;  %v8770_v35 = vld [vmem:[%s11475_s6 + $0x844] sm:$0xf0]  ;;  %v7206_v36 = vld [vmem:[%s11475_s6 + $0x8c0] sm:$0xf]  ;;  %v8780_v23 = vld [vmem:[%s11475_s6 + $0x894] sm:$0xf0] }
  0xfa   :  { %2032 = vmatpush.bf16.msrb.mxu1 %v7055_v45  ;;  %v7014_v45 = vld [vmem:[%s11475_s6 + $0x780] sm:$0xf]  ;;  %v8786_v38 = vld [vmem:[%s11475_s6 + $0x8c4] sm:$0xf0]  ;;  %v7120_v26 = vld [vmem:[%s11475_s6 + $0x818] sm:$0xf0] }
  0xfb   :  { %2045 = vmatpush.bf16.msrb.mxu2 %v6995_v46  ;;  %v8746_v46 = vld [vmem:[%s11475_s6 + $0x784] sm:$0xf0] }
  0xfc   :  { %2058 = vmatpush.bf16.msrb.mxu3 %v7059_v50  ;;  %v6952_v50 = vld [vmem:[%s11475_s6 + $0x708] sm:$0xf0]  ;;  %v7015_v61 = vor.u32 %v8746_v46, %v7014_v45  ;;  %v7207_v46 = vor.u32 %v8786_v38, %v7206_v36  ;;  %v8761_v38 = vld [vmem:[%s11475_s6 + $0x804] sm:$0xf] }
  0xfd   :  { %2020 = vmatpush.bf16.msrb.mxu0 %v6983_v56  ;;  %v819_v48 = vpop.f32.mrf.mxu2  ;;  %v7230_v56 = vld [vmem:[%s11475_s6 + $0x8f0] sm:$0xf]  ;;  %v6955_v62 = vor.u32 %v8729_v47, %v6952_v50 }
  0xfe   :  { %2033 = vmatpush.bf16.msrb.mxu1 %v7047_v58  ;;  %v832_v53 = vpop.f32.mrf.mxu3  ;;  %v8792_v58 = vld [vmem:[%s11475_s6 + $0x8f4] sm:$0xf0]  ;;  %v7134_v48 = vld [vmem:[%s11475_s6 + $0x830] sm:$0xf] }
  0xff   :  { %2046 = vmatpush.bf16.msrb.mxu2 %v6987_v59  ;;  %v8775_v59 = vld [vmem:[%s11475_s6 + $0x874] sm:$0xf]  ;;  %v7231_v3 = vor.u32 %v8792_v58, %v7230_v56  ;;  %v7198_v50 = vld [vmem:[%s11475_s6 + $0x8b0] sm:$0xf]  ;;  %v8784_v53 = vld [vmem:[%s11475_s6 + $0x8b4] sm:$0xf0] }
 0x100   :  { %2059 = vmatpush.bf16.msrb.mxu3 %v7051_v0  ;;  %v7232_v0 = vld [vmem:[%s11475_s6 + $0x8f8] sm:$0xf0]  ;;  %v7171_v5 = vor.u32 %v8775_v59, %v7168_v60  ;;  %v7199_v60 = vor.u32 %v8784_v53, %v7198_v50 }
 0x101   :  { %2021 = vmatpush.bf16.msrb.mxu0 %v6975_v7  ;;  %v8774_v7 = vld [vmem:[%s11475_s6 + $0x864] sm:$0xf0]  ;;  %v7200_v58 = vld [vmem:[%s11475_s6 + $0x8b8] sm:$0xf0] }
 0x102   :  { %2034 = vmatpush.bf16.msrb.mxu1 %v7039_v10  ;;  %v7222_v10 = vld [vmem:[%s11475_s6 + $0x8e0] sm:$0xf]  ;;  %v7159_v17 = vor.u32 %v8774_v7, %v7158_v6  ;;  %v7128_v6 = vld [vmem:[%s11475_s6 + $0x828] sm:$0xf0] }
 0x103   :  { %2047 = vmatpush.bf16.msrb.mxu2 %v6979_v11  ;;  %v7235_v11 = vor.u32 %v8791_v63, %v7232_v0  ;;  %v7223_v18 = vor.u32 %v8790_v12, %v7222_v10  ;;  %v8766_v63 = vld [vmem:[%s11475_s6 + $0x824] sm:$0xf0]  ;;  %v7190_v0 = vld [vmem:[%s11475_s6 + $0x8a0] sm:$0xf]  ;;  %v8781_v10 = vld [vmem:[%s11475_s6 + $0x8a4] sm:$0xf] }
 0x104   :  { %2060 = vmatpush.bf16.msrb.mxu3 %v7043_v16  ;;  %v7224_v16 = vld [vmem:[%s11475_s6 + $0x8e8] sm:$0xf0] }
 0x105   :  { %2022 = vmatpush.bf16.msrb.mxu0 %v6967_v25  ;;  %v7227_v25 = vor.u32 %v8789_v15, %v7224_v16 }
 0x106   :  { %2035 = vmatpush.bf16.msrb.mxu1 %v7031_v28  ;;  %v7152_v28 = vld [vmem:[%s11475_s6 + $0x858] sm:$0xf0] }
 0x107   :  { %2048 = vmatpush.bf16.msrb.mxu2 %v6971_v29  ;;  %v8787_v29 = vld [vmem:[%s11475_s6 + $0x8d4] sm:$0xf] }
 0x108   :  { %2061 = vmatpush.bf16.msrb.mxu3 %v7035_v33  ;;  %v7155_v33 = vor.u32 %v8771_v27, %v7152_v28  ;;  %v7219_v37 = vor.u32 %v8787_v29, %v7216_v30  ;;  %v8779_v27 = vld [vmem:[%s11475_s6 + $0x894] sm:$0xf]  ;;  %v7184_v28 = vld [vmem:[%s11475_s6 + $0x898] sm:$0xf0] }
 0x109   :  { %2023 = vmatpush.bf16.msrb.mxu0 %v6959_v40  ;;  %v8769_v40 = vld [vmem:[%s11475_s6 + $0x844] sm:$0xf]  ;;  %v7187_v36 = vor.u32 %v8779_v27, %v7184_v28 }
 0x10a   :  { %2036 = vmatpush.bf16.msrb.mxu1 %v7023_v43  ;;  %v7208_v43 = vld [vmem:[%s11475_s6 + $0x8c8] sm:$0xf0]  ;;  %v7147_v47 = vor.u32 %v8769_v40, %v7144_v41 }
 0x10b   :  { %2049 = vmatpush.bf16.msrb.mxu2 %v6963_v44  ;;  %v7143_v44 = vor.u32 %v8770_v35, %v7142_v34  ;;  %v7211_v52 = vor.u32 %v8785_v42, %v7208_v43  ;;  %v7174_v34 = vld [vmem:[%s11475_s6 + $0x880] sm:$0xf]  ;;  %v7112_v40 = vld [vmem:[%s11475_s6 + $0x808] sm:$0xf0]  ;;  %v8777_v42 = vld [vmem:[%s11475_s6 + $0x884] sm:$0xf] }
 0x10c   :  { %2062 = vmatpush.bf16.msrb.mxu3 %v7027_v49  ;;  %v8768_v49 = vld [vmem:[%s11475_s6 + $0x834] sm:$0xf0]  ;;  %v7176_v43 = vld [vmem:[%s11475_s6 + $0x888] sm:$0xf0] }
 0x10d   :  { %2024 = vmatpush.bf16.msrb.mxu0 %v6951_v57  ;;  %v1038_v45 = vpop.f32.mrf.mxu0  ;;  %v8783_v57 = vld [vmem:[%s11475_s6 + $0x8b4] sm:$0xf]  ;;  %v7135_v59 = vor.u32 %v8768_v49, %v7134_v48 }
 0x10e   :  { %2037 = vmatpush.bf16.msrb.mxu1 %v7015_v61  ;;  %v1051_v51 = vpop.f32.mrf.mxu1  ;;  %v7139_v61 = vor.u32 %v8767_v54, %v7136_v55 }
 0x10f   :  { %2050 = vmatpush.bf16.msrb.mxu2 %v6955_v62  ;;  %v10952_v56 = vadd.f32 %v1051_v51, %v1038_v45  ;;  %v7126_v62 = vld [vmem:[%s11475_s6 + $0x820] sm:$0xf] }
 0x110   :  { %2063 = vmatpush.bf16.msrb.mxu3 %v7019_v1  ;;  %2025 = vmatmul.bf16.vlgmr.msrb.gmra.mxu0 %v9531_v8  ;;  %v7127_v13 = vor.u32 %v8766_v63, %v7126_v62 }
 0x111   :  { %2264 = vmatpush.bf16.msra.mxu0 %v7167_v2  ;;  %2038 = vmatmul.bf16.vlgmr.msrb.gmra.mxu1 %v9533_v9  ;;  %v7203_v2 = vor.u32 %v8783_v57, %v7200_v58 }
 0x112   :  { %2277 = vmatpush.bf16.msra.mxu1 %v7231_v3  ;;  %2051 = vmatmul.bf16.vlgmr.msrb.gmra.mxu2 %v9531_v8  ;;  %v8782_v3 = vld [vmem:[%s11475_s6 + $0x8a4] sm:$0xf0] }
 0x113   :  { %2290 = vmatpush.bf16.msra.mxu2 %v7171_v5  ;;  %2064 = vmatmul.bf16.vlgmr.msrb.gmra.mxu3 %v9533_v9  ;;  %v8765_v5 = vld [vmem:[%s11475_s6 + $0x824] sm:$0xf]  ;;  %v7191_v16 = vor.u32 %v8782_v3, %v7190_v0 }
 0x114   :  { %2303 = vmatpush.bf16.msra.mxu3 %v7235_v11  ;;  %v7192_v11 = vld [vmem:[%s11475_s6 + $0x8a8] sm:$0xf0] }
 0x115   :  { %2265 = vmatpush.bf16.msra.mxu0 %v7159_v17  ;;  %v1064_v1 = vpop.f32.mrf.mxu2  ;;  %v1040_v15 = vpop.f32.mrf.mxu0  ;;  %v7131_v17 = vor.u32 %v8765_v5, %v7128_v6  ;;  %v7195_v21 = vor.u32 %v8781_v10, %v7192_v11 }
 0x116   :  { %2278 = vmatpush.bf16.msra.mxu1 %v7223_v18  ;;  %v1077_v7 = vpop.f32.mrf.mxu3  ;;  %v8764_v18 = vld [vmem:[%s11475_s6 + $0x814] sm:$0xf0]  ;;  %v1053_v20 = vpop.f32.mrf.mxu1 }
 0x117   :  { %2291 = vmatpush.bf16.msra.mxu2 %v7163_v19  ;;  %v10984_v12 = vadd.f32 %v1077_v7, %v1064_v1  ;;  %v7182_v19 = vld [vmem:[%s11475_s6 + $0x890] sm:$0xf]  ;;  %v7119_v29 = vor.u32 %v8764_v18, %v7118_v14  ;;  %v9170_v18 = vmov 1.0  }
 0x118   :  { %2304 = vmatpush.bf16.msra.mxu3 %v7227_v25  ;;  %v8763_v25 = vld [vmem:[%s11475_s6 + $0x814] sm:$0xf]  ;;  %v7183_v30 = vor.u32 %v8780_v23, %v7182_v19  ;;  %3493 = vst.msk [vmem:[#allocation3 + $0x90] sm:$0x1] %vm3492_vm4, %v9170_v18 }
 0x119   :  { %2266 = vmatpush.bf16.msra.mxu0 %v7151_v31  ;;  %v7123_v31 = vor.u32 %v8763_v25, %v7120_v26  ;;  %3892 = vst.msk [vmem:[#allocation4 + $0x48] sm:$0x1] %vm3891_vm11, %v9170_v18 }
 0x11a   :  { %2279 = vmatpush.bf16.msra.mxu1 %v7215_v32  ;;  %v7110_v32 = vld [vmem:[%s11475_s6 + $0x800] sm:$0xf] }
 0x11b   :  { %2292 = vmatpush.bf16.msra.mxu2 %v7155_v33  ;;  %v8762_v33 = vld [vmem:[%s11475_s6 + $0x804] sm:$0xf0] }
 0x11c   :  { %2305 = vmatpush.bf16.msra.mxu3 %v7219_v37  ;;  %v8778_v37 = vld [vmem:[%s11475_s6 + $0x884] sm:$0xf0] }
 0x11d   :  { %2267 = vmatpush.bf16.msra.mxu0 %v7143_v44  ;;  %v1066_v35 = vpop.f32.mrf.mxu2  ;;  %v7111_v44 = vor.u32 %v8762_v33, %v7110_v32  ;;  %v7175_v45 = vor.u32 %v8778_v37, %v7174_v34  ;;  %v8808_v37 = vld [vmem:[#allocation7 + $0x78] sm:$0xff] }
 0x11e   :  { %2280 = vmatpush.bf16.msra.mxu1 %v7207_v46  ;;  %v1079_v41 = vpop.f32.mrf.mxu3  ;;  %v7115_v46 = vor.u32 %v8761_v38, %v7112_v40  ;;  %v8799_v38 = vld [vmem:[#allocation7 + $0x30] sm:$0xff] }
 0x11f   :  { %2293 = vmatpush.bf16.msra.mxu2 %v7147_v47  ;;  %v7179_v47 = vor.u32 %v8777_v42, %v7176_v43  ;;  %v8807_v41 = vld [vmem:[#allocation7 + $0x70] sm:$0xff] }
 0x120   :  { %2306 = vmatpush.bf16.msra.mxu3 %v7211_v52 }
 0x121   :  { %2268 = vmatpush.bf16.msra.mxu0 %v7135_v59 }
 0x122   :  { %2281 = vmatpush.bf16.msra.mxu1 %v7199_v60 }
 0x123   :  { %2294 = vmatpush.bf16.msra.mxu2 %v7139_v61 }
 0x124   :  { %2307 = vmatpush.bf16.msra.mxu3 %v7203_v2 }
 0x125   :  { %2269 = vmatpush.bf16.msra.mxu0 %v7127_v13 }
 0x126   :  { %2282 = vmatpush.bf16.msra.mxu1 %v7191_v16 }
 0x127   :  { %2295 = vmatpush.bf16.msra.mxu2 %v7131_v17  ;;  %v2318_v17 = vlaneseq }
 0x128   :  { %2308 = vmatpush.bf16.msra.mxu3 %v7195_v21 }
 0x129   :  { %2270 = vmatpush.bf16.msra.mxu0 %v7119_v29  ;;  %vm2320_vm0 = vcmp.lt.s32.totalorder %v2318_v17, 256  ;;  %vm4674_vm13 = vcmp.lt.s32.totalorder %v2318_v17, 225 }
 0x12a   :  { %2283 = vmatpush.bf16.msra.mxu1 %v7183_v30  ;;  %2323 = vst.msk [vmem:[#allocation2 + $0x90] ss:$8 sm:$0x3] %vm2320_vm0, %v9170_v18 }
 0x12b   :  { %2296 = vmatpush.bf16.msra.mxu2 %v7123_v31  ;;  %5755 = vst.msk [vmem:[#allocation6 + $0x40] ss:$8 sm:$0x3] %vm2320_vm0, %v9170_v18 }
 0x12c   :  { %2309 = vmatpush.bf16.msra.mxu3 %v7187_v36  ;;  %v8800_v36 = vld [vmem:[#allocation7 + $0x38] sm:$0xff]  ;;  %4677 = vst.msk [vmem:[#allocation5 + $0x120] ss:$8 sm:$0x3] %vm4674_vm13, %v9170_v18 }
 0x12d   :  { %2271 = vmatpush.bf16.msra.mxu0 %v7111_v44  ;;  %v1285_v48 = vpop.f32.mrf.mxu0 }
 0x12e   :  { %2284 = vmatpush.bf16.msra.mxu1 %v7175_v45  ;;  %v1298_v49 = vpop.f32.mrf.mxu1 }
 0x12f   :  { %2297 = vmatpush.bf16.msra.mxu2 %v7115_v46  ;;  %v11038_v50 = vadd.f32 %v1298_v49, %v1285_v48  ;;  %v8798_v46 = vld [vmem:[#allocation7 + $0x28] sm:$0xff]  ;;  %v8797_v48 = vld [vmem:[#allocation7 + $0x20] sm:$0xff] }
 0x130   :  { %2310 = vmatpush.bf16.msra.mxu3 %v7179_v47  ;;  %2272 = vmatmul.bf16.vlgmr.msra.gmra.mxu0 %v9531_v8  ;;  %v8806_v47 = vld [vmem:[#allocation7 + $0x68] sm:$0xff] }
 0x131   :  { %2285 = vmatmul.bf16.vlgmr.msra.gmra.mxu1 %v9533_v9  ;;  %v2345_v19 = vld [vmem:[#allocation2 + $0x90] sm:$0x1]  ;;  %v2346_v25 = vld [vmem:[#allocation2 + $0x98] sm:$0x1] }
 0x132   :  { %2298 = vmatmul.bf16.vlgmr.msra.gmra.mxu2 %v9531_v8  ;;  %7236 = vmatpush.msk.msrb.mxu0 %vm2354_vm1, %v2345_v19  ;;  %v8840_v19 = vld [vmem:[#allocation7 + $0x178] sm:$0xff] }
 0x133   :  { %2311 = vmatmul.bf16.vlgmr.msra.gmra.mxu3 %v9533_v9  ;;  %7239 = vmatpush.msk.msrb.mxu1 %vm2354_vm1, %v2346_v25  ;;  %v8839_v25 = vld [vmem:[#allocation7 + $0x170] sm:$0xff] }
 0x134   :  { %2541 = vmatpush.bf16.msrb.mxu2 %v8800_v36  ;;  %2555 = vmatpush.bf16.msrb.mxu3 %v8808_v37  ;;  %v8843_v36 = vld [vmem:[#allocation7 + $0x190] sm:$0xff]  ;;  %v8836_v37 = vld [vmem:[#allocation7 + $0x158] sm:$0xff] }
 0x135   :  { %v1311_v51 = vpop.f32.mrf.mxu2  ;;  %v1287_v54 = vpop.f32.mrf.mxu0 }
 0x136   :  { %v1324_v52 = vpop.f32.mrf.mxu3  ;;  %v1300_v55 = vpop.f32.mrf.mxu1  ;;  %v8816_v54 = vld [vmem:[#allocation7 + $0xb8] sm:$0xff] }
 0x137   :  { %v11040_v53 = vadd.f32 %v1324_v52, %v1311_v51  ;;  %v8805_v51 = vld [vmem:[#allocation7 + $0x60] sm:$0xff]  ;;  %v8804_v55 = vld [vmem:[#allocation7 + $0x58] sm:$0xff] }
 0x138   :  { %2542 = vmatpush.bf16.msrb.mxu2 %v8799_v38  ;;  %2556 = vmatpush.bf16.msrb.mxu3 %v8807_v41  ;;  %v8852_v38 = vld [vmem:[#allocation7 + $0x1d8] sm:$0xff]  ;;  %v8842_v41 = vld [vmem:[#allocation7 + $0x188] sm:$0xff] }
 0x13c   :  { %2543 = vmatpush.bf16.msrb.mxu2 %v8798_v46  ;;  %2557 = vmatpush.bf16.msrb.mxu3 %v8806_v47  ;;  %v8834_v46 = vld [vmem:[#allocation7 + $0x148] sm:$0xff] }
 0x13d   :  { %v1313_v57 = vpop.f32.mrf.mxu2  ;;  %v8850_v47 = vld [vmem:[#allocation7 + $0x1c8] sm:$0xff] }
 0x13e   :  { %v1326_v58 = vpop.f32.mrf.mxu3  ;;  %v9086_v57 = vld [vmem:[#allocation2] sm:$0xff] }
 0x13f   :  { %v8803_v58 = vld [vmem:[#allocation7 + $0x50] sm:$0xff] }
 0x140   :  { %2544 = vmatpush.bf16.msrb.mxu2 %v8797_v48  ;;  %2558 = vmatpush.bf16.msrb.mxu3 %v8805_v51  ;;  %v8833_v48 = vld [vmem:[#allocation7 + $0x140] sm:$0xff] }
 0x144   :  { %2559 = vmatpush.bf16.msrb.mxu3 %v8804_v55 }
 0x148   :  { %2560 = vmatpush.bf16.msrb.mxu3 %v8803_v58 }
 0x14d   :  { %v1532_v59 = vpop.f32.mrf.mxu0 }
 0x14e   :  { %v1545_v60 = vpop.f32.mrf.mxu1 }
 0x14f   :  { %v1546_v61 = vadd.f32 %v1545_v60, %v1532_v59  ;;  %v2328_v59 = vld [vmem:[#allocation2 + $0x8] sm:$0xff] }
 0x150   :  { %v2326_v60 = vld [vmem:[%s11470_s1 + $0x8] sm:$0xff] }
 0x155   :  { %v1558_v62 = vpop.f32.mrf.mxu2  ;;  %v1534_v9 = vpop.f32.mrf.mxu0 }
 0x156   :  { %v1571_v63 = vpop.f32.mrf.mxu3  ;;  %v1547_v0 = vpop.f32.mrf.mxu1  ;;  %v8822_v9 = vld [vmem:[#allocation7 + $0xe8] sm:$0xff] }
 0x157   :  { %v11042_v8 = vadd.f32 %v1571_v63, %v1558_v62  ;;  %v8802_v62 = vld [vmem:[#allocation7 + $0x48] sm:$0xff]  ;;  %v8793_v63 = vld [vmem:[#allocation7] sm:$0xff]  ;;  %v8812_v0 = vld [vmem:[#allocation7 + $0x98] sm:$0xff] }
 0x158   :  { %2561 = vmatpush.bf16.msrb.mxu3 %v8802_v62  ;;  %v8863_v62 = vld [vmem:[%s11477_s8 + $0x30] sm:$0xff] }
 0x15d   :  { %v1560_v1 = vpop.f32.mrf.mxu2 }
 0x15e   :  { %v1573_v2 = vpop.f32.mrf.mxu3  ;;  %v8821_v1 = vld [vmem:[#allocation7 + $0xe0] sm:$0xff] }
 0x15f   :  { %v8811_v2 = vld [vmem:[#allocation7 + $0x90] sm:$0xff] }
 0x16d   :  { %v1779_v3 = vpop.f32.mrf.mxu0 }
 0x16e   :  { %v1792_v5 = vpop.f32.mrf.mxu1 }
 0x16f   :  { %v1793_v6 = vadd.f32 %v1792_v5, %v1779_v3  ;;  %v8820_v3 = vld [vmem:[#allocation7 + $0xd8] sm:$0xff]  ;;  %v8810_v5 = vld [vmem:[#allocation7 + $0x88] sm:$0xff] }
 0x175   :  { %v1805_v7 = vpop.f32.mrf.mxu2  ;;  %v1781_v13 = vpop.f32.mrf.mxu0 }
 0x176   :  { %v1818_v10 = vpop.f32.mrf.mxu3  ;;  %v1794_v14 = vpop.f32.mrf.mxu1  ;;  %v8831_v13 = vld [vmem:[#allocation7 + $0x130] sm:$0xff] }
 0x177   :  { %v1819_v11 = vadd.f32 %v1818_v10, %v1805_v7  ;;  %v8809_v7 = vld [vmem:[#allocation7 + $0x80] sm:$0xff]  ;;  %v8848_v10 = vld [vmem:[#allocation7 + $0x1b8] sm:$0xff]  ;;  %v8847_v14 = vld [vmem:[#allocation7 + $0x1b0] sm:$0xff] }
 0x17d   :  { %v1807_v15 = vpop.f32.mrf.mxu2 }
 0x17e   :  { %v1820_v16 = vpop.f32.mrf.mxu3  ;;  %v8801_v15 = vld [vmem:[#allocation7 + $0x40] sm:$0xff] }
 0x17f   :  { %v8817_v16 = vld [vmem:[#allocation7 + $0xc0] sm:$0xff]  ;;  %2562 = vmatpush.bf16.msrb.mxu3 %v8801_v15  ;;  %v8892_v15 = vld [vmem:[%s11477_s8 + $0x118] sm:$0xff] }
 0x183   :  { %2871 = vmatpush.bf16.msra.mxu3 %v8840_v19  ;;  %v8867_v19 = vld [vmem:[%s11477_s8 + $0x50] sm:$0xff] }
 0x187   :  { %2872 = vmatpush.bf16.msra.mxu3 %v8839_v25 }
 0x18d   :  { %v2026_v20 = vpop.f32.mrf.mxu0 }
 0x18e   :  { %v2039_v21 = vpop.f32.mrf.mxu1 }
 0x18f   :  { %v2040_v23 = vadd.f32 %v2039_v21, %v2026_v20  ;;  %v8856_v20 = vld [vmem:[#allocation7 + $0x1f8] sm:$0xff]  ;;  %v8830_v21 = vld [vmem:[#allocation7 + $0x128] sm:$0xff] }
 0x195   :  { %v2052_v26 = vpop.f32.mrf.mxu2  ;;  %v2028_v29 = vpop.f32.mrf.mxu0 }
 0x196   :  { %v2065_v27 = vpop.f32.mrf.mxu3  ;;  %v2041_v30 = vpop.f32.mrf.mxu1  ;;  %v8838_v29 = vld [vmem:[#allocation7 + $0x168] sm:$0xff] }
 0x197   :  { %v2066_v28 = vadd.f32 %v2065_v27, %v2052_v26  ;;  %v8855_v26 = vld [vmem:[#allocation7 + $0x1f0] sm:$0xff]  ;;  %v8829_v27 = vld [vmem:[#allocation7 + $0x120] sm:$0xff]  ;;  %v8854_v30 = vld [vmem:[#allocation7 + $0x1e8] sm:$0xff]  ;;  %2873 = vmatpush.bf16.msra.mxu3 %v8838_v29 }
 0x198   :  { %v8890_v29 = vld [vmem:[%s11477_s8 + $0x108] sm:$0xff] }
 0x19d   :  { %v2054_v31 = vpop.f32.mrf.mxu2 }
 0x19e   :  { %v2067_v32 = vpop.f32.mrf.mxu3  ;;  %v8828_v31 = vld [vmem:[#allocation7 + $0x118] sm:$0xff] }
 0x19f   :  { %v8844_v32 = vld [vmem:[#allocation7 + $0x198] sm:$0xff] }
 0x1ad   :  { %v2273_v33 = vpop.f32.mrf.mxu0 }
 0x1ae   :  { %v2286_v34 = vpop.f32.mrf.mxu1 }
 0x1af   :  { %v2287_v35 = vadd.f32 %v2286_v34, %v2273_v33  ;;  %v8837_v33 = vld [vmem:[#allocation7 + $0x160] sm:$0xff] }
 0x1b0   :  { %v8853_v34 = vld [vmem:[#allocation7 + $0x1e0] sm:$0xff]  ;;  %2874 = vmatpush.bf16.msra.mxu3 %v8837_v33 }
 0x1b1   :  { %2368 = vmatpush.msrb.mxu0 %v2287_v35  ;;  %v8827_v35 = vld [vmem:[#allocation7 + $0x110] sm:$0xff] }
 0x1b3   :  { %2369 = vmatpush.msrb.mxu0 %v2040_v23  ;;  %v8846_v23 = vld [vmem:[#allocation7 + $0x1a8] sm:$0xff] }
 0x1b4   :  { %2875 = vmatpush.bf16.msra.mxu3 %v8836_v37 }
 0x1b5   :  { %v2299_v40 = vpop.f32.mrf.mxu2  ;;  %v2275_v43 = vpop.f32.mrf.mxu0  ;;  %2370 = vmatpush.msrb.mxu0 %v1793_v6  ;;  %v8819_v6 = vld [vmem:[#allocation7 + $0xd0] sm:$0xff] }
 0x1b6   :  { %v2312_v42 = vpop.f32.mrf.mxu3  ;;  %v2288_v45 = vpop.f32.mrf.mxu1  ;;  %v8851_v43 = vld [vmem:[#allocation7 + $0x1d0] sm:$0xff] }
 0x1b7   :  { %v2313_v44 = vadd.f32 %v2312_v42, %v2299_v40  ;;  %2371 = vmatpush.msrb.mxu0 %v1546_v61  ;;  %v8794_v61 = vld [vmem:[#allocation7 + $0x8] sm:$0xff]  ;;  %v8835_v42 = vld [vmem:[#allocation7 + $0x150] sm:$0xff]  ;;  %v8841_v45 = vld [vmem:[#allocation7 + $0x180] sm:$0xff] }
 0x1b8   :  { %v8826_v40 = vld [vmem:[#allocation7 + $0x108] sm:$0xff]  ;;  %2876 = vmatpush.bf16.msra.mxu3 %v8835_v42 }
 0x1b9   :  { %2391 = vmatpush.msrb.mxu1 %v2313_v44  ;;  %2372 = vmatpush.msrb.mxu0 %v11038_v50  ;;  %v2325_v50 = vld [vmem:[%s11470_s1] sm:$0xff]  ;;  %v8825_v44 = vld [vmem:[#allocation7 + $0x100] sm:$0xff] }
 0x1bb   :  { %2392 = vmatpush.msrb.mxu1 %v2066_v28  ;;  %2373 = vmatpush.msrb.mxu0 %v10952_v56  ;;  %v8796_v56 = vld [vmem:[#allocation7 + $0x18] sm:$0xff]  ;;  %v8845_v28 = vld [vmem:[#allocation7 + $0x1a0] sm:$0xff] }
 0x1bc   :  { %2545 = vmatpush.bf16.msrb.mxu2 %v8796_v56  ;;  %2877 = vmatpush.bf16.msra.mxu3 %v8834_v46 }
 0x1bd   :  { %v2301_v49 = vpop.f32.mrf.mxu2  ;;  %2393 = vmatpush.msrb.mxu1 %v1819_v11  ;;  %2374 = vmatpush.msrb.mxu0 %v10752_v4  ;;  %v8795_v4 = vld [vmem:[#allocation7 + $0x10] sm:$0xff]  ;;  %v8818_v11 = vld [vmem:[#allocation7 + $0xc8] sm:$0xff] }
 0x1be   :  { %v2314_v52 = vpop.f32.mrf.mxu3  ;;  %v8849_v49 = vld [vmem:[#allocation7 + $0x1c0] sm:$0xff] }
 0x1bf   :  { %2394 = vmatpush.msrb.mxu1 %v11042_v8  ;;  %2375 = vmatpush.msrb.mxu0 %v10552_v22  ;;  %v8815_v22 = vld [vmem:[#allocation7 + $0xb0] sm:$0xff]  ;;  %v8832_v8 = vld [vmem:[#allocation7 + $0x138] sm:$0xff] }
 0x1c0   :  { %2546 = vmatpush.bf16.msrb.mxu2 %v8795_v4  ;;  %2878 = vmatpush.bf16.msra.mxu3 %v8833_v48 }
 0x1c1   :  { %2395 = vmatpush.msrb.mxu1 %v11040_v53  ;;  %2376 = vmatpush.msrb.mxu0 %v9086_v57  ;;  %v8824_v53 = vld [vmem:[#allocation7 + $0xf8] sm:$0xff] }
 0x1c2   :  { %7237 = vmatmul.msk.f32.vlgmr.msrb.gmra.mxu0 %vm2347_vm2, %v2325_v50 }
 0x1c3   :  { %2396 = vmatpush.msrb.mxu1 %v10984_v12  ;;  %2698 = vmatpush.bf16.msra.mxu0 %v8816_v54  ;;  %v8814_v12 = vld [vmem:[#allocation7 + $0xa8] sm:$0xff] }
 0x1c4   :  { %2547 = vmatpush.bf16.msrb.mxu2 %v8794_v61  ;;  %v8859_v61 = vld [vmem:[%s11477_s8 + $0x10] sm:$0xff] }
 0x1c5   :  { %2397 = vmatpush.msrb.mxu1 %v10784_v24  ;;  %v8823_v24 = vld [vmem:[#allocation7 + $0xf0] sm:$0xff] }
 0x1c7   :  { %2398 = vmatpush.msrb.mxu1 %v10584_v39  ;;  %2699 = vmatpush.bf16.msra.mxu0 %v8815_v22  ;;  %v8813_v39 = vld [vmem:[#allocation7 + $0xa0] sm:$0xff] }
 0x1c8   :  { %2548 = vmatpush.bf16.msrb.mxu2 %v8793_v63  ;;  %v8858_v63 = vld [vmem:[%s11477_s8 + $0x8] sm:$0xff] }
 0x1c9   :  { %2399 = vmatpush.msrb.mxu1 %v2328_v59  ;;  %v8860_v59 = vld [vmem:[%s11477_s8 + $0x18] sm:$0xff] }
 0x1ca   :  { %7240 = vmatmul.msk.f32.vlgmr.msrb.gmra.mxu1 %vm2347_vm2, %v2325_v50  ;;  %7238 = vmatmul.msk.f32.gmra.mxu0 %vm2347_vm2, %v2326_v60 }
 0x1cb   :  { %2712 = vmatpush.bf16.msra.mxu1 %v8824_v53  ;;  %2700 = vmatpush.bf16.msra.mxu0 %v8814_v12  ;;  %v8864_v53 = vld [vmem:[%s11477_s8 + $0x38] sm:$0xff] }
 0x1cc   :  { %2857 = vmatpush.bf16.msra.mxu2 %v8832_v8  ;;  %v8880_v12 = vld [vmem:[%s11477_s8 + $0xb8] sm:$0xff]  ;;  %v8862_v8 = vld [vmem:[%s11477_s8 + $0x28] sm:$0xff] }
 0x1cf   :  { %2713 = vmatpush.bf16.msra.mxu1 %v8823_v24  ;;  %2701 = vmatpush.bf16.msra.mxu0 %v8813_v39  ;;  %v8875_v24 = vld [vmem:[%s11477_s8 + $0x90] sm:$0xff] }
 0x1d0   :  { %2858 = vmatpush.bf16.msra.mxu2 %v8831_v13  ;;  %v8879_v39 = vld [vmem:[%s11477_s8 + $0xb0] sm:$0xff]  ;;  %v8868_v13 = vld [vmem:[%s11477_s8 + $0x58] sm:$0xff] }
 0x1d2   :  { %7241 = vmatmul.msk.f32.gmra.mxu1 %vm2347_vm2, %v2326_v60  ;;  %v8876_v60 = vld [vmem:[%s11477_s8 + $0x98] sm:$0xff] }
 0x1d3   :  { %2714 = vmatpush.bf16.msra.mxu1 %v8822_v9  ;;  %2702 = vmatpush.bf16.msra.mxu0 %v8812_v0  ;;  %v8874_v9 = vld [vmem:[%s11477_s8 + $0x88] sm:$0xff] }
 0x1d4   :  { %2859 = vmatpush.bf16.msra.mxu2 %v8830_v21 }
 0x1d7   :  { %2715 = vmatpush.bf16.msra.mxu1 %v8821_v1  ;;  %2703 = vmatpush.bf16.msra.mxu0 %v8811_v2  ;;  %v8878_v1 = vld [vmem:[%s11477_s8 + $0xa8] sm:$0xff] }
 0x1d8   :  { %2860 = vmatpush.bf16.msra.mxu2 %v8829_v27  ;;  %v8870_v27 = vld [vmem:[%s11477_s8 + $0x68] sm:$0xff] }
 0x1db   :  { %2716 = vmatpush.bf16.msra.mxu1 %v8820_v3  ;;  %2704 = vmatpush.bf16.msra.mxu0 %v8810_v5  ;;  %v8857_v5 = vld [vmem:[%s11477_s8] sm:$0xff] }
 0x1dc   :  { %2861 = vmatpush.bf16.msra.mxu2 %v8828_v31  ;;  %v8869_v31 = vld [vmem:[%s11477_s8 + $0x60] sm:$0xff] }
 0x1df   :  { %2717 = vmatpush.bf16.msra.mxu1 %v8819_v6  ;;  %2705 = vmatpush.bf16.msra.mxu0 %v8809_v7  ;;  %v8861_v6 = vld [vmem:[%s11477_s8 + $0x20] sm:$0xff] }
 0x1e0   :  { %2862 = vmatpush.bf16.msra.mxu2 %v8827_v35  ;;  %v8873_v7 = vld [vmem:[%s11477_s8 + $0x80] sm:$0xff] }
 0x1e3   :  { %3016 = vmatpush.bf16.msrb.mxu0 %v8848_v10  ;;  %2718 = vmatpush.bf16.msra.mxu1 %v8818_v11  ;;  %v8877_v10 = vld [vmem:[%s11477_s8 + $0xa0] sm:$0xff] }
 0x1e4   :  { %2863 = vmatpush.bf16.msra.mxu2 %v8826_v40 }
 0x1e7   :  { %3017 = vmatpush.bf16.msrb.mxu0 %v8847_v14  ;;  %2719 = vmatpush.bf16.msra.mxu1 %v8817_v16  ;;  %v8872_v14 = vld [vmem:[%s11477_s8 + $0x78] sm:$0xff] }
 0x1e8   :  { %2864 = vmatpush.bf16.msra.mxu2 %v8825_v44 }
 0x1eb   :  { %3030 = vmatpush.bf16.msrb.mxu1 %v8856_v20  ;;  %3018 = vmatpush.bf16.msrb.mxu0 %v8846_v23  ;;  %v8871_v20 = vld [vmem:[%s11477_s8 + $0x70] sm:$0xff] }
 0x1ec   :  { %v8891_v23 = vld [vmem:[%s11477_s8 + $0x110] sm:$0xff] }
 0x1ef   :  { %3031 = vmatpush.bf16.msrb.mxu1 %v8855_v26  ;;  %3019 = vmatpush.bf16.msrb.mxu0 %v8845_v28  ;;  %v8866_v26 = vld [vmem:[%s11477_s8 + $0x48] sm:$0xff] }
 0x1f3   :  { %3032 = vmatpush.bf16.msrb.mxu1 %v8854_v30  ;;  %3020 = vmatpush.bf16.msrb.mxu0 %v8844_v32  ;;  %v8865_v30 = vld [vmem:[%s11477_s8 + $0x40] sm:$0xff] }
 0x1f4   :  { %v8889_v32 = vld [vmem:[%s11477_s8 + $0x100] sm:$0xff] }
 0x1f7   :  { %3033 = vmatpush.bf16.msrb.mxu1 %v8853_v34  ;;  %3021 = vmatpush.bf16.msrb.mxu0 %v8843_v36 }
 0x1fb   :  { %3034 = vmatpush.bf16.msrb.mxu1 %v8852_v38  ;;  %3022 = vmatpush.bf16.msrb.mxu0 %v8842_v41 }
 0x1ff   :  { %3035 = vmatpush.bf16.msrb.mxu1 %v8851_v43  ;;  %3023 = vmatpush.bf16.msrb.mxu0 %v8841_v45 }
 0x203   :  { %3036 = vmatpush.bf16.msrb.mxu1 %v8850_v47 }
 0x207   :  { %3037 = vmatpush.bf16.msrb.mxu1 %v8849_v49 }
 0x23f   :  { %v2378_v51 = vpop.f32.mrf.mxu0 }
 0x240   :  { %v2407_v54 = vmax.f32 %v2378_v51, 0.0 }
 0x247   :  { %v2401_v52 = vpop.f32.mrf.mxu1  ;;  %v2381_v50 = vpop.f32.mrf.mxu0 }
 0x248   :  { %v2409_v56 = vmax.f32 %v2381_v50, 0.0  ;;  %v2408_v22 = vmax.f32 %v2401_v52, 0.0 }
 0x24a   :  { %v2411_v55 = vpack.c.bf16 %v2409_v56, %v2407_v54 }
 0x24c   :  { %2549 = vmatmul.bf16.vlgmr.msrb.gmra.mxu2 %v2411_v55  ;;  %2706 = vmatmul.bf16.vlgmr.msra.gmra.mxu0 %v2411_v55 }
 0x24d   :  { %3087 = vmatpush.bf16.msrb.mxu2 %v8860_v59  ;;  %3284 = vmatpush.bf16.msra.mxu0 %v8876_v60  ;;  %v8887_v59 = vld [vmem:[%s11477_s8 + $0xf0] sm:$0xff]  ;;  %v8886_v60 = vld [vmem:[%s11477_s8 + $0xe8] sm:$0xff] }
 0x24f   :  { %v2404_v57 = vpop.f32.mrf.mxu1 }
 0x250   :  { %v2410_v4 = vmax.f32 %v2404_v57, 0.0 }
 0x251   :  { %3088 = vmatpush.bf16.msrb.mxu2 %v8859_v61  ;;  %3285 = vmatpush.bf16.msra.mxu0 %v8875_v24  ;;  %v8885_v61 = vld [vmem:[%s11477_s8 + $0xe0] sm:$0xff] }
 0x252   :  { %v2412_v58 = vpack.c.bf16 %v2410_v4, %v2408_v22  ;;  %v8884_v22 = vld [vmem:[%s11477_s8 + $0xd8] sm:$0xff] }
 0x253   :  { %v8888_v4 = vld [vmem:[%s11477_s8 + $0xf8] sm:$0xff] }
 0x254   :  { %2563 = vmatmul.bf16.vlgmr.msrb.gmra.mxu3 %v2412_v58  ;;  %2720 = vmatmul.bf16.vlgmr.msra.gmra.mxu1 %v2412_v58 }
 0x255   :  { %3137 = vmatpush.bf16.msrb.mxu3 %v8864_v53  ;;  %3333 = vmatpush.bf16.msra.mxu1 %v8880_v12  ;;  %v8882_v53 = vld [vmem:[%s11477_s8 + $0xc8] sm:$0xff]  ;;  %v8881_v12 = vld [vmem:[%s11477_s8 + $0xc0] sm:$0xff] }
 0x256   :  { %3089 = vmatpush.bf16.msrb.mxu2 %v8858_v63  ;;  %3286 = vmatpush.bf16.msra.mxu0 %v8874_v9 }
 0x259   :  { %3138 = vmatpush.bf16.msrb.mxu3 %v8863_v62  ;;  %3334 = vmatpush.bf16.msra.mxu1 %v8879_v39  ;;  %v3514_v62 = vld [vmem:[#allocation3 + $0x90] sm:$0x1] }
 0x25a   :  { %3090 = vmatpush.bf16.msrb.mxu2 %v8857_v5  ;;  %3287 = vmatpush.bf16.msra.mxu0 %v8873_v7 }
 0x25c   :  { %2865 = vmatmul.bf16.vlgmr.msra.gmra.mxu2 %v2411_v55  ;;  %3024 = vmatmul.bf16.vlgmr.msrb.gmra.mxu0 %v2411_v55 }
 0x25d   :  { %3139 = vmatpush.bf16.msrb.mxu3 %v8862_v8  ;;  %3335 = vmatpush.bf16.msra.mxu1 %v8878_v1 }
 0x25e   :  { %3186 = vmatpush.bf16.msra.mxu2 %v8868_v13  ;;  %3480 = vmatpush.bf16.msrb.mxu0 %v8892_v15 }
 0x261   :  { %3140 = vmatpush.bf16.msrb.mxu3 %v8861_v6  ;;  %3336 = vmatpush.bf16.msra.mxu1 %v8877_v10 }
 0x262   :  { %3187 = vmatpush.bf16.msra.mxu2 %v8867_v19  ;;  %3481 = vmatpush.bf16.msrb.mxu0 %v8891_v23 }
 0x264   :  { %2879 = vmatmul.bf16.vlgmr.msra.gmra.mxu3 %v2412_v58  ;;  %3038 = vmatmul.bf16.vlgmr.msrb.gmra.mxu1 %v2412_v58  ;;  %v8883_v58 = vld [vmem:[%s11477_s8 + $0xd0] sm:$0xff] }
 0x265   :  { %3235 = vmatpush.bf16.msra.mxu3 %v8872_v14 }
 0x266   :  { %3188 = vmatpush.bf16.msra.mxu2 %v8866_v26  ;;  %3482 = vmatpush.bf16.msrb.mxu0 %v8890_v29 }
 0x269   :  { %3236 = vmatpush.bf16.msra.mxu3 %v8871_v20 }
 0x26a   :  { %3189 = vmatpush.bf16.msra.mxu2 %v8865_v30  ;;  %3483 = vmatpush.bf16.msrb.mxu0 %v8889_v32 }
 0x26d   :  { %3237 = vmatpush.bf16.msra.mxu3 %v8870_v27 }
 0x271   :  { %3238 = vmatpush.bf16.msra.mxu3 %v8869_v31 }
 0x2c9   :  { %v2707_v3 = vpop.f32.mrf.mxu0 }
 0x2cf   :  { %v2550_v0 = vpop.f32.mrf.mxu2 }
 0x2d1   :  { %v2721_v2 = vpop.f32.mrf.mxu1  ;;  %v2709_v25 = vpop.f32.mrf.mxu0 }
 0x2d2   :  { %v2722_v38 = vadd.f32 %v2721_v2, %v2707_v3 }
 0x2d7   :  { %v2564_v11 = vpop.f32.mrf.mxu3  ;;  %v2552_v16 = vpop.f32.mrf.mxu2 }
 0x2d8   :  { %v2565_v37 = vadd.f32 %v2564_v11, %v2550_v0 }
 0x2d9   :  { %v2723_v21 = vpop.f32.mrf.mxu1  ;;  %v3025_v35 = vpop.f32.mrf.mxu0 }
 0x2da   :  { %v2726_v42 = vmax.f32 %v2565_v37, %v2722_v38  ;;  %v2724_v43 = vadd.f32 %v2723_v21, %v2709_v25  ;;  %v3495_v21 = vld [vmem:[%s11471_s2 + $0x8] sm:$0xff] }
 0x2df   :  { %v2566_v28 = vpop.f32.mrf.mxu3  ;;  %v2866_v33 = vpop.f32.mrf.mxu2 }
 0x2e0   :  { %v2567_v40 = vadd.f32 %v2566_v28, %v2552_v16 }
 0x2e1   :  { %v3039_v34 = vpop.f32.mrf.mxu1  ;;  %v3027_v51 = vpop.f32.mrf.mxu0 }
 0x2e2   :  { %v2727_v47 = vmax.f32 %v2567_v40, %v2724_v43  ;;  %v3040_v52 = vadd.f32 %v3039_v34, %v3025_v35  ;;  %v3494_v40 = vld [vmem:[%s11471_s2] sm:$0xff]  ;;  %v8894_v43 = vld [vmem:[%s11478_s9 + $0x8] sm:$0xff] }
 0x2e7   :  { %v2880_v36 = vpop.f32.mrf.mxu3  ;;  %v2868_v44 = vpop.f32.mrf.mxu2 }
 0x2e8   :  { %v2881_v41 = vadd.f32 %v2880_v36, %v2866_v33 }
 0x2e9   :  { %v3041_v45 = vpop.f32.mrf.mxu1 }
 0x2ea   :  { %v2885_v48 = vmax.f32 %v2726_v42, %v2881_v41  ;;  %v3042_v50 = vadd.f32 %v3041_v45, %v3027_v51  ;;  %v8893_v42 = vld [vmem:[%s11478_s9] sm:$0xff]  ;;  %v8896_v45 = vld [vmem:[%s11478_s9 + $0x18] sm:$0xff] }
 0x2ec   :  { %v3044_v56 = vmax.f32 %v2885_v48, %v3040_v52  ;;  %v7745_v52 = vld [vmem:[%s11479_s10] sm:$0xf] }
 0x2ef   :  { %v2882_v46 = vpop.f32.mrf.mxu3 }
 0x2f0   :  { %v2883_v49 = vadd.f32 %v2882_v46, %v2868_v44  ;;  %v8895_v44 = vld [vmem:[%s11478_s9 + $0x10] sm:$0xff] }
 0x2f2   :  { %v2886_v54 = vmax.f32 %v2727_v47, %v2883_v49 }
 0x2f4   :  { %v3045_v55 = vmax.f32 %v2886_v54, %v3042_v50  ;;  %v8897_v50 = vld [vmem:[%s11479_s10] sm:$0x10] }
 0x2f5   :  { %v7746_v54 = vor.u32 %v8897_v50, %v7745_v52 }
 0x2f6   :  { %v3046_v57 = vpack.c.bf16 %v3045_v55, %v3044_v56  ;;  %v9171_v56 = vmov 65535  }
 0x2f7   :  { %v3671_v55 = vsel %vm3669_vm7, 4294967295, %v9171_v56 }
 0x2f8   :  { %7514 = vmatmul.msk.bf16.vlgmr.msrb.gmra.mxu2 %vm3079_vm3, %v3046_v57  ;;  %7539 = vmatmul.msk.bf16.vlgmr.msrb.gmra.mxu3 %vm3079_vm3, %v3046_v57 }
 0x2f9   :  { %7614 = vmatmul.msk.bf16.vlgmr.msra.gmra.mxu0 %vm3079_vm3, %v3046_v57  ;;  %7639 = vmatmul.msk.bf16.vlgmr.msra.gmra.mxu1 %vm3079_vm3, %v3046_v57 }
 0x2fa   :  { %3382 = vmatpush.bf16.msrb.mxu2 %v8884_v22  ;;  %3431 = vmatpush.bf16.msrb.mxu3 %v8888_v4  ;;  %v8898_v22 = vld [vmem:[%s11479_s10 + $0x8] sm:$0x10]  ;;  %v3672_v4 = vsel %vm3670_vm8, %v3671_v55, 0 }
 0x2fb   :  { %3604 = vmatpush.bf16.msra.mxu0 %v8894_v43 }
 0x2fe   :  { %3383 = vmatpush.bf16.msrb.mxu2 %v8883_v58  ;;  %3432 = vmatpush.bf16.msrb.mxu3 %v8887_v59  ;;  %v7759_v59 = vld [vmem:[%s11479_s10 + $0x10] sm:$0xf] }
 0x302   :  { %3384 = vmatpush.bf16.msrb.mxu2 %v8882_v53  ;;  %3433 = vmatpush.bf16.msrb.mxu3 %v8886_v60  ;;  %v8899_v53 = vld [vmem:[%s11479_s10 + $0x10] sm:$0x10]  ;;  %v3674_v60 = vand.u32 %v7746_v54, %v3672_v4 }
 0x306   :  { %3385 = vmatpush.bf16.msrb.mxu2 %v8881_v12  ;;  %3434 = vmatpush.bf16.msrb.mxu3 %v8885_v61  ;;  %v7760_v12 = vor.u32 %v8899_v53, %v7759_v59  ;;  %v7766_v61 = vld [vmem:[%s11479_s10 + $0x18] sm:$0xf] }
 0x308   :  { %7564 = vmatmul.msk.bf16.vlgmr.msra.gmra.mxu2 %vm3079_vm3, %v3046_v57  ;;  %7589 = vmatmul.msk.bf16.vlgmr.msra.gmra.mxu3 %vm3079_vm3, %v3046_v57 }
 0x309   :  { %7714 = vmatmul.msk.bf16.vlgmr.msrb.gmra.mxu0 %vm3079_vm3, %v3046_v57 }
 0x30a   :  { %7715 = vmatpush.msk.msra.mxu2 %vm2354_vm1, %v3514_v62  ;;  %3582 = vmatpush.bf16.msra.mxu3 %v8893_v42  ;;  %v8900_v62 = vld [vmem:[%s11479_s10 + $0x18] sm:$0x10] }
 0x318   :  { %7664 = vmatmul.msk.bf16.vlgmr.msrb.gmra.mxu2 %vm3079_vm3, %v3046_v57  ;;  %7689 = vmatmul.msk.bf16.vlgmr.msrb.gmra.mxu3 %vm3079_vm3, %v3046_v57  ;;  %v7752_v57 = vld [vmem:[%s11479_s10 + $0x8] sm:$0xf] }
 0x319   :  { %v7753_v58 = vor.u32 %v8898_v22, %v7752_v57  ;;  %3683 = vmatpush.bf16.msrb.mxu3 %v3674_v60 }
 0x376   :  { %v3289_v24 = vpop.f32.mrf.mxu0  ;;  %v3338_v39 = vpop.f32.mrf.mxu1 }
 0x377   :  { %3294 = vst.msk [vmem:[#allocation3 + $0x40] sm:$0xff] %vm3097_vm5, %v3289_v24  ;;  %v3700_v24 = vand.u32 %v7753_v58, %v3672_v4  ;;  %v4033_v58 = vld [vmem:[#allocation9 + $0x68] sm:$0x11] }
 0x378   :  { %3343 = vst.msk [vmem:[#allocation3 + $0x50] sm:$0xff] %vm3097_vm5, %v3338_v39  ;;  %v7767_v39 = vor.u32 %v8900_v62, %v7766_v61  ;;  %v4053_v60 = vunpack.c.l.b16 %v4033_v58 }
 0x379   :  { %3709 = vmatpush.bf16.msrb.mxu0 %v3700_v24 }
 0x37b   :  { %v3092_v63 = vpop.f32.mrf.mxu2  ;;  %v3142_v8 = vpop.f32.mrf.mxu3 }
 0x37c   :  { %3098 = vst.msk [vmem:[#allocation3] sm:$0xff] %vm3097_vm5, %v3092_v63  ;;  %v3725_v63 = vand.u32 %v7760_v12, %v3672_v4  ;;  %v9172_v12 = vmov 0  }
 0x37d   :  { %3147 = vst.msk [vmem:[#allocation3 + $0x10] sm:$0xff] %vm3097_vm5, %v3142_v8  ;;  %v3750_v8 = vand.u32 %v7767_v39, %v3672_v4  ;;  %v11294_v61 = vsel %vm2354_vm1, 65535, %v9172_v12  ;;  %v4061_v39 = vpack.c.b16 %v4053_v60, %v4053_v60  ;;  %v4195_v12 = vld [vmem:[#allocation9 + $0xd8] sm:$0x11] }
 0x37e   :  { %v3291_v9 = vpop.f32.mrf.mxu0  ;;  %v3340_v0 = vpop.f32.mrf.mxu1  ;;  %v3504_v31 = vld [vmem:[#allocation3 + $0x40] sm:$0xff] }
 0x37f   :  { %3295 = vst.msk [vmem:[#allocation3 + $0x48] sm:$0xff] %vm3097_vm5, %v3291_v9  ;;  %v3506_v29 = vld [vmem:[#allocation3 + $0x50] sm:$0xff]  ;;  %v7773_v9 = vld [vmem:[%s11479_s10 + $0x20] sm:$0xf] }
 0x380   :  { %3344 = vst.msk [vmem:[#allocation3 + $0x58] sm:$0xff] %vm3097_vm5, %v3340_v0  ;;  %v8901_v0 = vld [vmem:[%s11479_s10 + $0x20] sm:$0x10] }
 0x383   :  { %v3094_v1 = vpop.f32.mrf.mxu2  ;;  %v3144_v2 = vpop.f32.mrf.mxu3  ;;  %v3496_v41 = vld [vmem:[#allocation3] sm:$0xff] }
 0x384   :  { %3099 = vst.msk [vmem:[#allocation3 + $0x8] sm:$0xff] %vm3097_vm5, %v3094_v1  ;;  %v3498_v37 = vld [vmem:[#allocation3 + $0x10] sm:$0xff]  ;;  %v7780_v1 = vld [vmem:[%s11479_s10 + $0x28] sm:$0xf] }
 0x385   :  { %3148 = vst.msk [vmem:[#allocation3 + $0x18] sm:$0xff] %vm3097_vm5, %v3144_v2  ;;  %v7774_v2 = vor.u32 %v8901_v0, %v7773_v9  ;;  %v4070_v9 = vand.u32 %v4061_v39, %v11294_v61 }
 0x386   :  { %v3485_v3 = vpop.f32.mrf.mxu0  ;;  %v3505_v30 = vld [vmem:[#allocation3 + $0x48] sm:$0xff] }
 0x387   :  { %3490 = vst.msk [vmem:[#allocation3 + $0x80] sm:$0xff] %vm3097_vm5, %v3485_v3  ;;  %v3507_v28 = vld [vmem:[#allocation3 + $0x58] sm:$0xff]  ;;  %v8902_v3 = vld [vmem:[%s11479_s10 + $0x28] sm:$0x10] }
 0x38b   :  { %v3191_v5 = vpop.f32.mrf.mxu2  ;;  %v3240_v6 = vpop.f32.mrf.mxu3  ;;  %v3497_v38 = vld [vmem:[#allocation3 + $0x8] sm:$0xff] }
 0x38c   :  { %3196 = vst.msk [vmem:[#allocation3 + $0x20] sm:$0xff] %vm3097_vm5, %v3191_v5  ;;  %v3499_v36 = vld [vmem:[#allocation3 + $0x18] sm:$0xff]  ;;  %v7787_v5 = vld [vmem:[%s11479_s10 + $0x30] sm:$0xf] }
 0x38d   :  { %3245 = vst.msk [vmem:[#allocation3 + $0x30] sm:$0xff] %vm3097_vm5, %v3240_v6  ;;  %v8903_v6 = vld [vmem:[%s11479_s10 + $0x30] sm:$0x10] }
 0x38e   :  { %v3487_v7 = vpop.f32.mrf.mxu0  ;;  %v3512_v14 = vld [vmem:[#allocation3 + $0x80] sm:$0xff] }
 0x38f   :  { %3491 = vst.msk [vmem:[#allocation3 + $0x88] sm:$0xff] %vm3097_vm5, %v3487_v7  ;;  %v7781_v7 = vor.u32 %v8902_v3, %v7780_v1 }
 0x393   :  { %v3193_v10 = vpop.f32.mrf.mxu2  ;;  %v3242_v11 = vpop.f32.mrf.mxu3  ;;  %v3500_v35 = vld [vmem:[#allocation3 + $0x20] sm:$0xff] }
 0x394   :  { %3197 = vst.msk [vmem:[#allocation3 + $0x28] sm:$0xff] %vm3097_vm5, %v3193_v10  ;;  %v3502_v33 = vld [vmem:[#allocation3 + $0x30] sm:$0xff]  ;;  %v7788_v10 = vor.u32 %v8903_v6, %v7787_v5  ;;  %v4054_v6 = vunpack.c.h.b16 %v4033_v58  ;;  %v4114_v58 = vld [vmem:[#allocation9 + $0xa0] sm:$0x11] }
 0x395   :  { %3246 = vst.msk [vmem:[#allocation3 + $0x38] sm:$0xff] %vm3097_vm5, %v3242_v11  ;;  %v7794_v11 = vld [vmem:[%s11479_s10 + $0x38] sm:$0xf]  ;;  %v4135_v60 = vunpack.c.h.b16 %v4114_v58 }
 0x396   :  { %v3513_v13 = vld [vmem:[#allocation3 + $0x88] sm:$0xff] }
 0x397   :  { %3556 = vmatpush.msra.mxu2 %v3513_v13  ;;  %v8904_v13 = vld [vmem:[%s11479_s10 + $0x38] sm:$0x10] }
 0x399   :  { %3557 = vmatpush.msra.mxu2 %v3512_v14  ;;  %v3775_v14 = vand.u32 %v7774_v2, %v3672_v4 }
 0x39a   :  { %7716 = vmatmul.msk.f32.vlgmr.msra.gmra.mxu2 %vm3515_vm6, %v3495_v21 }
 0x39b   :  { %v3387_v15 = vpop.f32.mrf.mxu2  ;;  %v3436_v16 = vpop.f32.mrf.mxu3  ;;  %v3501_v34 = vld [vmem:[#allocation3 + $0x28] sm:$0xff]  ;;  %3627 = vmatpush.bf16.msrb.mxu2 %v8895_v44 }
 0x39c   :  { %3392 = vst.msk [vmem:[#allocation3 + $0x60] sm:$0xff] %vm3097_vm5, %v3387_v15  ;;  %v3503_v32 = vld [vmem:[#allocation3 + $0x38] sm:$0xff]  ;;  %v7795_v15 = vor.u32 %v8904_v13, %v7794_v11  ;;  %v4062_v11 = vpack.c.b16 %v4054_v6, %v4054_v6  ;;  %v7879_v6 = vld [vmem:[#allocation9 + $0x98] sm:$0xf0] }
 0x39d   :  { %3441 = vst.msk [vmem:[#allocation3 + $0x70] sm:$0xff] %vm3097_vm5, %v3436_v16  ;;  %v3800_v16 = vand.u32 %v7781_v7, %v3672_v4 }
 0x39f   :  { %3734 = vmatpush.bf16.msra.mxu2 %v3725_v63 }
 0x3a3   :  { %v3389_v19 = vpop.f32.mrf.mxu2  ;;  %v3438_v20 = vpop.f32.mrf.mxu3  ;;  %v3508_v27 = vld [vmem:[#allocation3 + $0x60] sm:$0xff] }
 0x3a4   :  { %3393 = vst.msk [vmem:[#allocation3 + $0x68] sm:$0xff] %vm3097_vm5, %v3389_v19  ;;  %v3510_v25 = vld [vmem:[#allocation3 + $0x70] sm:$0xff]  ;;  %v3825_v19 = vand.u32 %v7788_v10, %v3672_v4 }
 0x3a5   :  { %3442 = vst.msk [vmem:[#allocation3 + $0x78] sm:$0xff] %vm3097_vm5, %v3438_v20  ;;  %v3850_v20 = vand.u32 %v7795_v15, %v3672_v4  ;;  %v3893_v15 = vld [vmem:[%s11472_s3] sm:$0xff] }
 0x3ab   :  { %v3509_v26 = vld [vmem:[#allocation3 + $0x68] sm:$0xff] }
 0x3ac   :  { %v3511_v23 = vld [vmem:[#allocation3 + $0x78] sm:$0xff] }
 0x3ad   :  { %3522 = vmatpush.msrb.mxu1 %v3511_v23 }
 0x3af   :  { %3523 = vmatpush.msrb.mxu1 %v3510_v25 }
 0x3b1   :  { %3524 = vmatpush.msrb.mxu1 %v3509_v26  ;;  %v7801_v26 = vld [vmem:[%s11479_s10 + $0x40] sm:$0xf] }
 0x3b3   :  { %3525 = vmatpush.msrb.mxu1 %v3508_v27  ;;  %v8905_v27 = vld [vmem:[%s11479_s10 + $0x40] sm:$0x10] }
 0x3b5   :  { %3526 = vmatpush.msrb.mxu1 %v3507_v28 }
 0x3b7   :  { %3527 = vmatpush.msrb.mxu1 %v3506_v29 }
 0x3b9   :  { %3528 = vmatpush.msrb.mxu1 %v3505_v30 }
 0x3bb   :  { %3529 = vmatpush.msrb.mxu1 %v3504_v31 }
 0x3bd   :  { %3530 = vmatpush.msrb.mxu1 %v3503_v32 }
 0x3bf   :  { %3531 = vmatpush.msrb.mxu1 %v3502_v33  ;;  %v7802_v33 = vor.u32 %v8905_v27, %v7801_v26  ;;  %v7827_v27 = vld [vmem:[#allocation9 + $0x28] sm:$0xf0] }
 0x3c1   :  { %3532 = vmatpush.msrb.mxu1 %v3501_v34 }
 0x3c3   :  { %3533 = vmatpush.msrb.mxu1 %v3500_v35 }
 0x3c5   :  { %3534 = vmatpush.msrb.mxu1 %v3499_v36  ;;  %v3875_v36 = vand.u32 %v7802_v33, %v3672_v4  ;;  %v3946_v4 = vld [vmem:[#allocation9 + $0x30] sm:$0x11]  ;;  %v7853_v33 = vld [vmem:[#allocation9 + $0x60] sm:$0xf0] }
 0x3c6   :  { %v3966_v59 = vunpack.c.l.b16 %v3946_v4  ;;  %v3967_v53 = vunpack.c.h.b16 %v3946_v4  ;;  %v7837_v4 = vld [vmem:[#allocation9 + $0x40] sm:$0xf0] }
 0x3c7   :  { %3535 = vmatpush.msrb.mxu1 %v3498_v37 }
 0x3c8   :  { %v3974_v62 = vpack.c.b16 %v3966_v59, %v3966_v59  ;;  %v3975_v24 = vpack.c.b16 %v3967_v53, %v3967_v53  ;;  %v4134_v53 = vunpack.c.l.b16 %v4114_v58 }
 0x3c9   :  { %3536 = vmatpush.msrb.mxu1 %v3497_v38 }
 0x3ca   :  { %v3988_v63 = vand.u32 %v11294_v61, %v3974_v62  ;;  %v4215_v62 = vunpack.c.l.b16 %v4195_v12  ;;  %v4142_v39 = vpack.c.b16 %v4134_v53, %v4134_v53 }
 0x3cb   :  { %3537 = vmatpush.msrb.mxu1 %v3496_v41 }
 0x3cc   :  { %3538 = vmatmul.f32.vlgmr.msrb.gmra.mxu1 %v3494_v40 }
 0x3cd   :  { %3650 = vmatpush.bf16.msra.mxu1 %v8896_v45 }
 0x3d1   :  { %3759 = vmatpush.bf16.msrb.mxu1 %v3750_v8  ;;  %v3991_v8 = vand.u32 %v11294_v61, %v3975_v24  ;;  %v4216_v24 = vunpack.c.h.b16 %v4195_v12 }
 0x41d   :  { %v3559_v46 = vpop.f32.mrf.mxu2 }
 0x449   :  { %v3539_v47 = vpop.f32.mrf.mxu1 }
 0x44a   :  { %v3560_v48 = vadd.f32 %v3559_v46, %v3539_v47  ;;  %v3904_v46 = vld [vmem:[#allocation4 + $0x48] sm:$0x1] }
 0x44c   :  { %v3562_v49 = vmax.f32 %v3560_v48, 0.0 }
 0x44e   :  { %v3563_v51 = vpack.c.bf16 %v3562_v49, %v3562_v49 }
 0x450   :  { %7721 = vmatmul.msk.bf16.vlgmr.msra.gmra.mxu3 %vm3097_vm5, %v3563_v51  ;;  %7728 = vmatmul.msk.bf16.vlgmr.msra.gmra.mxu0 %vm3097_vm5, %v3563_v51 }
 0x451   :  { %7735 = vmatmul.msk.bf16.vlgmr.msrb.gmra.mxu2 %vm3097_vm5, %v3563_v51  ;;  %7742 = vmatmul.msk.bf16.vlgmr.msra.gmra.mxu1 %vm3097_vm5, %v3563_v51 }
 0x452   :  { %3784 = vmatpush.bf16.msra.mxu3 %v3775_v14  ;;  %3809 = vmatpush.bf16.msra.mxu0 %v3800_v16  ;;  %v4073_v16 = vand.u32 %v4062_v11, %v11294_v61 }
 0x453   :  { %3834 = vmatpush.bf16.msrb.mxu2 %v3825_v19  ;;  %3859 = vmatpush.bf16.msra.mxu1 %v3850_v20  ;;  %v3894_v20 = vld [vmem:[%s11472_s3 + $0x8] sm:$0xff] }
 0x4cd   :  { %v3606_v21 = vpop.f32.mrf.mxu0 }
 0x4ce   :  { %v3652_v23 = vpop.f32.mrf.mxu1 }
 0x4d3   :  { %v3584_v25 = vpop.f32.mrf.mxu3 }
 0x4d4   :  { %v3610_v28 = vmax.f32 %v3584_v25, %v3606_v21  ;;  %v3629_v29 = vpop.f32.mrf.mxu2  ;;  %v7825_v21 = vld [vmem:[#allocation9 + $0x20] sm:$0xf]  ;;  %v8910_v25 = vld [vmem:[#allocation9 + $0x24] sm:$0xf] }
 0x4d5   :  { %v3608_v30 = vpop.f32.mrf.mxu0 }
 0x4d6   :  { %v3633_v31 = vmax.f32 %v3610_v28, %v3629_v29  ;;  %v3654_v32 = vpop.f32.mrf.mxu1  ;;  %v7851_v28 = vld [vmem:[#allocation9 + $0x58] sm:$0xf]  ;;  %v8917_v29 = vld [vmem:[#allocation9 + $0x5c] sm:$0xf0]  ;;  %v7830_v30 = vor.u32 %v8910_v25, %v7827_v27  ;;  %v7871_v27 = vld [vmem:[#allocation9 + $0x88] sm:$0xf0] }
 0x4d7   :  { %v8916_v32 = vld [vmem:[#allocation9 + $0x5c] sm:$0xf] }
 0x4d8   :  { %v3656_v34 = vmax.f32 %v3633_v31, %v3652_v23  ;;  %v8911_v23 = vld [vmem:[#allocation9 + $0x24] sm:$0xf0]  ;;  %v7852_v31 = vor.u32 %v8917_v29, %v7851_v28  ;;  %v7895_v28 = vld [vmem:[#allocation9 + $0xb8] sm:$0xf]  ;;  %v8927_v29 = vld [vmem:[#allocation9 + $0xbc] sm:$0xf0] }
 0x4d9   :  { %v7826_v26 = vor.u32 %v8911_v23, %v7825_v21  ;;  %v8921_v21 = vld [vmem:[#allocation9 + $0x84] sm:$0xf0] }
 0x4da   :  { %v3657_v35 = vpack.c.bf16 %v3656_v34, %v3656_v34  ;;  %v7817_v34 = vld [vmem:[#allocation9 + $0x10] sm:$0xf] }
 0x4db   :  { %v3586_v37 = vpop.f32.mrf.mxu3 }
 0x4dc   :  { %v3631_v38 = vpop.f32.mrf.mxu2  ;;  %7747 = vmatmul.msk.bf16.vlgmr.msrb.gmra.mxu3 %vm3665_vm9, %v3657_v35  ;;  %7754 = vmatmul.msk.bf16.vlgmr.msrb.gmra.mxu0 %vm3665_vm9, %v3657_v35  ;;  %v8908_v37 = vld [vmem:[#allocation9 + $0x14] sm:$0xf] }
 0x4dd   :  { %7761 = vmatmul.msk.bf16.vlgmr.msra.gmra.mxu2 %vm3665_vm9, %v3657_v35  ;;  %7768 = vmatmul.msk.bf16.vlgmr.msrb.gmra.mxu1 %vm3665_vm9, %v3657_v35  ;;  %v7819_v38 = vld [vmem:[#allocation9 + $0x18] sm:$0xf0] }
 0x4de   :  { %3884 = vmatpush.bf16.msrb.mxu3 %v3875_v36  ;;  %7804 = vmatpush.msk.msrb.mxu0 %vm2354_vm1, %v3904_v46  ;;  %v8909_v36 = vld [vmem:[#allocation9 + $0x14] sm:$0xf0]  ;;  %v7845_v46 = vld [vmem:[#allocation9 + $0x50] sm:$0xf0] }
 0x4df   :  { %3997 = vmatpush.bf16.msra.mxu2 %v3988_v63  ;;  %4011 = vmatpush.bf16.msrb.mxu1 %v3991_v8  ;;  %v4143_v63 = vpack.c.b16 %v4135_v60, %v4135_v60  ;;  %v4223_v8 = vpack.c.b16 %v4215_v62, %v4215_v62 }
 0x4e1   :  { %v4232_v11 = vand.u32 %v4223_v8, %v11294_v61 }
 0x4e3   :  { %3998 = vmatpush.bf16.msra.mxu2 %v7826_v26  ;;  %4012 = vmatpush.bf16.msrb.mxu1 %v7830_v30  ;;  %v8920_v26 = vld [vmem:[#allocation9 + $0x84] sm:$0xf]  ;;  %v8926_v30 = vld [vmem:[#allocation9 + $0xbc] sm:$0xf] }
 0x4ec   :  { %7775 = vmatmul.msk.bf16.vlgmr.msra.gmra.mxu3 %vm3665_vm9, %v3657_v35  ;;  %7782 = vmatmul.msk.bf16.vlgmr.msra.gmra.mxu0 %vm3665_vm9, %v3657_v35 }
 0x4ed   :  { %7789 = vmatmul.msk.bf16.vlgmr.msrb.gmra.mxu2 %vm3665_vm9, %v3657_v35  ;;  %7796 = vmatmul.msk.bf16.vlgmr.msra.gmra.mxu1 %vm3665_vm9, %v3657_v35 }
 0x4ee   :  { %4079 = vmatpush.bf16.msra.mxu3 %v4070_v9  ;;  %v4224_v9 = vpack.c.b16 %v4216_v24, %v4216_v24 }
 0x4f2   :  { %4080 = vmatpush.bf16.msra.mxu3 %v7852_v31  ;;  %v7897_v31 = vld [vmem:[#allocation9 + $0xc0] sm:$0xf0] }
 0x4fc   :  { %7803 = vmatmul.msk.bf16.vlgmr.msrb.gmra.mxu3 %vm3665_vm9, %v3657_v35  ;;  %v7856_v35 = vor.u32 %v8916_v32, %v7853_v33  ;;  %v7874_v33 = vor.u32 %v8920_v26, %v7871_v27  ;;  %v7949_v26 = vld [vmem:[#allocation9 + $0x130] sm:$0xf0]  ;;  %v4519_v27 = vld [vmem:[#allocation9 + $0x1b8] sm:$0x11] }
 0x559   :  { %v3711_v40 = vpop.f32.mrf.mxu0 }
 0x55a   :  { %3715 = vst.msk [vmem:[#allocation4 + $0x8] sm:$0xff] %vm3689_vm10, %v3711_v40  ;;  %v3761_v41 = vpop.f32.mrf.mxu1  ;;  %v7818_v40 = vor.u32 %v8909_v36, %v7817_v34  ;;  %v7861_v34 = vld [vmem:[#allocation9 + $0x70] sm:$0xf]  ;;  %v7896_v36 = vor.u32 %v8927_v29, %v7895_v28  ;;  %v7913_v28 = vld [vmem:[#allocation9 + $0xe0] sm:$0xf] }
 0x55b   :  { %3765 = vst.msk [vmem:[#allocation4 + $0x18] sm:$0xff] %vm3689_vm10, %v3761_v41  ;;  %v7822_v41 = vor.u32 %v8908_v37, %v7819_v38  ;;  %v7900_v37 = vor.u32 %v8926_v30, %v7897_v31  ;;  %v8918_v38 = vld [vmem:[#allocation9 + $0x74] sm:$0xf]  ;;  %v8931_v31 = vld [vmem:[#allocation9 + $0xe4] sm:$0xf0] }
 0x55c   :  { %3999 = vmatpush.bf16.msra.mxu2 %v7818_v40  ;;  %v7863_v40 = vld [vmem:[#allocation9 + $0x78] sm:$0xf0] }
 0x55d   :  { %4013 = vmatpush.bf16.msrb.mxu1 %v7822_v41  ;;  %v7887_v41 = vld [vmem:[#allocation9 + $0xa8] sm:$0xf] }
 0x55f   :  { %v3685_v42 = vpop.f32.mrf.mxu3 }
 0x560   :  { %3690 = vst.msk [vmem:[#allocation4] sm:$0xff] %vm3689_vm10, %v3685_v42  ;;  %v3736_v43 = vpop.f32.mrf.mxu2  ;;  %v7843_v42 = vld [vmem:[#allocation9 + $0x48] sm:$0xf] }
 0x561   :  { %3740 = vst.msk [vmem:[#allocation4 + $0x10] sm:$0xff] %vm3689_vm10, %v3736_v43  ;;  %v3713_v44 = vpop.f32.mrf.mxu0  ;;  %v3896_v14 = vld [vmem:[#allocation4 + $0x8] sm:$0xff]  ;;  %v8915_v43 = vld [vmem:[#allocation9 + $0x4c] sm:$0xf0] }
 0x562   :  { %v3763_v45 = vpop.f32.mrf.mxu1  ;;  %v3898_v10 = vld [vmem:[#allocation4 + $0x18] sm:$0xff] }
 0x563   :  { %v8914_v44 = vld [vmem:[#allocation9 + $0x4c] sm:$0xf]  ;;  %v7844_v45 = vor.u32 %v8915_v43, %v7843_v42  ;;  %v8925_v42 = vld [vmem:[#allocation9 + $0xac] sm:$0xf0] }
 0x564   :  { %v8924_v43 = vld [vmem:[#allocation9 + $0xac] sm:$0xf] }
 0x565   :  { %4081 = vmatpush.bf16.msra.mxu3 %v7844_v45 }
 0x567   :  { %v3687_v47 = vpop.f32.mrf.mxu3  ;;  %v3895_v19 = vld [vmem:[#allocation4] sm:$0xff] }
 0x568   :  { %v3738_v48 = vpop.f32.mrf.mxu2  ;;  %v3897_v13 = vld [vmem:[#allocation4 + $0x10] sm:$0xff]  ;;  %v7848_v47 = vor.u32 %v8914_v44, %v7845_v46  ;;  %v7889_v44 = vld [vmem:[#allocation9 + $0xb0] sm:$0xf0]  ;;  %v7866_v46 = vor.u32 %v8918_v38, %v7863_v40  ;;  %v7939_v38 = vld [vmem:[#allocation9 + $0x118] sm:$0xf] }
 0x569   :  { %v3811_v49 = vpop.f32.mrf.mxu0  ;;  %v7809_v48 = vld [vmem:[#allocation9] sm:$0xf] }
 0x56a   :  { %3815 = vst.msk [vmem:[#allocation4 + $0x28] sm:$0xff] %vm3689_vm10, %v3811_v49  ;;  %v3861_v51 = vpop.f32.mrf.mxu1  ;;  %v8907_v49 = vld [vmem:[#allocation9 + $0x4] sm:$0xf0]  ;;  %v8937_v40 = vld [vmem:[#allocation9 + $0x11c] sm:$0xf0] }
 0x56b   :  { %3865 = vst.msk [vmem:[#allocation4 + $0x38] sm:$0xff] %vm3689_vm10, %v3861_v51  ;;  %v8906_v51 = vld [vmem:[#allocation9 + $0x4] sm:$0xf] }
 0x56f   :  { %v3786_v52 = vpop.f32.mrf.mxu3 }
 0x570   :  { %3790 = vst.msk [vmem:[#allocation4 + $0x20] sm:$0xff] %vm3689_vm10, %v3786_v52  ;;  %v3836_v50 = vpop.f32.mrf.mxu2  ;;  %v7810_v52 = vor.u32 %v8907_v49, %v7809_v48  ;;  %v7892_v48 = vor.u32 %v8924_v43, %v7889_v44  ;;  %v8936_v43 = vld [vmem:[#allocation9 + $0x11c] sm:$0xf]  ;;  %v7941_v44 = vld [vmem:[#allocation9 + $0x120] sm:$0xf0] }
 0x571   :  { %3840 = vst.msk [vmem:[#allocation4 + $0x30] sm:$0xff] %vm3689_vm10, %v3836_v50  ;;  %v3813_v54 = vpop.f32.mrf.mxu0  ;;  %v3900_v5 = vld [vmem:[#allocation4 + $0x28] sm:$0xff]  ;;  %v7811_v50 = vld [vmem:[#allocation9 + $0x8] sm:$0xf0] }
 0x572   :  { %v3863_v56 = vpop.f32.mrf.mxu1  ;;  %v3902_v2 = vld [vmem:[#allocation4 + $0x38] sm:$0xff]  ;;  %v7835_v54 = vld [vmem:[#allocation9 + $0x38] sm:$0xf]  ;;  %4000 = vmatpush.bf16.msra.mxu2 %v7810_v52 }
 0x573   :  { %v8913_v56 = vld [vmem:[#allocation9 + $0x3c] sm:$0xf0]  ;;  %v4357_v52 = vld [vmem:[#allocation9 + $0x148] sm:$0x11] }
 0x577   :  { %v3788_v55 = vpop.f32.mrf.mxu3  ;;  %v3899_v7 = vld [vmem:[#allocation4 + $0x20] sm:$0xff] }
 0x578   :  { %v3838_v57 = vpop.f32.mrf.mxu2  ;;  %v3901_v3 = vld [vmem:[#allocation4 + $0x30] sm:$0xff]  ;;  %v7814_v55 = vor.u32 %v8906_v51, %v7811_v50  ;;  %v4276_v51 = vld [vmem:[#allocation9 + $0x110] sm:$0x11] }
 0x579   :  { %v7836_v57 = vor.u32 %v8913_v56, %v7835_v54  ;;  %v4296_v50 = vunpack.c.l.b16 %v4276_v51  ;;  %v4297_v54 = vunpack.c.h.b16 %v4276_v51  ;;  %v4377_v56 = vunpack.c.l.b16 %v4357_v52 }
 0x57a   :  { %4014 = vmatpush.bf16.msrb.mxu1 %v7814_v55  ;;  %v4378_v55 = vunpack.c.h.b16 %v4357_v52  ;;  %v7944_v51 = vor.u32 %v8936_v43, %v7941_v44  ;;  %v8035_v43 = vld [vmem:[#allocation9 + $0x1e8] sm:$0xf0] }
 0x57b   :  { %4082 = vmatpush.bf16.msra.mxu3 %v7836_v57  ;;  %v4304_v57 = vpack.c.b16 %v4296_v50, %v4296_v50  ;;  %v4385_v58 = vpack.c.b16 %v4377_v56, %v4377_v56 }
 0x57d   :  { %v4313_v62 = vand.u32 %v4304_v57, %v11294_v61  ;;  %v4394_v8 = vand.u32 %v4385_v58, %v11294_v61  ;;  %v8947_v57 = vld [vmem:[#allocation9 + $0x174] sm:$0xf0]  ;;  %v8946_v58 = vld [vmem:[#allocation9 + $0x174] sm:$0xf] }
 0x57f   :  { %v3886_v22 = vpop.f32.mrf.mxu3  ;;  %4241 = vmatpush.bf16.msrb.mxu3 %v4232_v11 }
 0x580   :  { %3890 = vst.msk [vmem:[#allocation4 + $0x40] sm:$0xff] %vm3689_vm10, %v3886_v22  ;;  %v8912_v22 = vld [vmem:[#allocation9 + $0x3c] sm:$0xf] }
 0x581   :  { %v7840_v59 = vor.u32 %v8912_v22, %v7837_v4  ;;  %v4305_v22 = vpack.c.b16 %v4297_v54, %v4297_v54 }
 0x583   :  { %v4316_v24 = vand.u32 %v4305_v22, %v11294_v61 }
 0x587   :  { %v3888_v0 = vpop.f32.mrf.mxu3  ;;  %v3903_v1 = vld [vmem:[#allocation4 + $0x40] sm:$0xff] }
 0x588   :  { %3921 = vmatpush.msrb.mxu0 %v3903_v1  ;;  %v7877_v0 = vld [vmem:[#allocation9 + $0x90] sm:$0xf]  ;;  %v8923_v1 = vld [vmem:[#allocation9 + $0x94] sm:$0xf0] }
 0x58a   :  { %3922 = vmatpush.msrb.mxu0 %v3902_v2  ;;  %v8922_v2 = vld [vmem:[#allocation9 + $0x94] sm:$0xf] }
 0x58c   :  { %3923 = vmatpush.msrb.mxu0 %v3901_v3  ;;  %v4151_v3 = vand.u32 %v4142_v39, %v11294_v61  ;;  %v7929_v39 = vld [vmem:[#allocation9 + $0x100] sm:$0xf] }
 0x58e   :  { %3924 = vmatpush.msrb.mxu0 %v3900_v5  ;;  %v4154_v5 = vand.u32 %v4143_v63, %v11294_v61  ;;  %4160 = vmatpush.bf16.msrb.mxu2 %v4151_v3  ;;  %v8935_v63 = vld [vmem:[#allocation9 + $0x104] sm:$0xf0]  ;;  %v8941_v3 = vld [vmem:[#allocation9 + $0x13c] sm:$0xf0] }
 0x590   :  { %3925 = vmatpush.msrb.mxu0 %v3899_v7  ;;  %v7903_v7 = vld [vmem:[#allocation9 + $0xc8] sm:$0xf]  ;;  %4174 = vmatpush.bf16.msra.mxu1 %v4154_v5  ;;  %v8940_v5 = vld [vmem:[#allocation9 + $0x13c] sm:$0xf] }
 0x592   :  { %3926 = vmatpush.msrb.mxu0 %v3898_v10  ;;  %v8929_v10 = vld [vmem:[#allocation9 + $0xcc] sm:$0xf0] }
 0x593   :  { %v7904_v23 = vor.u32 %v8929_v10, %v7903_v7  ;;  %v7921_v7 = vld [vmem:[#allocation9 + $0xf0] sm:$0xf]  ;;  %v7930_v10 = vor.u32 %v8935_v63, %v7929_v39 }
 0x594   :  { %3927 = vmatpush.msrb.mxu0 %v3897_v13  ;;  %v4235_v13 = vand.u32 %v4224_v9, %v11294_v61 }
 0x595   :  { %4242 = vmatpush.bf16.msrb.mxu3 %v7904_v23  ;;  %v4438_v23 = vld [vmem:[#allocation9 + $0x180] sm:$0x11] }
 0x596   :  { %3928 = vmatpush.msrb.mxu0 %v3896_v14  ;;  %v8928_v14 = vld [vmem:[#allocation9 + $0xcc] sm:$0xf] }
 0x598   :  { %3929 = vmatpush.msrb.mxu0 %v3895_v19  ;;  %v7882_v19 = vor.u32 %v8922_v2, %v7879_v6  ;;  %v7955_v2 = vld [vmem:[#allocation9 + $0x138] sm:$0xf]  ;;  %v7957_v6 = vld [vmem:[#allocation9 + $0x140] sm:$0xf0] }
 0x599   :  { %7805 = vmatmul.msk.f32.vlgmr.msrb.gmra.mxu0 %vm2347_vm2, %v3893_v15  ;;  %v7905_v15 = vld [vmem:[#allocation9 + $0xd0] sm:$0xf0]  ;;  %4243 = vmatpush.bf16.msrb.mxu3 %v7896_v36 }
 0x59a   :  { %4093 = vmatpush.bf16.msra.mxu0 %v4073_v16  ;;  %v7878_v16 = vor.u32 %v8923_v1, %v7877_v0  ;;  %v7908_v25 = vor.u32 %v8928_v14, %v7905_v15  ;;  %4175 = vmatpush.bf16.msra.mxu1 %v7882_v19  ;;  %v8934_v0 = vld [vmem:[#allocation9 + $0x104] sm:$0xf]  ;;  %v7931_v1 = vld [vmem:[#allocation9 + $0x108] sm:$0xf0]  ;;  %v8932_v14 = vld [vmem:[#allocation9 + $0xf4] sm:$0xf]  ;;  %v7960_v19 = vor.u32 %v8940_v5, %v7957_v6 }
 0x59b   :  { %v7934_v11 = vor.u32 %v8934_v0, %v7931_v1  ;;  %v7923_v15 = vld [vmem:[#allocation9 + $0xf8] sm:$0xf0]  ;;  %v8944_v0 = vld [vmem:[#allocation9 + $0x164] sm:$0xf]  ;;  %v7999_v5 = vld [vmem:[#allocation9 + $0x198] sm:$0xf] }
 0x59c   :  { %4161 = vmatpush.bf16.msrb.mxu2 %v7878_v16  ;;  %v7956_v16 = vor.u32 %v8941_v3, %v7955_v2  ;;  %v7926_v30 = vor.u32 %v8932_v14, %v7923_v15  ;;  %v7975_v3 = vld [vmem:[#allocation9 + $0x168] sm:$0xf0]  ;;  %v4600_v6 = vld [vmem:[#allocation9 + $0x1f0] sm:$0x11] }
 0x59d   :  { %v7978_v14 = vor.u32 %v8944_v0, %v7975_v3  ;;  %v7965_v15 = vld [vmem:[#allocation9 + $0x150] sm:$0xf] }
 0x59e   :  { %4094 = vmatpush.bf16.msra.mxu0 %v7856_v35  ;;  %v8919_v35 = vld [vmem:[#allocation9 + $0x74] sm:$0xf0]  ;;  %4176 = vmatpush.bf16.msra.mxu1 %v7874_v33  ;;  %v7915_v33 = vld [vmem:[#allocation9 + $0xe8] sm:$0xf0] }
 0x59f   :  { %v7862_v45 = vor.u32 %v8919_v35, %v7861_v34  ;;  %v4458_v34 = vunpack.c.l.b16 %v4438_v23  ;;  %v4459_v35 = vunpack.c.h.b16 %v4438_v23 }
 0x5a1   :  { %7806 = vmatmul.msk.f32.gmra.mxu0 %vm2347_vm2, %v3894_v20  ;;  %v7869_v20 = vld [vmem:[#allocation9 + $0x80] sm:$0xf] }
 0x5a2   :  { %4095 = vmatpush.bf16.msra.mxu0 %v7848_v47  ;;  %v7870_v32 = vor.u32 %v8921_v21, %v7869_v20  ;;  %v7888_v47 = vor.u32 %v8925_v42, %v7887_v41  ;;  %4177 = vmatpush.bf16.msra.mxu1 %v7866_v46  ;;  %v7947_v20 = vld [vmem:[#allocation9 + $0x128] sm:$0xf]  ;;  %v8939_v21 = vld [vmem:[#allocation9 + $0x12c] sm:$0xf0]  ;;  %v4539_v41 = vunpack.c.l.b16 %v4519_v27  ;;  %v4540_v42 = vunpack.c.h.b16 %v4519_v27 }
 0x5a3   :  { %v7948_v36 = vor.u32 %v8939_v21, %v7947_v20  ;;  %v4621_v20 = vunpack.c.h.b16 %v4600_v6  ;;  %v7991_v27 = vld [vmem:[#allocation9 + $0x188] sm:$0xf] }
 0x5a4   :  { %4162 = vmatpush.bf16.msrb.mxu2 %v7870_v32  ;;  %4244 = vmatpush.bf16.msrb.mxu3 %v7888_v47  ;;  %v8930_v32 = vld [vmem:[#allocation9 + $0xe4] sm:$0xf]  ;;  %v7940_v47 = vor.u32 %v8937_v40, %v7939_v38  ;;  %v4547_v52 = vpack.c.b16 %v4539_v41, %v4539_v41  ;;  %v4548_v50 = vpack.c.b16 %v4540_v42, %v4540_v42  ;;  %v8033_v40 = vld [vmem:[#allocation9 + $0x1e0] sm:$0xf]  ;;  %v8959_v41 = vld [vmem:[#allocation9 + $0x1e4] sm:$0xf0] }
 0x5a5   :  { %v7918_v46 = vor.u32 %v8930_v32, %v7915_v33  ;;  %v8958_v42 = vld [vmem:[#allocation9 + $0x1e4] sm:$0xf]  ;;  %v8034_v44 = vor.u32 %v8959_v41, %v8033_v40 }
 0x5a6   :  { %4096 = vmatpush.bf16.msra.mxu0 %v7840_v59  ;;  %v4386_v59 = vpack.c.b16 %v4378_v55, %v4378_v55  ;;  %v7981_v55 = vld [vmem:[#allocation9 + $0x170] sm:$0xf]  ;;  %v4556_v22 = vand.u32 %v4547_v52, %v11294_v61 }
 0x5a7   :  { %v7982_v39 = vor.u32 %v8947_v57, %v7981_v55  ;;  %v8019_v55 = vld [vmem:[#allocation9 + $0x1c8] sm:$0xf0] }
 0x5a8   :  { %4163 = vmatpush.bf16.msrb.mxu2 %v7862_v45  ;;  %v4397_v9 = vand.u32 %v4386_v59, %v11294_v61  ;;  %v7914_v45 = vor.u32 %v8931_v31, %v7913_v28  ;;  %v7983_v59 = vld [vmem:[#allocation9 + $0x178] sm:$0xf0]  ;;  %v8949_v28 = vld [vmem:[#allocation9 + $0x18c] sm:$0xf0] }
 0x5a9   :  { %v7986_v63 = vor.u32 %v8946_v58, %v7983_v59 }
 0x5aa   :  { %4255 = vmatpush.bf16.msrb.mxu0 %v4235_v13  ;;  %v8933_v13 = vld [vmem:[#allocation9 + $0xf4] sm:$0xf0] }
 0x5ab   :  { %v7922_v29 = vor.u32 %v8933_v13, %v7921_v7  ;;  %v8951_v7 = vld [vmem:[#allocation9 + $0x19c] sm:$0xf0] }
 0x5ac   :  { %v8000_v21 = vor.u32 %v8951_v7, %v7999_v5 }
 0x5ae   :  { %4256 = vmatpush.bf16.msrb.mxu0 %v7908_v25  ;;  %v8938_v25 = vld [vmem:[#allocation9 + $0x12c] sm:$0xf] }
 0x5b2   :  { %4257 = vmatpush.bf16.msrb.mxu0 %v7900_v37  ;;  %v7952_v37 = vor.u32 %v8938_v25, %v7949_v26  ;;  %v8942_v25 = vld [vmem:[#allocation9 + $0x154] sm:$0xf]  ;;  %v7967_v26 = vld [vmem:[#allocation9 + $0x158] sm:$0xf0] }
 0x5b3   :  { %v7970_v32 = vor.u32 %v8942_v25, %v7967_v26 }
 0x5b6   :  { %4258 = vmatpush.bf16.msrb.mxu0 %v7892_v48  ;;  %v4466_v48 = vpack.c.b16 %v4458_v34, %v4458_v34  ;;  %v4629_v34 = vpack.c.b16 %v4621_v20, %v4621_v20 }
 0x5b8   :  { %v4475_v54 = vand.u32 %v4466_v48, %v11294_v61  ;;  %v4640_v38 = vand.u32 %v4629_v34, %v11294_v61  ;;  %v8956_v48 = vld [vmem:[#allocation9 + $0x1d4] sm:$0xf] }
 0x616   :  { %v3931_v49 = vpop.f32.mrf.mxu0 }
 0x617   :  { %v3937_v53 = vmax.f32 %v3931_v49, 0.0  ;;  %v4467_v49 = vpack.c.b16 %v4459_v35, %v4459_v35  ;;  %v7992_v35 = vor.u32 %v8949_v28, %v7991_v27 }
 0x619   :  { %v4478_v56 = vand.u32 %v4467_v49, %v11294_v61  ;;  %v8027_v49 = vld [vmem:[#allocation9 + $0x1d8] sm:$0xf0] }
 0x61a   :  { %v8030_v52 = vor.u32 %v8956_v48, %v8027_v49 }
 0x61e   :  { %v3934_v4 = vpop.f32.mrf.mxu0 }
 0x61f   :  { %v3938_v60 = vmax.f32 %v3934_v4, 0.0  ;;  %v4559_v4 = vand.u32 %v4548_v50, %v11294_v61  ;;  %v8017_v50 = vld [vmem:[#allocation9 + $0x1c0] sm:$0xf] }
 0x621   :  { %v11312_v12 = vpack.c.bf16 %v3938_v60, %v3937_v53  ;;  %v8007_v53 = vld [vmem:[#allocation9 + $0x1a8] sm:$0xf]  ;;  %v8953_v60 = vld [vmem:[#allocation9 + $0x1ac] sm:$0xf0] }
 0x622   :  { %v8008_v1 = vor.u32 %v8953_v60, %v8007_v53 }
 0x623   :  { %7831 = vmatmul.msk.bf16.vlgmr.msra.gmra.mxu2 %vm3689_vm10, %v11312_v12  ;;  %7832 = vmatmul.msk.bf16.vlgmr.msrb.gmra.mxu1 %vm3689_vm10, %v11312_v12 }
 0x624   :  { %7857 = vmatmul.msk.bf16.vlgmr.msra.gmra.mxu3 %vm3689_vm10, %v11312_v12  ;;  %7858 = vmatmul.msk.bf16.vlgmr.msra.gmra.mxu0 %vm3689_vm10, %v11312_v12 }
 0x625   :  { %4322 = vmatpush.bf16.msra.mxu2 %v4313_v62  ;;  %4336 = vmatpush.bf16.msrb.mxu1 %v4316_v24  ;;  %v8952_v62 = vld [vmem:[#allocation9 + $0x1ac] sm:$0xf]  ;;  %v8009_v24 = vld [vmem:[#allocation9 + $0x1b0] sm:$0xf0] }
 0x626   :  { %4403 = vmatpush.bf16.msra.mxu3 %v4394_v8  ;;  %4417 = vmatpush.bf16.msra.mxu0 %v4397_v9  ;;  %v7973_v8 = vld [vmem:[#allocation9 + $0x160] sm:$0xf]  ;;  %v8945_v9 = vld [vmem:[#allocation9 + $0x164] sm:$0xf0]  ;;  %v8012_v2 = vor.u32 %v8952_v62, %v8009_v24 }
 0x627   :  { %v7974_v13 = vor.u32 %v8945_v9, %v7973_v8 }
 0x629   :  { %4323 = vmatpush.bf16.msra.mxu2 %v7930_v10  ;;  %4337 = vmatpush.bf16.msrb.mxu1 %v7934_v11  ;;  %v8950_v10 = vld [vmem:[#allocation9 + $0x19c] sm:$0xf]  ;;  %v8001_v11 = vld [vmem:[#allocation9 + $0x1a0] sm:$0xf0] }
 0x62a   :  { %4404 = vmatpush.bf16.msra.mxu3 %v7956_v16  ;;  %4418 = vmatpush.bf16.msra.mxu0 %v7960_v19  ;;  %v8943_v16 = vld [vmem:[#allocation9 + $0x154] sm:$0xf0]  ;;  %v4620_v19 = vunpack.c.l.b16 %v4600_v6  ;;  %v8004_v23 = vor.u32 %v8950_v10, %v8001_v11 }
 0x62b   :  { %v7966_v31 = vor.u32 %v8943_v16, %v7965_v15 }
 0x62c   :  { %v4628_v33 = vpack.c.b16 %v4620_v19, %v4620_v19  ;;  %v4718_v19 = vld [vmem:[#allocation5 + $0x128] sm:$0x1] }
 0x62d   :  { %4324 = vmatpush.bf16.msra.mxu2 %v7922_v29  ;;  %4338 = vmatpush.bf16.msrb.mxu1 %v7926_v30  ;;  %v8948_v29 = vld [vmem:[#allocation9 + $0x18c] sm:$0xf]  ;;  %v7993_v30 = vld [vmem:[#allocation9 + $0x190] sm:$0xf0] }
 0x62e   :  { %4405 = vmatpush.bf16.msra.mxu3 %v7948_v36  ;;  %4419 = vmatpush.bf16.msra.mxu0 %v7952_v37  ;;  %v7996_v36 = vor.u32 %v8948_v29, %v7993_v30  ;;  %v4637_v37 = vand.u32 %v4628_v33, %v11294_v61 }
 0x631   :  { %4325 = vmatpush.bf16.msra.mxu2 %v7914_v45  ;;  %4339 = vmatpush.bf16.msrb.mxu1 %v7918_v46  ;;  %v8038_v45 = vor.u32 %v8958_v42, %v8035_v43  ;;  %v8025_v46 = vld [vmem:[#allocation9 + $0x1d0] sm:$0xf]  ;;  %v8103_v42 = vld [vmem:[#allocation11 + $0x70] sm:$0xf] }
 0x632   :  { %4406 = vmatpush.bf16.msra.mxu3 %v7940_v47  ;;  %4420 = vmatpush.bf16.msra.mxu0 %v7944_v51  ;;  %v8957_v47 = vld [vmem:[#allocation9 + $0x1d4] sm:$0xf0]  ;;  %v8975_v43 = vld [vmem:[#allocation11 + $0x74] sm:$0xf0] }
 0x633   :  { %7883 = vmatmul.msk.bf16.vlgmr.msrb.gmra.mxu2 %vm3689_vm10, %v11312_v12  ;;  %7884 = vmatmul.msk.bf16.vlgmr.msra.gmra.mxu1 %vm3689_vm10, %v11312_v12  ;;  %v8026_v51 = vor.u32 %v8957_v47, %v8025_v46  ;;  %v4680_v47 = vld [vmem:[%s11473_s4 + $0x8] sm:$0xff]  ;;  %v8104_v49 = vor.u32 %v8975_v43, %v8103_v42  ;;  %v8979_v42 = vld [vmem:[#allocation11 + $0x94] sm:$0xf0] }
 0x634   :  { %7909 = vmatmul.msk.bf16.vlgmr.msrb.gmra.mxu3 %vm3689_vm10, %v11312_v12  ;;  %7910 = vmatmul.msk.bf16.vlgmr.msrb.gmra.mxu0 %vm3689_vm10, %v11312_v12 }
 0x635   :  { %4484 = vmatpush.bf16.msrb.mxu2 %v4475_v54  ;;  %4498 = vmatpush.bf16.msra.mxu1 %v4478_v56  ;;  %v8955_v54 = vld [vmem:[#allocation9 + $0x1c4] sm:$0xf0]  ;;  %v8954_v56 = vld [vmem:[#allocation9 + $0x1c4] sm:$0xf] }
 0x636   :  { %4565 = vmatpush.bf16.msrb.mxu3 %v4556_v22  ;;  %4579 = vmatpush.bf16.msrb.mxu0 %v4559_v4  ;;  %v8018_v57 = vor.u32 %v8955_v54, %v8017_v50  ;;  %v8022_v22 = vor.u32 %v8954_v56, %v8019_v55  ;;  %v8973_v50 = vld [vmem:[#allocation11 + $0x64] sm:$0xf0]  ;;  %v8151_v55 = vld [vmem:[#allocation11 + $0xd0] sm:$0xf] }
 0x639   :  { %4485 = vmatpush.bf16.msrb.mxu2 %v7982_v39  ;;  %4499 = vmatpush.bf16.msra.mxu1 %v7986_v63 }
 0x63a   :  { %4566 = vmatpush.bf16.msrb.mxu3 %v8008_v1  ;;  %4580 = vmatpush.bf16.msrb.mxu0 %v8012_v2 }
 0x63d   :  { %4486 = vmatpush.bf16.msrb.mxu2 %v7974_v13  ;;  %4500 = vmatpush.bf16.msra.mxu1 %v7978_v14  ;;  %v4717_v14 = vld [vmem:[#allocation5 + $0x120] sm:$0x1] }
 0x63e   :  { %4567 = vmatpush.bf16.msrb.mxu3 %v8000_v21  ;;  %4581 = vmatpush.bf16.msrb.mxu0 %v8004_v23 }
 0x641   :  { %4487 = vmatpush.bf16.msrb.mxu2 %v7966_v31  ;;  %4501 = vmatpush.bf16.msra.mxu1 %v7970_v32 }
 0x642   :  { %4568 = vmatpush.bf16.msrb.mxu3 %v7992_v35  ;;  %4582 = vmatpush.bf16.msrb.mxu0 %v7996_v36  ;;  %v11397_v35 = vld [vmem:[#allocation11 + $0xe0] sm:$0x11] }
 0x643   :  { %7935 = vmatmul.msk.bf16.vlgmr.msra.gmra.mxu2 %vm3689_vm10, %v11312_v12  ;;  %7936 = vmatmul.msk.bf16.vlgmr.msrb.gmra.mxu1 %vm3689_vm10, %v11312_v12 }
 0x644   :  { %7961 = vmatmul.msk.bf16.vlgmr.msra.gmra.mxu3 %vm3689_vm10, %v11312_v12  ;;  %7962 = vmatmul.msk.bf16.vlgmr.msra.gmra.mxu0 %vm3689_vm10, %v11312_v12 }
 0x645   :  { %4646 = vmatpush.bf16.msra.mxu2 %v4637_v37  ;;  %4660 = vmatpush.bf16.msrb.mxu1 %v4640_v38  ;;  %v4926_v38 = vunpack.c.l.b16 %v11397_v35 }
 0x646   :  { %8041 = vmatpush.msk.msra.mxu0 %vm2354_vm1, %v4717_v14  ;;  %v8135_v14 = vld [vmem:[#allocation11 + $0xb0] sm:$0xf] }
 0x649   :  { %4647 = vmatpush.bf16.msra.mxu2 %v8034_v44  ;;  %4661 = vmatpush.bf16.msrb.mxu1 %v8038_v45  ;;  %v4956_v45 = vpack.c.b16 %v4926_v38, %v4926_v38 }
 0x64b   :  { %v4990_v56 = vand.u32 %v4956_v45, %v11294_v61  ;;  %v8081_v45 = vld [vmem:[#allocation11 + $0x48] sm:$0xf0] }
 0x64d   :  { %4648 = vmatpush.bf16.msra.mxu2 %v8026_v51  ;;  %4662 = vmatpush.bf16.msrb.mxu1 %v8030_v52  ;;  %v8095_v52 = vld [vmem:[#allocation11 + $0x60] sm:$0xf] }
 0x651   :  { %4649 = vmatpush.bf16.msra.mxu2 %v8018_v57  ;;  %4663 = vmatpush.bf16.msrb.mxu1 %v8022_v22  ;;  %v8987_v57 = vld [vmem:[#allocation11 + $0xd4] sm:$0xf0] }
 0x653   :  { %7987 = vmatmul.msk.bf16.vlgmr.msrb.gmra.mxu2 %vm3689_vm10, %v11312_v12  ;;  %7988 = vmatmul.msk.bf16.vlgmr.msra.gmra.mxu1 %vm3689_vm10, %v11312_v12 }
 0x654   :  { %8013 = vmatmul.msk.bf16.vlgmr.msrb.gmra.mxu3 %vm3689_vm10, %v11312_v12  ;;  %8014 = vmatmul.msk.bf16.vlgmr.msrb.gmra.mxu0 %vm3689_vm10, %v11312_v12 }
 0x655   :  { %8043 = vmatpush.msk.msra.mxu1 %vm2354_vm1, %v4718_v19  ;;  %v8972_v19 = vld [vmem:[#allocation11 + $0x64] sm:$0xf] }
 0x663   :  { %8039 = vmatmul.msk.bf16.vlgmr.msra.gmra.mxu2 %vm3689_vm10, %v11312_v12  ;;  %8040 = vmatmul.msk.bf16.vlgmr.msrb.gmra.mxu1 %vm3689_vm10, %v11312_v12 }
 0x6a0   :  { %v4016_v4 = vpop.f32.mrf.mxu1 }
 0x6a1   :  { %4023 = vst.msk [vmem:[#allocation5 + $0x8] sm:$0xff] %vm4022_vm12, %v4016_v4  ;;  %v4098_v58 = vpop.f32.mrf.mxu0  ;;  %v8096_v4 = vor.u32 %v8973_v50, %v8095_v52  ;;  %v8137_v52 = vld [vmem:[#allocation11 + $0xb8] sm:$0xf0] }
 0x6a2   :  { %4104 = vst.msk [vmem:[#allocation5 + $0x28] sm:$0xff] %vm4022_vm12, %v4098_v58  ;;  %v4927_v58 = vunpack.c.h.b16 %v11397_v35  ;;  %v8965_v35 = vld [vmem:[#allocation11 + $0x24] sm:$0xf0] }
 0x6a6   :  { %v11362_v59 = vpop.f32.mrf.mxu2 }
 0x6a7   :  { %v11364_v53 = vpop.f32.mrf.mxu3 }
 0x6a8   :  { %v4018_v60 = vpop.f32.mrf.mxu1 }
 0x6a9   :  { %4025 = vst.msk [vmem:[#allocation5 + $0x18] sm:$0xff] %vm4022_vm12, %v4018_v60  ;;  %v4100_v62 = vpop.f32.mrf.mxu0  ;;  %v8087_v60 = vld [vmem:[#allocation11 + $0x50] sm:$0xf] }
 0x6aa   :  { %4106 = vst.msk [vmem:[#allocation5 + $0x38] sm:$0xff] %vm4022_vm12, %v4100_v62  ;;  %v8971_v62 = vld [vmem:[#allocation11 + $0x54] sm:$0xf0] }
 0x6ae   :  { %v11368_v24 = vpop.f32.mrf.mxu2 }
 0x6af   :  { %v11370_v12 = vpop.f32.mrf.mxu3 }
 0x6b0   :  { %v4179_v39 = vpop.f32.mrf.mxu1 }
 0x6b1   :  { %4185 = vst.msk [vmem:[#allocation5 + $0x48] sm:$0xff] %vm4022_vm12, %v4179_v39  ;;  %v4260_v63 = vpop.f32.mrf.mxu0 }
 0x6b2   :  { %4266 = vst.msk [vmem:[#allocation5 + $0x68] sm:$0xff] %vm4022_vm12, %v4260_v63  ;;  %v8152_v63 = vor.u32 %v8987_v57, %v8151_v55  ;;  %v8977_v55 = vld [vmem:[#allocation11 + $0x84] sm:$0xf0] }
 0x6b6   :  { %v11374_v8 = vpop.f32.mrf.mxu2 }
 0x6b7   :  { %v11376_v9 = vpop.f32.mrf.mxu3 }
 0x6b8   :  { %v4181_v0 = vpop.f32.mrf.mxu1  ;;  %v4690_v39 = vld [vmem:[#allocation5 + $0x48] sm:$0xff] }
 0x6b9   :  { %4187 = vst.msk [vmem:[#allocation5 + $0x58] sm:$0xff] %vm4022_vm12, %v4181_v0  ;;  %v4262_v1 = vpop.f32.mrf.mxu0  ;;  %v4694_v54 = vld [vmem:[#allocation5 + $0x68] sm:$0xff]  ;;  %v8985_v0 = vld [vmem:[#allocation11 + $0xc4] sm:$0xf0] }
 0x6ba   :  { %4268 = vst.msk [vmem:[#allocation5 + $0x78] sm:$0xff] %vm4022_vm12, %v4262_v1  ;;  %v4688_v1 = vld [vmem:[#allocation5 + $0x38] sm:$0xff] }
 0x6be   :  { %v11380_v2 = vpop.f32.mrf.mxu2 }
 0x6bf   :  { %v11382_v3 = vpop.f32.mrf.mxu3 }
 0x6c0   :  { %v4341_v5 = vpop.f32.mrf.mxu1  ;;  %v4692_v22 = vld [vmem:[#allocation5 + $0x58] sm:$0xff] }
 0x6c1   :  { %4347 = vst.msk [vmem:[#allocation5 + $0x88] sm:$0xff] %vm4022_vm12, %v4341_v5  ;;  %v4422_v6 = vpop.f32.mrf.mxu0  ;;  %v4696_v48 = vld [vmem:[#allocation5 + $0x78] sm:$0xff]  ;;  %v8088_v5 = vor.u32 %v8971_v62, %v8087_v60 }
 0x6c2   :  { %4428 = vst.msk [vmem:[#allocation5 + $0xa8] sm:$0xff] %vm4022_vm12, %v4422_v6  ;;  %v8079_v6 = vld [vmem:[#allocation11 + $0x40] sm:$0xf]  ;;  %v8980_v62 = vld [vmem:[#allocation11 + $0xa4] sm:$0xf] }
 0x6c6   :  { %v4327_v7 = vpop.f32.mrf.mxu2 }
 0x6c7   :  { %v4408_v10 = vpop.f32.mrf.mxu3 }
 0x6c8   :  { %v4343_v11 = vpop.f32.mrf.mxu1  ;;  %v4698_v44 = vld [vmem:[#allocation5 + $0x88] sm:$0xff] }
 0x6c9   :  { %4349 = vst.msk [vmem:[#allocation5 + $0x98] sm:$0xff] %vm4022_vm12, %v4343_v11  ;;  %v4424_v13 = vpop.f32.mrf.mxu0  ;;  %v4702_v37 = vld [vmem:[#allocation5 + $0xa8] sm:$0xff] }
 0x6ca   :  { %4430 = vst.msk [vmem:[#allocation5 + $0xb8] sm:$0xff] %vm4022_vm12, %v4424_v13 }
 0x6ce   :  { %v4329_v15 = vpop.f32.mrf.mxu2 }
 0x6cf   :  { %v4410_v16 = vpop.f32.mrf.mxu3 }
 0x6d0   :  { %v4503_v20 = vpop.f32.mrf.mxu1  ;;  %v4700_v40 = vld [vmem:[#allocation5 + $0x98] sm:$0xff] }
 0x6d1   :  { %4509 = vst.msk [vmem:[#allocation5 + $0xc8] sm:$0xff] %vm4022_vm12, %v4503_v20  ;;  %v4584_v17 = vpop.f32.mrf.mxu0  ;;  %v4704_v36 = vld [vmem:[#allocation5 + $0xb8] sm:$0xff]  ;;  %v8097_v20 = vld [vmem:[#allocation11 + $0x68] sm:$0xf0] }
 0x6d2   :  { %4590 = vst.msk [vmem:[#allocation5 + $0xe8] sm:$0xff] %vm4022_vm12, %v4584_v17 }
 0x6d6   :  { %v4489_v18 = vpop.f32.mrf.mxu2 }
 0x6d7   :  { %v4570_v21 = vpop.f32.mrf.mxu3 }
 0x6d8   :  { %v4505_v23 = vpop.f32.mrf.mxu1  ;;  %v4706_v33 = vld [vmem:[#allocation5 + $0xc8] sm:$0xff] }
 0x6d9   :  { %4511 = vst.msk [vmem:[#allocation5 + $0xd8] sm:$0xff] %vm4022_vm12, %v4505_v23  ;;  %v4586_v25 = vpop.f32.mrf.mxu0  ;;  %v4710_v30 = vld [vmem:[#allocation5 + $0xe8] sm:$0xff] }
 0x6da   :  { %4592 = vst.msk [vmem:[#allocation5 + $0xf8] sm:$0xff] %vm4022_vm12, %v4586_v25  ;;  %v4682_v23 = vld [vmem:[#allocation5 + $0x8] sm:$0xff] }
 0x6db   :  { %v8986_v25 = vld [vmem:[#allocation11 + $0xd4] sm:$0xf] }
 0x6de   :  { %v4491_v26 = vpop.f32.mrf.mxu2 }
 0x6df   :  { %v4572_v27 = vpop.f32.mrf.mxu3 }
 0x6e0   :  { %v4665_v28 = vpop.f32.mrf.mxu1  ;;  %4728 = vmatpush.msra.mxu3 %v4572_v27  ;;  %v4708_v31 = vld [vmem:[#allocation5 + $0xd8] sm:$0xff]  ;;  %v8100_v27 = vor.u32 %v8972_v19, %v8097_v20  ;;  %v8209_v19 = vld [vmem:[#allocation11 + $0x148] sm:$0xf]  ;;  %v9001_v20 = vld [vmem:[#allocation11 + $0x14c] sm:$0xf0] }
 0x6e1   :  { %4671 = vst.msk [vmem:[#allocation5 + $0x108] sm:$0xff] %vm4022_vm12, %v4665_v28  ;;  %v4712_v29 = vld [vmem:[#allocation5 + $0xf8] sm:$0xff] }
 0x6e2   :  { %4768 = vmatpush.msrb.mxu2 %v4712_v29  ;;  %4729 = vmatpush.msra.mxu3 %v4570_v21  ;;  %v8967_v21 = vld [vmem:[#allocation11 + $0x34] sm:$0xf0]  ;;  %v8127_v28 = vld [vmem:[#allocation11 + $0xa0] sm:$0xf]  ;;  %v8981_v29 = vld [vmem:[#allocation11 + $0xa4] sm:$0xf0] }
 0x6e3   :  { %v8128_v38 = vor.u32 %v8981_v29, %v8127_v28  ;;  %v8113_v28 = vld [vmem:[#allocation11 + $0x88] sm:$0xf0] }
 0x6e4   :  { %4769 = vmatpush.msrb.mxu2 %v4710_v30  ;;  %4730 = vmatpush.msra.mxu3 %v4491_v26  ;;  %v8153_v26 = vld [vmem:[#allocation11 + $0xd8] sm:$0xf0]  ;;  %v8970_v30 = vld [vmem:[#allocation11 + $0x54] sm:$0xf] }
 0x6e6   :  { %4770 = vmatpush.msrb.mxu2 %v4708_v31  ;;  %v4651_v32 = vpop.f32.mrf.mxu2  ;;  %4731 = vmatpush.msra.mxu3 %v4489_v18  ;;  %v8071_v18 = vld [vmem:[#allocation11 + $0x30] sm:$0xf]  ;;  %v8089_v31 = vld [vmem:[#allocation11 + $0x58] sm:$0xf0] }
 0x6e8   :  { %4771 = vmatpush.msrb.mxu2 %v4706_v33  ;;  %v4667_v34 = vpop.f32.mrf.mxu1  ;;  %4732 = vmatpush.msra.mxu3 %v4410_v16  ;;  %v4714_v51 = vld [vmem:[#allocation5 + $0x108] sm:$0xff]  ;;  %v4684_v16 = vld [vmem:[#allocation5 + $0x18] sm:$0xff]  ;;  %v8156_v33 = vor.u32 %v8986_v25, %v8153_v26 }
 0x6e9   :  { %4673 = vst.msk [vmem:[#allocation5 + $0x118] sm:$0xff] %vm4022_vm12, %v4667_v34  ;;  %v8063_v34 = vld [vmem:[#allocation11 + $0x20] sm:$0xf]  ;;  %v9013_v25 = vld [vmem:[#allocation11 + $0x1ac] sm:$0xf0] }
 0x6ea   :  { %4772 = vmatpush.msrb.mxu2 %v4704_v36  ;;  %4733 = vmatpush.msra.mxu3 %v4408_v10  ;;  %v4686_v10 = vld [vmem:[#allocation5 + $0x28] sm:$0xff]  ;;  %v8984_v36 = vld [vmem:[#allocation11 + $0xc4] sm:$0xf] }
 0x6ec   :  { %4773 = vmatpush.msrb.mxu2 %v4702_v37  ;;  %4734 = vmatpush.msra.mxu3 %v4329_v15  ;;  %v8983_v15 = vld [vmem:[#allocation11 + $0xb4] sm:$0xf0]  ;;  %v8145_v37 = vld [vmem:[#allocation11 + $0xc8] sm:$0xf0] }
 0x6ee   :  { %4774 = vmatpush.msrb.mxu2 %v4700_v40  ;;  %v4653_v41 = vpop.f32.mrf.mxu2  ;;  %4735 = vmatpush.msra.mxu3 %v4327_v7  ;;  %v8969_v7 = vld [vmem:[#allocation11 + $0x44] sm:$0xf0]  ;;  %v8092_v40 = vor.u32 %v8970_v30, %v8089_v31  ;;  %v8201_v30 = vld [vmem:[#allocation11 + $0x138] sm:$0xf]  ;;  %v8999_v31 = vld [vmem:[#allocation11 + $0x13c] sm:$0xf0] }
 0x6ef   :  { %4762 = vmatpush.msra.mxu0 %v4653_v41  ;;  %v8119_v41 = vld [vmem:[#allocation11 + $0x90] sm:$0xf] }
 0x6f0   :  { %4775 = vmatpush.msrb.mxu2 %v4698_v44  ;;  %v4716_v46 = vld [vmem:[#allocation5 + $0x118] sm:$0xff]  ;;  %4736 = vmatpush.msra.mxu3 %v11382_v3  ;;  %v8105_v3 = vld [vmem:[#allocation11 + $0x78] sm:$0xf0]  ;;  %v8120_v50 = vor.u32 %v8979_v42, %v8119_v41  ;;  %v8202_v41 = vor.u32 %v8999_v31, %v8201_v30 }
 0x6f1   :  { %4802 = vmatpush.msra.mxu1 %v4716_v46  ;;  %4763 = vmatpush.msra.mxu0 %v4651_v32  ;;  %v11420_v32 = vld [vmem:[#allocation11 + $0x1c8] sm:$0x11]  ;;  %v8968_v44 = vld [vmem:[#allocation11 + $0x44] sm:$0xf]  ;;  %v8064_v46 = vor.u32 %v8965_v35, %v8063_v34  ;;  %v8249_v35 = vld [vmem:[#allocation11 + $0x198] sm:$0xf] }
 0x6f2   :  { %4776 = vmatpush.msrb.mxu2 %v4696_v48  ;;  %4737 = vmatpush.msra.mxu3 %v11376_v9  ;;  %v8143_v9 = vld [vmem:[#allocation11 + $0xc0] sm:$0xf]  ;;  %v5164_v43 = vunpack.c.l.b16 %v11420_v32  ;;  %v8055_v48 = vld [vmem:[#allocation11 + $0x10] sm:$0xf]  ;;  %v8049_v34 = vld [vmem:[#allocation11 + $0x8] sm:$0xf0] }
 0x6f3   :  { %4803 = vmatpush.msra.mxu1 %v4714_v51  ;;  %8042 = vmatmul.msk.f32.vlgmr.msra.gmra.mxu0 %vm3515_vm6, %v4680_v47  ;;  %v8144_v11 = vor.u32 %v8985_v0, %v8143_v9  ;;  %v8982_v51 = vld [vmem:[#allocation11 + $0xb4] sm:$0xf]  ;;  %v8129_v9 = vld [vmem:[#allocation11 + $0xa8] sm:$0xf0]  ;;  %v8235_v30 = vld [vmem:[#allocation11 + $0x180] sm:$0xf0] }
 0x6f4   :  { %4777 = vmatpush.msrb.mxu2 %v4694_v54  ;;  %4738 = vmatpush.msra.mxu3 %v11380_v2  ;;  %v8974_v2 = vld [vmem:[#allocation11 + $0x74] sm:$0xf]  ;;  %v8084_v54 = vor.u32 %v8968_v44, %v8081_v45  ;;  %v5194_v57 = vpack.c.b16 %v5164_v43, %v5164_v43  ;;  %v8140_v60 = vor.u32 %v8982_v51, %v8137_v52  ;;  %v8193_v43 = vld [vmem:[#allocation11 + $0x128] sm:$0xf]  ;;  %v8997_v44 = vld [vmem:[#allocation11 + $0x12c] sm:$0xf0] }
 0x6f5   :  { %8044 = vmatmul.msk.f32.vlgmr.msra.gmra.mxu1 %vm3515_vm6, %v4680_v47  ;;  %4995 = vmatpush.bf16.msrb.mxu0 %v8104_v49  ;;  %v8108_v13 = vor.u32 %v8974_v2, %v8105_v3  ;;  %v8148_v47 = vor.u32 %v8984_v36, %v8145_v37  ;;  %v8963_v49 = vld [vmem:[#allocation11 + $0x14] sm:$0xf0]  ;;  %v9003_v2 = vld [vmem:[#allocation11 + $0x15c] sm:$0xf0]  ;;  %v8241_v51 = vld [vmem:[#allocation11 + $0x188] sm:$0xf] }
 0x6f6   :  { %4778 = vmatpush.msrb.mxu2 %v4692_v22  ;;  %4739 = vmatpush.msra.mxu3 %v11374_v8  ;;  %v4957_v8 = vpack.c.b16 %v4927_v58, %v4927_v58  ;;  %v8966_v22 = vld [vmem:[#allocation11 + $0x34] sm:$0xf]  ;;  %v8056_v58 = vor.u32 %v8963_v49, %v8055_v48  ;;  %v9011_v36 = vld [vmem:[#allocation11 + $0x19c] sm:$0xf0]  ;;  %v9009_v52 = vld [vmem:[#allocation11 + $0x18c] sm:$0xf0] }
 0x6f7   :  { %5009 = vmatpush.bf16.msrb.mxu1 %v4990_v56  ;;  %v8111_v56 = vld [vmem:[#allocation11 + $0x80] sm:$0xf]  ;;  %v8250_v48 = vor.u32 %v9011_v36, %v8249_v35  ;;  %v8171_v31 = vld [vmem:[#allocation11 + $0x100] sm:$0xf0]  ;;  %v8988_v35 = vld [vmem:[#allocation11 + $0xec] sm:$0xf] }
 0x6f8   :  { %4779 = vmatpush.msrb.mxu2 %v4690_v39  ;;  %4740 = vmatpush.msra.mxu3 %v11370_v12  ;;  %v4679_v12 = vld [vmem:[%s11473_s4] sm:$0xff]  ;;  %v4993_v17 = vand.u32 %v4957_v8, %v11294_v61  ;;  %v8112_v0 = vor.u32 %v8977_v55, %v8111_v56  ;;  %v5225_v8 = vand.u32 %v5194_v57, %v11294_v61  ;;  %v9012_v57 = vld [vmem:[#allocation11 + $0x1ac] sm:$0xf]  ;;  %v8225_v36 = vld [vmem:[#allocation11 + $0x168] sm:$0xf] }
 0x6f9   :  { %4996 = vmatpush.bf16.msrb.mxu0 %v8096_v4  ;;  %v8073_v4 = vld [vmem:[#allocation11 + $0x38] sm:$0xf0]  ;;  %v8047_v39 = vld [vmem:[#allocation11] sm:$0xf]  ;;  %v8194_v56 = vor.u32 %v8997_v44, %v8193_v43  ;;  %v8163_v44 = vld [vmem:[#allocation11 + $0xf0] sm:$0xf0] }
 0x6fa   :  { %4780 = vmatpush.msrb.mxu2 %v4688_v1  ;;  %4741 = vmatpush.msra.mxu3 %v11364_v53  ;;  %v8080_v53 = vor.u32 %v8969_v7, %v8079_v6  ;;  %v8217_v1 = vld [vmem:[#allocation11 + $0x158] sm:$0xf]  ;;  %v8076_v3 = vor.u32 %v8966_v22, %v8073_v4  ;;  %v8065_v6 = vld [vmem:[#allocation11 + $0x28] sm:$0xf0]  ;;  %v8259_v22 = vld [vmem:[#allocation11 + $0x1b0] sm:$0xf0]  ;;  %v8242_v4 = vor.u32 %v9009_v52, %v8241_v51 }
 0x6fb   :  { %5010 = vmatpush.bf16.msrb.mxu1 %v8152_v63  ;;  %v8961_v63 = vld [vmem:[#allocation11 + $0x4] sm:$0xf0] }
 0x6fc   :  { %4781 = vmatpush.msrb.mxu2 %v4686_v10  ;;  %4742 = vmatpush.msra.mxu3 %v11368_v24  ;;  %v8136_v24 = vor.u32 %v8983_v15, %v8135_v14  ;;  %v8048_v7 = vor.u32 %v8961_v63, %v8047_v39  ;;  %v8265_v10 = vld [vmem:[#allocation11 + $0x1b8] sm:$0xf]  ;;  %v8218_v14 = vor.u32 %v9003_v2, %v8217_v1  ;;  %v8121_v15 = vld [vmem:[#allocation11 + $0x98] sm:$0xf0]  ;;  %v8996_v1 = vld [vmem:[#allocation11 + $0x12c] sm:$0xf] }
 0x6fd   :  { %4997 = vmatpush.bf16.msrb.mxu0 %v8088_v5  ;;  %v8964_v5 = vld [vmem:[#allocation11 + $0x24] sm:$0xf]  ;;  %v8262_v39 = vor.u32 %v9012_v57, %v8259_v22  ;;  %v9010_v63 = vld [vmem:[#allocation11 + $0x19c] sm:$0xf]  ;;  %v8195_v2 = vld [vmem:[#allocation11 + $0x130] sm:$0xf0] }
 0x6fe   :  { %4782 = vmatpush.msrb.mxu2 %v4684_v16  ;;  %4743 = vmatpush.msra.mxu3 %v11362_v59  ;;  %v8072_v59 = vor.u32 %v8967_v21, %v8071_v18  ;;  %v5165_v16 = vunpack.c.h.b16 %v11420_v32  ;;  %v8057_v21 = vld [vmem:[#allocation11 + $0x18] sm:$0xf0]  ;;  %v8960_v32 = vld [vmem:[#allocation11 + $0x4] sm:$0xf]  ;;  %v8331_v57 = vld [vmem:[#allocation11 + $0x240] sm:$0xf] }
 0x6ff   :  { %4744 = vmatmul.f32.vlgmr.msra.gmra.mxu3 %v4679_v12  ;;  %5011 = vmatpush.bf16.msrb.mxu1 %v8144_v11  ;;  %v9015_v11 = vld [vmem:[#allocation11 + $0x1bc] sm:$0xf0]  ;;  %v8052_v45 = vor.u32 %v8960_v32, %v8049_v34  ;;  %v8989_v34 = vld [vmem:[#allocation11 + $0xec] sm:$0xf0]  ;;  %v9031_v22 = vld [vmem:[#allocation11 + $0x244] sm:$0xf0] }
 0x700   :  { %4783 = vmatpush.msrb.mxu2 %v4682_v23  ;;  %5021 = vmatpush.bf16.msrb.mxu3 %v8108_v13  ;;  %v8978_v13 = vld [vmem:[#allocation11 + $0x94] sm:$0xf]  ;;  %v8266_v18 = vor.u32 %v9015_v11, %v8265_v10  ;;  %v8257_v23 = vld [vmem:[#allocation11 + $0x1a8] sm:$0xf]  ;;  %v5195_v29 = vpack.c.b16 %v5165_v16, %v5165_v16  ;;  %v8185_v10 = vld [vmem:[#allocation11 + $0x118] sm:$0xf] }
 0x701   :  { %4784 = vmatmul.f32.vlgmr.msrb.gmra.mxu2 %v4679_v12  ;;  %4998 = vmatpush.bf16.msrb.mxu0 %v8080_v53  ;;  %v8132_v12 = vor.u32 %v8980_v62, %v8129_v9  ;;  %v8068_v53 = vor.u32 %v8964_v5, %v8065_v6  ;;  %v8124_v26 = vor.u32 %v8978_v13, %v8121_v15  ;;  %v8203_v62 = vld [vmem:[#allocation11 + $0x140] sm:$0xf0]  ;;  %v9008_v5 = vld [vmem:[#allocation11 + $0x18c] sm:$0xf]  ;;  %v8995_v11 = vld [vmem:[#allocation11 + $0x11c] sm:$0xf0] }
 0x702   :  { %5035 = vmatpush.bf16.msra.mxu2 %v4993_v17  ;;  %v8962_v17 = vld [vmem:[#allocation11 + $0x14] sm:$0xf]  ;;  %v5228_v42 = vand.u32 %v5195_v29, %v11294_v61  ;;  %v8251_v9 = vld [vmem:[#allocation11 + $0x1a0] sm:$0xf0]  ;;  %v8198_v6 = vor.u32 %v8996_v1, %v8195_v2  ;;  %v8186_v13 = vor.u32 %v8995_v11, %v8185_v10  ;;  %v8177_v16 = vld [vmem:[#allocation11 + $0x108] sm:$0xf] }
 0x703   :  { %5012 = vmatpush.bf16.msrb.mxu1 %v8136_v24  ;;  %v8976_v24 = vld [vmem:[#allocation11 + $0x84] sm:$0xf]  ;;  %v9029_v11 = vld [vmem:[#allocation11 + $0x234] sm:$0xf0] }
 0x704   :  { %5022 = vmatpush.bf16.msrb.mxu3 %v8100_v27  ;;  %v8210_v27 = vor.u32 %v9001_v20, %v8209_v19  ;;  %v8116_v37 = vor.u32 %v8976_v24, %v8113_v28  ;;  %v8993_v19 = vld [vmem:[#allocation11 + $0x10c] sm:$0xf0]  ;;  %v8992_v20 = vld [vmem:[#allocation11 + $0x10c] sm:$0xf]  ;;  %v9007_v24 = vld [vmem:[#allocation11 + $0x17c] sm:$0xf0] }
 0x705   :  { %4999 = vmatpush.bf16.msrb.mxu0 %v8072_v59  ;;  %v8060_v59 = vor.u32 %v8962_v17, %v8057_v21  ;;  %v8179_v17 = vld [vmem:[#allocation11 + $0x110] sm:$0xf0]  ;;  %v8169_v21 = vld [vmem:[#allocation11 + $0xf8] sm:$0xf] }
 0x706   :  { %5036 = vmatpush.bf16.msra.mxu2 %v8156_v33  ;;  %v8258_v33 = vor.u32 %v9013_v25, %v8257_v23  ;;  %v8991_v23 = vld [vmem:[#allocation11 + $0xfc] sm:$0xf0]  ;;  %v8990_v25 = vld [vmem:[#allocation11 + $0xfc] sm:$0xf] }
 0x707   :  { %5013 = vmatpush.bf16.msrb.mxu1 %v8128_v38  ;;  %v9002_v38 = vld [vmem:[#allocation11 + $0x15c] sm:$0xf]  ;;  %v8170_v28 = vor.u32 %v8991_v23, %v8169_v21  ;;  %v8174_v32 = vor.u32 %v8990_v25, %v8171_v31  ;;  %v8315_v21 = vld [vmem:[#allocation11 + $0x220] sm:$0xf]  ;;  %v9027_v23 = vld [vmem:[#allocation11 + $0x224] sm:$0xf0] }
 0x708   :  { %5023 = vmatpush.bf16.msrb.mxu3 %v8092_v40  ;;  %v8219_v40 = vld [vmem:[#allocation11 + $0x160] sm:$0xf0]  ;;  %v8365_v31 = vld [vmem:[#allocation11 + $0x288] sm:$0xf0] }
 0x709   :  { %5000 = vmatpush.bf16.msrb.mxu0 %v8064_v46  ;;  %v9014_v46 = vld [vmem:[#allocation11 + $0x1bc] sm:$0xf]  ;;  %v8222_v49 = vor.u32 %v9002_v38, %v8219_v40  ;;  %v9004_v38 = vld [vmem:[#allocation11 + $0x16c] sm:$0xf]  ;;  %v9026_v25 = vld [vmem:[#allocation11 + $0x224] sm:$0xf] }
 0x70a   :  { %5037 = vmatpush.bf16.msra.mxu2 %v8148_v47  ;;  %v8267_v47 = vld [vmem:[#allocation11 + $0x1c0] sm:$0xf0] }
 0x70b   :  { %5014 = vmatpush.bf16.msrb.mxu1 %v8120_v50  ;;  %v9000_v50 = vld [vmem:[#allocation11 + $0x14c] sm:$0xf]  ;;  %v8270_v55 = vor.u32 %v9014_v46, %v8267_v47  ;;  %v5313_v46 = vld [vmem:[#allocation11 + $0x2b0] sm:$0x11] }
 0x70c   :  { %5024 = vmatpush.bf16.msrb.mxu3 %v8084_v54  ;;  %v8211_v54 = vld [vmem:[#allocation11 + $0x150] sm:$0xf0]  ;;  %v5399_v47 = vunpack.c.l.b16 %v5313_v46 }
 0x70d   :  { %5001 = vmatpush.bf16.msrb.mxu0 %v8056_v58  ;;  %v8214_v58 = vor.u32 %v9000_v50, %v8211_v54 }
 0x70e   :  { %5038 = vmatpush.bf16.msra.mxu2 %v8140_v60  ;;  %v8998_v60 = vld [vmem:[#allocation11 + $0x13c] sm:$0xf]  ;;  %v5429_v50 = vpack.c.b16 %v5399_v47, %v5399_v47  ;;  %v9023_v47 = vld [vmem:[#allocation11 + $0x204] sm:$0xf0] }
 0x70f   :  { %5015 = vmatpush.bf16.msrb.mxu1 %v8112_v0  ;;  %v8206_v0 = vor.u32 %v8998_v60, %v8203_v62  ;;  %v9030_v60 = vld [vmem:[#allocation11 + $0x244] sm:$0xf]  ;;  %v8333_v62 = vld [vmem:[#allocation11 + $0x248] sm:$0xf0] }
 0x710   :  { %5025 = vmatpush.bf16.msrb.mxu3 %v8076_v3  ;;  %v8254_v3 = vor.u32 %v9010_v63, %v8251_v9  ;;  %v8379_v9 = vld [vmem:[#allocation11 + $0x2a0] sm:$0xf] }
 0x711   :  { %5002 = vmatpush.bf16.msrb.mxu0 %v8048_v7 }
 0x712   :  { %5039 = vmatpush.bf16.msra.mxu2 %v8132_v12  ;;  %v8994_v12 = vld [vmem:[#allocation11 + $0x11c] sm:$0xf] }
 0x713   :  { %5244 = vmatpush.bf16.msra.mxu1 %v5225_v8  ;;  %v8243_v8 = vld [vmem:[#allocation11 + $0x190] sm:$0xf0] }
 0x714   :  { %5026 = vmatpush.bf16.msrb.mxu3 %v8068_v53  ;;  %v8246_v7 = vor.u32 %v9008_v5, %v8243_v8  ;;  %v8178_v53 = vor.u32 %v8993_v19, %v8177_v16  ;;  %v8381_v5 = vld [vmem:[#allocation11 + $0x2a8] sm:$0xf0]  ;;  %v8332_v8 = vor.u32 %v9031_v22, %v8331_v57  ;;  %v8371_v16 = vld [vmem:[#allocation11 + $0x290] sm:$0xf]  ;;  %v9041_v19 = vld [vmem:[#allocation11 + $0x294] sm:$0xf0] }
 0x715   :  { %5230 = vmatpush.bf16.msra.mxu0 %v8218_v14  ;;  %v8187_v14 = vld [vmem:[#allocation11 + $0x120] sm:$0xf0] }
 0x716   :  { %5040 = vmatpush.bf16.msra.mxu2 %v8124_v26  ;;  %v8190_v15 = vor.u32 %v8994_v12, %v8187_v14  ;;  %v8233_v26 = vld [vmem:[#allocation11 + $0x178] sm:$0xf]  ;;  %v9028_v12 = vld [vmem:[#allocation11 + $0x234] sm:$0xf] }
 0x717   :  { %5245 = vmatpush.bf16.msra.mxu1 %v8266_v18  ;;  %v8182_v18 = vor.u32 %v8992_v20, %v8179_v17  ;;  %v8234_v29 = vor.u32 %v9007_v24, %v8233_v26  ;;  %v9040_v20 = vld [vmem:[#allocation11 + $0x294] sm:$0xf]  ;;  %v8317_v26 = vld [vmem:[#allocation11 + $0x228] sm:$0xf0]  ;;  %v8372_v24 = vor.u32 %v9041_v19, %v8371_v16  ;;  %v9018_v16 = vld [vmem:[#allocation11 + $0x1e4] sm:$0xf] }
 0x718   :  { %5027 = vmatpush.bf16.msrb.mxu3 %v8060_v59  ;;  %v8285_v19 = vld [vmem:[#allocation11 + $0x1e8] sm:$0xf0] }
 0x719   :  { %5231 = vmatpush.bf16.msra.mxu0 %v8210_v27  ;;  %v9006_v27 = vld [vmem:[#allocation11 + $0x17c] sm:$0xf] }
 0x71a   :  { %5041 = vmatpush.bf16.msra.mxu2 %v8116_v37  ;;  %v8238_v59 = vor.u32 %v9006_v27, %v8235_v30  ;;  %v9005_v37 = vld [vmem:[#allocation11 + $0x16c] sm:$0xf0]  ;;  %v9038_v30 = vld [vmem:[#allocation11 + $0x284] sm:$0xf] }
 0x71b   :  { %5246 = vmatpush.bf16.msra.mxu1 %v8258_v33  ;;  %v8161_v33 = vld [vmem:[#allocation11 + $0xe8] sm:$0xf] }
 0x71c   :  { %5028 = vmatpush.bf16.msrb.mxu3 %v8052_v45  ;;  %v8162_v40 = vor.u32 %v8989_v34, %v8161_v33  ;;  %v8166_v45 = vor.u32 %v8988_v35, %v8163_v44  ;;  %v8307_v33 = vld [vmem:[#allocation11 + $0x210] sm:$0xf]  ;;  %v9025_v34 = vld [vmem:[#allocation11 + $0x214] sm:$0xf0]  ;;  %v9024_v35 = vld [vmem:[#allocation11 + $0x214] sm:$0xf] }
 0x71d   :  { %5232 = vmatpush.bf16.msra.mxu0 %v8202_v41  ;;  %v8226_v41 = vor.u32 %v9005_v37, %v8225_v36  ;;  %v8309_v36 = vld [vmem:[#allocation11 + $0x218] sm:$0xf0]  ;;  %v8308_v44 = vor.u32 %v9025_v34, %v8307_v33 }
 0x71e   :  { %5270 = vmatpush.bf16.msrb.mxu2 %v5228_v42  ;;  %v8227_v42 = vld [vmem:[#allocation11 + $0x170] sm:$0xf0] }
 0x71f   :  { %5247 = vmatpush.bf16.msra.mxu1 %v8250_v48  ;;  %v8230_v43 = vor.u32 %v9004_v38, %v8227_v42  ;;  %v5400_v48 = vunpack.c.h.b16 %v5313_v46  ;;  %v8368_v38 = vor.u32 %v9038_v30, %v8365_v31  ;;  %v9036_v42 = vld [vmem:[#allocation11 + $0x274] sm:$0xf]  ;;  %v8299_v46 = vld [vmem:[#allocation11 + $0x200] sm:$0xf]  ;;  %v8439_v30 = vld [vmem:[#allocation11 + $0x320] sm:$0xf0] }
 0x720   :  { %5256 = vmatpush.bf16.msra.mxu3 %v8222_v49  ;;  %v8300_v57 = vor.u32 %v9023_v47, %v8299_v46  ;;  %v9017_v31 = vld [vmem:[#allocation11 + $0x1d4] sm:$0xf0]  ;;  %v8431_v46 = vld [vmem:[#allocation11 + $0x310] sm:$0xf0]  ;;  %v9071_v47 = vld [vmem:[#allocation11 + $0x38c] sm:$0xf0] }
 0x721   :  { %5233 = vmatpush.bf16.msra.mxu0 %v8194_v56  ;;  %v5430_v54 = vpack.c.b16 %v5400_v48, %v5400_v48  ;;  %v9022_v48 = vld [vmem:[#allocation11 + $0x204] sm:$0xf] }
 0x722   :  { %5271 = vmatpush.bf16.msrb.mxu2 %v8270_v55 }
 0x723   :  { %5248 = vmatpush.bf16.msra.mxu1 %v8242_v4  ;;  %v5463_v63 = vand.u32 %v5430_v54, %v11294_v61  ;;  %v9035_v54 = vld [vmem:[#allocation11 + $0x264] sm:$0xf0] }
 0x724   :  { %5257 = vmatpush.bf16.msra.mxu3 %v8214_v58 }
 0x725   :  { %5234 = vmatpush.bf16.msra.mxu0 %v8186_v13  ;;  %v8325_v13 = vld [vmem:[#allocation11 + $0x238] sm:$0xf0] }
 0x726   :  { %5272 = vmatpush.bf16.msrb.mxu2 %v8262_v39  ;;  %v5460_v39 = vand.u32 %v5429_v50, %v11294_v61  ;;  %v8347_v50 = vld [vmem:[#allocation11 + $0x260] sm:$0xf] }
 0x727   :  { %5249 = vmatpush.bf16.msra.mxu1 %v8234_v29  ;;  %v9039_v29 = vld [vmem:[#allocation11 + $0x284] sm:$0xf0] }
 0x728   :  { %5258 = vmatpush.bf16.msra.mxu3 %v8206_v0  ;;  %v9043_v0 = vld [vmem:[#allocation11 + $0x2a4] sm:$0xf0] }
 0x729   :  { %5235 = vmatpush.bf16.msra.mxu0 %v8178_v53  ;;  %v8380_v14 = vor.u32 %v9043_v0, %v8379_v9  ;;  %v8373_v53 = vld [vmem:[#allocation11 + $0x298] sm:$0xf0] }
 0x72a   :  { %5273 = vmatpush.bf16.msrb.mxu2 %v8254_v3  ;;  %v9042_v3 = vld [vmem:[#allocation11 + $0x2a4] sm:$0xf]  ;;  %v8376_v27 = vor.u32 %v9040_v20, %v8373_v53  ;;  %v5548_v0 = vld [vmem:[#allocation11 + $0x398] sm:$0x11] }
 0x72b   :  { %5250 = vmatpush.bf16.msra.mxu1 %v8226_v41  ;;  %v9037_v41 = vld [vmem:[#allocation11 + $0x274] sm:$0xf0]  ;;  %v5634_v20 = vunpack.c.l.b16 %v5548_v0  ;;  %v5635_v53 = vunpack.c.h.b16 %v5548_v0 }
 0x72c   :  { %5259 = vmatpush.bf16.msra.mxu3 %v8198_v6  ;;  %v8336_v6 = vor.u32 %v9030_v60, %v8333_v62  ;;  %v9020_v60 = vld [vmem:[#allocation11 + $0x1f4] sm:$0xf]  ;;  %v8293_v62 = vld [vmem:[#allocation11 + $0x1f8] sm:$0xf0] }
 0x72d   :  { %5236 = vmatpush.bf16.msra.mxu0 %v8170_v28  ;;  %v8363_v28 = vld [vmem:[#allocation11 + $0x280] sm:$0xf]  ;;  %v5664_v33 = vpack.c.b16 %v5634_v20, %v5634_v20  ;;  %v5665_v34 = vpack.c.b16 %v5635_v53, %v5635_v53  ;;  %v9048_v53 = vld [vmem:[#allocation11 + $0x2dc] sm:$0xf] }
 0x72e   :  { %5274 = vmatpush.bf16.msrb.mxu2 %v8246_v7  ;;  %v8323_v7 = vld [vmem:[#allocation11 + $0x230] sm:$0xf]  ;;  %v8364_v37 = vor.u32 %v9039_v29, %v8363_v28  ;;  %v9057_v28 = vld [vmem:[#allocation11 + $0x31c] sm:$0xf0]  ;;  %v9056_v29 = vld [vmem:[#allocation11 + $0x31c] sm:$0xf] }
 0x72f   :  { %v8324_v17 = vor.u32 %v9029_v11, %v8323_v7  ;;  %v8296_v11 = vor.u32 %v9020_v60, %v8293_v62  ;;  %v8487_v60 = vld [vmem:[#allocation11 + $0x380] sm:$0xf0]  ;;  %v8477_v62 = vld [vmem:[#allocation11 + $0x368] sm:$0xf]  ;;  %v9049_v20 = vld [vmem:[#allocation11 + $0x2dc] sm:$0xf0] }
 0x730   :  { %5260 = vmatpush.bf16.msra.mxu3 %v8190_v15  ;;  %v8384_v15 = vor.u32 %v9042_v3, %v8381_v5  ;;  %v9032_v3 = vld [vmem:[#allocation11 + $0x254] sm:$0xf]  ;;  %v8283_v5 = vld [vmem:[#allocation11 + $0x1e0] sm:$0xf] }
 0x731   :  { %5237 = vmatpush.bf16.msra.mxu0 %v8162_v40  ;;  %v8355_v40 = vld [vmem:[#allocation11 + $0x270] sm:$0xf] }
 0x732   :  { %5275 = vmatpush.bf16.msrb.mxu2 %v8238_v59  ;;  %v8316_v59 = vor.u32 %v9027_v23, %v8315_v21  ;;  %v8275_v21 = vld [vmem:[#allocation11 + $0x1d0] sm:$0xf] }
 0x734   :  { %5261 = vmatpush.bf16.msra.mxu3 %v8182_v18  ;;  %v8328_v18 = vor.u32 %v9028_v12, %v8325_v13  ;;  %v9059_v12 = vld [vmem:[#allocation11 + $0x32c] sm:$0xf0]  ;;  %v9058_v13 = vld [vmem:[#allocation11 + $0x32c] sm:$0xf] }
 0x736   :  { %5276 = vmatpush.bf16.msrb.mxu2 %v8230_v43  ;;  %v8357_v43 = vld [vmem:[#allocation11 + $0x278] sm:$0xf0] }
 0x738   :  { %5262 = vmatpush.bf16.msra.mxu3 %v8174_v32  ;;  %v8320_v32 = vor.u32 %v9026_v25, %v8317_v26  ;;  %v8437_v26 = vld [vmem:[#allocation11 + $0x318] sm:$0xf] }
 0x73c   :  { %5263 = vmatpush.bf16.msra.mxu3 %v8166_v45  ;;  %v8312_v45 = vor.u32 %v9024_v35, %v8309_v36  ;;  %v8438_v35 = vor.u32 %v9057_v28, %v8437_v26  ;;  %v8442_v36 = vor.u32 %v9056_v29, %v8439_v30  ;;  %v9047_v30 = vld [vmem:[#allocation11 + $0x2cc] sm:$0xf0] }
 0x770   :  { %v4765_v49 = vpop.f32.mrf.mxu0 }
 0x772   :  { %v4805_v51 = vpop.f32.mrf.mxu1 }
 0x782   :  { %v4745_v52 = vpop.f32.mrf.mxu3 }
 0x783   :  { %v4766_v56 = vadd.f32 %v4765_v49, %v4745_v52  ;;  %v8301_v49 = vld [vmem:[#allocation11 + $0x208] sm:$0xf0]  ;;  %v8360_v52 = vor.u32 %v9036_v42, %v8357_v43  ;;  %v5695_v42 = vand.u32 %v5664_v33, %v11294_v61  ;;  %v5698_v43 = vand.u32 %v5665_v34, %v11294_v61  ;;  %v9052_v61 = vld [vmem:[#allocation11 + $0x2fc] sm:$0xf]  ;;  %v8463_v34 = vld [vmem:[#allocation11 + $0x350] sm:$0xf0] }
 0x784   :  { %v4785_v55 = vpop.f32.mrf.mxu2  ;;  %v8304_v22 = vor.u32 %v9022_v48, %v8301_v49  ;;  %v9070_v48 = vld [vmem:[#allocation11 + $0x38c] sm:$0xf]  ;;  %v8495_v49 = vld [vmem:[#allocation11 + $0x390] sm:$0xf0] }
 0x785   :  { %v4806_v4 = vadd.f32 %v4805_v51, %v4785_v55  ;;  %v4808_v58 = vmax.f32 %v4766_v56, 0.0  ;;  %v8356_v51 = vor.u32 %v9037_v41, %v8355_v40  ;;  %v9034_v56 = vld [vmem:[#allocation11 + $0x264] sm:$0xf]  ;;  %v8349_v55 = vld [vmem:[#allocation11 + $0x268] sm:$0xf0] }
 0x786   :  { %v8352_v9 = vor.u32 %v9034_v56, %v8349_v55  ;;  %v8429_v40 = vld [vmem:[#allocation11 + $0x308] sm:$0xf]  ;;  %v9055_v41 = vld [vmem:[#allocation11 + $0x30c] sm:$0xf0]  ;;  %v8498_v55 = vor.u32 %v9070_v48, %v8495_v49  ;;  %v9062_v33 = vld [vmem:[#allocation11 + $0x34c] sm:$0xf] }
 0x787   :  { %v4809_v1 = vmax.f32 %v4806_v4, 0.0  ;;  %v11428_v2 = vpack.c.bf16 %v4808_v58, %v4808_v58  ;;  %v8291_v4 = vld [vmem:[#allocation11 + $0x1f0] sm:$0xf]  ;;  %v9021_v58 = vld [vmem:[#allocation11 + $0x1f4] sm:$0xf0] }
 0x788   :  { %v8292_v7 = vor.u32 %v9021_v58, %v8291_v4  ;;  %v9069_v4 = vld [vmem:[#allocation11 + $0x37c] sm:$0xf0]  ;;  %v9068_v58 = vld [vmem:[#allocation11 + $0x37c] sm:$0xf] }
 0x789   :  { %v11430_v10 = vpack.c.bf16 %v4809_v1, %v4809_v1  ;;  %5003 = vmatmul.bf16.vlgmr.msrb.gmra.mxu0 %v11428_v2  ;;  %5029 = vmatmul.bf16.vlgmr.msrb.gmra.mxu3 %v11428_v2  ;;  %v9033_v1 = vld [vmem:[#allocation11 + $0x254] sm:$0xf0] }
 0x78a   :  { %5479 = vmatpush.bf16.msrb.mxu0 %v5460_v39  ;;  %5505 = vmatpush.bf16.msrb.mxu3 %v5463_v63  ;;  %v8339_v39 = vld [vmem:[#allocation11 + $0x250] sm:$0xf]  ;;  %v8348_v63 = vor.u32 %v9035_v54, %v8347_v50  ;;  %v8421_v54 = vld [vmem:[#allocation11 + $0x2f8] sm:$0xf] }
 0x78b   :  { %8157 = vmatmul.msk.bf16.vlgmr.msrb.gmra.mxu1 %vm4022_vm12, %v11430_v10  ;;  %8158 = vmatmul.msk.bf16.vlgmr.msra.gmra.mxu2 %vm4022_vm12, %v11430_v10 }
 0x78c   :  { %5465 = vmatpush.bf16.msrb.mxu1 %v8332_v8  ;;  %5491 = vmatpush.bf16.msra.mxu2 %v8336_v6  ;;  %v8341_v8 = vld [vmem:[#allocation11 + $0x258] sm:$0xf0]  ;;  %v8445_v6 = vld [vmem:[#allocation11 + $0x328] sm:$0xf] }
 0x78d   :  { %v8446_v23 = vor.u32 %v9059_v12, %v8445_v6  ;;  %v9067_v6 = vld [vmem:[#allocation11 + $0x36c] sm:$0xf0]  ;;  %v8469_v12 = vld [vmem:[#allocation11 + $0x358] sm:$0xf] }
 0x78e   :  { %5480 = vmatpush.bf16.msrb.mxu0 %v8380_v14  ;;  %5506 = vmatpush.bf16.msrb.mxu3 %v8384_v15  ;;  %v8447_v14 = vld [vmem:[#allocation11 + $0x330] sm:$0xf0]  ;;  %v9019_v15 = vld [vmem:[#allocation11 + $0x1e4] sm:$0xf0] }
 0x78f   :  { %v8450_v25 = vor.u32 %v9058_v13, %v8447_v14 }
 0x790   :  { %5466 = vmatpush.bf16.msrb.mxu1 %v8324_v17  ;;  %5492 = vmatpush.bf16.msra.mxu2 %v8328_v18  ;;  %v8340_v17 = vor.u32 %v9033_v1, %v8339_v39  ;;  %v8344_v18 = vor.u32 %v9032_v3, %v8341_v8  ;;  %v8490_v1 = vor.u32 %v9068_v58, %v8487_v60  ;;  %v9051_v3 = vld [vmem:[#allocation11 + $0x2ec] sm:$0xf0]  ;;  %v8415_v8 = vld [vmem:[#allocation11 + $0x2f0] sm:$0xf0] }
 0x792   :  { %5481 = vmatpush.bf16.msrb.mxu0 %v8372_v24  ;;  %5507 = vmatpush.bf16.msrb.mxu3 %v8376_v27  ;;  %v8284_v24 = vor.u32 %v9019_v15, %v8283_v5  ;;  %v8288_v27 = vor.u32 %v9018_v16, %v8285_v19  ;;  %v9050_v5 = vld [vmem:[#allocation11 + $0x2ec] sm:$0xf]  ;;  %v8405_v15 = vld [vmem:[#allocation11 + $0x2d8] sm:$0xf]  ;;  %v8478_v16 = vor.u32 %v9067_v6, %v8477_v62 }
 0x793   :  { %v8418_v14 = vor.u32 %v9050_v5, %v8415_v8  ;;  %v8406_v26 = vor.u32 %v9049_v20, %v8405_v15  ;;  %v5766_v5 = vld [vmem:[#allocation6 + $0x40] sm:$0x1] }
 0x794   :  { %5467 = vmatpush.bf16.msrb.mxu1 %v8316_v59  ;;  %5493 = vmatpush.bf16.msra.mxu2 %v8320_v32  ;;  %v9016_v59 = vld [vmem:[#allocation11 + $0x1d4] sm:$0xf]  ;;  %v8277_v32 = vld [vmem:[#allocation11 + $0x1d8] sm:$0xf0] }
 0x796   :  { %5482 = vmatpush.bf16.msrb.mxu0 %v8364_v37  ;;  %5508 = vmatpush.bf16.msrb.mxu3 %v8368_v38  ;;  %v8276_v37 = vor.u32 %v9017_v31, %v8275_v21  ;;  %v8280_v38 = vor.u32 %v9016_v59, %v8277_v32  ;;  %v9064_v21 = vld [vmem:[#allocation11 + $0x35c] sm:$0xf]  ;;  %v9046_v31 = vld [vmem:[#allocation11 + $0x2cc] sm:$0xf]  ;;  %v8399_v59 = vld [vmem:[#allocation11 + $0x2d0] sm:$0xf0] }
 0x797   :  { %v9063_v32 = vld [vmem:[#allocation11 + $0x34c] sm:$0xf0] }
 0x798   :  { %5468 = vmatpush.bf16.msrb.mxu1 %v8308_v44  ;;  %5494 = vmatpush.bf16.msra.mxu2 %v8312_v45  ;;  %v8493_v44 = vld [vmem:[#allocation11 + $0x388] sm:$0xf]  ;;  %v9054_v45 = vld [vmem:[#allocation11 + $0x30c] sm:$0xf] }
 0x799   :  { %5238 = vmatmul.bf16.vlgmr.msra.gmra.mxu0 %v11428_v2  ;;  %5264 = vmatmul.bf16.vlgmr.msra.gmra.mxu3 %v11428_v2  ;;  %v8434_v50 = vor.u32 %v9054_v45, %v8431_v46  ;;  %v8494_v56 = vor.u32 %v9071_v47, %v8493_v44  ;;  %v8391_v44 = vld [vmem:[#allocation11 + $0x2c0] sm:$0xf0]  ;;  %v9061_v45 = vld [vmem:[#allocation11 + $0x33c] sm:$0xf0]  ;;  %v9060_v46 = vld [vmem:[#allocation11 + $0x33c] sm:$0xf] }
 0x79a   :  { %5483 = vmatpush.bf16.msrb.mxu0 %v8356_v51  ;;  %5509 = vmatpush.bf16.msrb.mxu3 %v8360_v52  ;;  %v8485_v51 = vld [vmem:[#allocation11 + $0x378] sm:$0xf]  ;;  %v8430_v52 = vor.u32 %v9055_v41, %v8429_v40  ;;  %v8466_v41 = vor.u32 %v9062_v33, %v8463_v34  ;;  %v8455_v47 = vld [vmem:[#allocation11 + $0x340] sm:$0xf0] }
 0x79b   :  { %8271 = vmatmul.msk.bf16.vlgmr.msra.gmra.mxu1 %vm4022_vm12, %v11430_v10  ;;  %8272 = vmatmul.msk.bf16.vlgmr.msrb.gmra.mxu2 %vm4022_vm12, %v11430_v10  ;;  %v8486_v0 = vor.u32 %v9069_v4, %v8485_v51 }
 0x79c   :  { %5469 = vmatpush.bf16.msrb.mxu1 %v8300_v57  ;;  %5495 = vmatpush.bf16.msra.mxu2 %v8304_v22  ;;  %v9053_v57 = vld [vmem:[#allocation11 + $0x2fc] sm:$0xf0]  ;;  %v8423_v22 = vld [vmem:[#allocation11 + $0x300] sm:$0xf0] }
 0x79d   :  { %v8422_v39 = vor.u32 %v9053_v57, %v8421_v54 }
 0x79e   :  { %5484 = vmatpush.bf16.msrb.mxu0 %v8348_v63  ;;  %5510 = vmatpush.bf16.msrb.mxu3 %v8352_v9  ;;  %v8426_v63 = vor.u32 %v9052_v61, %v8423_v22  ;;  %v8413_v9 = vld [vmem:[#allocation11 + $0x2e8] sm:$0xf] }
 0x79f   :  { %v8414_v13 = vor.u32 %v9051_v3, %v8413_v9 }
 0x7a0   :  { %5470 = vmatpush.bf16.msrb.mxu1 %v8292_v7  ;;  %5496 = vmatpush.bf16.msra.mxu2 %v8296_v11  ;;  %v9066_v7 = vld [vmem:[#allocation11 + $0x36c] sm:$0xf]  ;;  %v8479_v11 = vld [vmem:[#allocation11 + $0x370] sm:$0xf0] }
 0x7a1   :  { %v8482_v19 = vor.u32 %v9066_v7, %v8479_v11  ;;  %v5767_v11 = vld [vmem:[#allocation6 + $0x48] sm:$0x1] }
 0x7a2   :  { %5485 = vmatpush.bf16.msrb.mxu0 %v8340_v17  ;;  %5511 = vmatpush.bf16.msrb.mxu3 %v8344_v18  ;;  %v8407_v17 = vld [vmem:[#allocation11 + $0x2e0] sm:$0xf0]  ;;  %v9065_v18 = vld [vmem:[#allocation11 + $0x35c] sm:$0xf0] }
 0x7a3   :  { %v8470_v28 = vor.u32 %v9065_v18, %v8469_v12 }
 0x7a4   :  { %5471 = vmatpush.bf16.msrb.mxu1 %v8284_v24  ;;  %5497 = vmatpush.bf16.msra.mxu2 %v8288_v27  ;;  %v8410_v24 = vor.u32 %v9048_v53, %v8407_v17  ;;  %v8397_v27 = vld [vmem:[#allocation11 + $0x2c8] sm:$0xf] }
 0x7a6   :  { %5700 = vmatpush.bf16.msra.mxu0 %v8446_v23  ;;  %5726 = vmatpush.bf16.msra.mxu3 %v8450_v25  ;;  %v8471_v23 = vld [vmem:[#allocation11 + $0x360] sm:$0xf0]  ;;  %v8461_v25 = vld [vmem:[#allocation11 + $0x348] sm:$0xf] }
 0x7a7   :  { %v8474_v29 = vor.u32 %v9064_v21, %v8471_v23  ;;  %v8462_v40 = vor.u32 %v9063_v32, %v8461_v25 }
 0x7a8   :  { %5472 = vmatpush.bf16.msrb.mxu1 %v8276_v37  ;;  %5498 = vmatpush.bf16.msra.mxu2 %v8280_v38  ;;  %v8402_v37 = vor.u32 %v9046_v31, %v8399_v59  ;;  %v8389_v38 = vld [vmem:[#allocation11 + $0x2b8] sm:$0xf] }
 0x7a9   :  { %8385 = vmatmul.msk.bf16.vlgmr.msrb.gmra.mxu0 %vm4022_vm12, %v11430_v10  ;;  %8386 = vmatmul.msk.bf16.vlgmr.msrb.gmra.mxu3 %vm4022_vm12, %v11430_v10 }
 0x7aa   :  { %5701 = vmatpush.bf16.msra.mxu0 %v8438_v35  ;;  %5727 = vmatpush.bf16.msra.mxu3 %v8442_v36  ;;  %v8453_v35 = vld [vmem:[#allocation11 + $0x338] sm:$0xf]  ;;  %v8398_v36 = vor.u32 %v9047_v30, %v8397_v27  ;;  %v5757_v27 = vld [vmem:[%s11474_s5] sm:$0x3f] }
 0x7ab   :  { %5473 = vmatmul.bf16.vlgmr.msrb.gmra.mxu1 %v11428_v2  ;;  %5499 = vmatmul.bf16.vlgmr.msra.gmra.mxu2 %v11428_v2  ;;  %v8454_v51 = vor.u32 %v9061_v45, %v8453_v35 }
 0x7ac   :  { %5714 = vmatpush.bf16.msra.mxu1 %v5695_v42  ;;  %5740 = vmatpush.bf16.msrb.mxu2 %v5698_v43  ;;  %v9045_v42 = vld [vmem:[#allocation11 + $0x2bc] sm:$0xf0]  ;;  %v9044_v43 = vld [vmem:[#allocation11 + $0x2bc] sm:$0xf] }
 0x7ad   :  { %v8390_v48 = vor.u32 %v9045_v42, %v8389_v38  ;;  %v8394_v49 = vor.u32 %v9044_v43, %v8391_v44 }
 0x7ae   :  { %5702 = vmatpush.bf16.msra.mxu0 %v8430_v52  ;;  %5728 = vmatpush.bf16.msra.mxu3 %v8434_v50  ;;  %v8458_v52 = vor.u32 %v9060_v46, %v8455_v47 }
 0x7b0   :  { %5715 = vmatpush.bf16.msra.mxu1 %v8494_v56  ;;  %5741 = vmatpush.bf16.msrb.mxu2 %v8498_v55 }
 0x7b2   :  { %5703 = vmatpush.bf16.msra.mxu0 %v8422_v39  ;;  %5729 = vmatpush.bf16.msra.mxu3 %v8426_v63 }
 0x7b4   :  { %5716 = vmatpush.bf16.msra.mxu1 %v8486_v0  ;;  %5742 = vmatpush.bf16.msrb.mxu2 %v8490_v1 }
 0x7b6   :  { %5704 = vmatpush.bf16.msra.mxu0 %v8414_v13  ;;  %5730 = vmatpush.bf16.msra.mxu3 %v8418_v14 }
 0x7b8   :  { %5717 = vmatpush.bf16.msra.mxu1 %v8478_v16  ;;  %5743 = vmatpush.bf16.msrb.mxu2 %v8482_v19 }
 0x7ba   :  { %5705 = vmatpush.bf16.msra.mxu0 %v8406_v26  ;;  %5731 = vmatpush.bf16.msra.mxu3 %v8410_v24 }
 0x7bc   :  { %5718 = vmatpush.bf16.msra.mxu1 %v8470_v28  ;;  %5744 = vmatpush.bf16.msrb.mxu2 %v8474_v29 }
 0x7be   :  { %5706 = vmatpush.bf16.msra.mxu0 %v8398_v36  ;;  %5732 = vmatpush.bf16.msra.mxu3 %v8402_v37 }
 0x7c0   :  { %5719 = vmatpush.bf16.msra.mxu1 %v8462_v40  ;;  %5745 = vmatpush.bf16.msrb.mxu2 %v8466_v41 }
 0x7c2   :  { %5707 = vmatpush.bf16.msra.mxu0 %v8390_v48  ;;  %5733 = vmatpush.bf16.msra.mxu3 %v8394_v49 }
 0x7c4   :  { %5720 = vmatpush.bf16.msra.mxu1 %v8454_v51  ;;  %5746 = vmatpush.bf16.msrb.mxu2 %v8458_v52 }
 0x7c5   :  { %5708 = vmatmul.bf16.vlgmr.msra.gmra.mxu0 %v11428_v2  ;;  %5734 = vmatmul.bf16.vlgmr.msra.gmra.mxu3 %v11428_v2 }
 0x7c6   :  { %8503 = vmatpush.msk.msrb.mxu0 %vm2354_vm1, %v5767_v11 }
 0x7c7   :  { %8499 = vmatmul.msk.bf16.vlgmr.msra.gmra.mxu1 %vm4022_vm12, %v11430_v10  ;;  %8500 = vmatmul.msk.bf16.vlgmr.msrb.gmra.mxu2 %vm4022_vm12, %v11430_v10 }
 0x7c8   :  { %8501 = vmatpush.msk.msrb.mxu1 %vm2354_vm1, %v5766_v5 }
 0x806   :  { %v5004_v50 = vpop.f32.mrf.mxu0 }
 0x808   :  { %v5017_v54 = vpop.f32.mrf.mxu1 }
 0x809   :  { %v5018_v56 = vadd.f32 %v5017_v54, %v5004_v50 }
 0x80c   :  { %v5030_v55 = vpop.f32.mrf.mxu3 }
 0x80e   :  { %v5043_v57 = vpop.f32.mrf.mxu2  ;;  %v5006_v61 = vpop.f32.mrf.mxu0 }
 0x80f   :  { %v5044_v22 = vadd.f32 %v5043_v57, %v5030_v55 }
 0x810   :  { %v5019_v4 = vpop.f32.mrf.mxu1 }
 0x814   :  { %v5032_v58 = vpop.f32.mrf.mxu3 }
 0x816   :  { %v5045_v60 = vpop.f32.mrf.mxu2  ;;  %v5239_v62 = vpop.f32.mrf.mxu0 }
 0x818   :  { %v5252_v39 = vpop.f32.mrf.mxu1 }
 0x819   :  { %v5253_v63 = vadd.f32 %v5252_v39, %v5239_v62 }
 0x81c   :  { %v5265_v2 = vpop.f32.mrf.mxu3 }
 0x81e   :  { %v5278_v9 = vpop.f32.mrf.mxu2  ;;  %v5241_v0 = vpop.f32.mrf.mxu0 }
 0x81f   :  { %v5279_v1 = vadd.f32 %v5278_v9, %v5265_v2 }
 0x820   :  { %v5254_v3 = vpop.f32.mrf.mxu1 }
 0x824   :  { %v5267_v10 = vpop.f32.mrf.mxu3 }
 0x826   :  { %v5280_v8 = vpop.f32.mrf.mxu2  ;;  %v5487_v6 = vpop.f32.mrf.mxu0 }
 0x828   :  { %v5474_v7 = vpop.f32.mrf.mxu1 }
 0x829   :  { %v5488_v12 = vadd.f32 %v5487_v6, %v5474_v7 }
 0x82c   :  { %v5513_v13 = vpop.f32.mrf.mxu3 }
 0x82e   :  { %v5500_v14 = vpop.f32.mrf.mxu2  ;;  %v5489_v16 = vpop.f32.mrf.mxu0 }
 0x82f   :  { %v5514_v15 = vadd.f32 %v5513_v13, %v5500_v14 }
 0x830   :  { %v5476_v19 = vpop.f32.mrf.mxu1 }
 0x834   :  { %v5515_v20 = vpop.f32.mrf.mxu3 }
 0x836   :  { %v5502_v53 = vpop.f32.mrf.mxu2 }
 0x842   :  { %v5709_v17 = vpop.f32.mrf.mxu0 }
 0x844   :  { %v5722_v18 = vpop.f32.mrf.mxu1 }
 0x845   :  { %v5723_v21 = vadd.f32 %v5722_v18, %v5709_v17 }
 0x847   :  { %5790 = vmatpush.msrb.mxu1 %v5723_v21 }
 0x848   :  { %v5735_v23 = vpop.f32.mrf.mxu3 }
 0x849   :  { %5791 = vmatpush.msrb.mxu1 %v5488_v12 }
 0x84a   :  { %v5748_v25 = vpop.f32.mrf.mxu2  ;;  %v5711_v24 = vpop.f32.mrf.mxu0 }
 0x84b   :  { %v5749_v26 = vadd.f32 %v5748_v25, %v5735_v23  ;;  %5792 = vmatpush.msrb.mxu1 %v5253_v63 }
 0x84c   :  { %v5724_v28 = vpop.f32.mrf.mxu1 }
 0x84d   :  { %5793 = vmatpush.msrb.mxu1 %v5018_v56  ;;  %5810 = vmatpush.msrb.mxu0 %v5749_v26 }
 0x84e   :  { %8502 = vmatmul.msk.f32.vlgmr.msrb.gmra.mxu1 %vm5768_vm14, %v5757_v27 }
 0x84f   :  { %5811 = vmatpush.msrb.mxu0 %v5514_v15 }
 0x850   :  { %v5737_v29 = vpop.f32.mrf.mxu3 }
 0x851   :  { %5812 = vmatpush.msrb.mxu0 %v5279_v1 }
 0x852   :  { %v5750_v30 = vpop.f32.mrf.mxu2 }
 0x853   :  { %5813 = vmatpush.msrb.mxu0 %v5044_v22 }
 0x854   :  { %8504 = vmatmul.msk.f32.vlgmr.msrb.gmra.mxu0 %vm5768_vm14, %v5757_v27 }
 0x8cb   :  { %v5795_v31 = vpop.f32.mrf.mxu1 }
 0x8cc   :  { %9082 = vtanh.f32 %v5795_v31 }
 0x8d1   :  { %v5815_v59 = vpop.f32.mrf.mxu0 }
 0x8d2   :  { %v9083_v32 = vpop.eup %9082  ;;  %9084 = vtanh.f32 %v5815_v59 }
 0x8d3   :  { %5820 = vst [vmem:[%s11482_s13] sm:$0x3f] %v9083_v32 }
 0x8d8   :  { %v9085_v33 = vpop.eup %9084 }
 0x8d9   :  { %5821 = vst [vmem:[%s11482_s13 + $0x8] sm:$0x3f] %v9085_v33 }
 0x8da   :  { %5826 = vsyncpa [#allocation8], 1 }
 0x8db   :  { %5827 = vsyncpa [#allocation10], 1 }

</bundles_post_ra>
